<compile_context>
chip_gen: v7x
topology: tpu7x:2x2x1
jax: 0.10.0
libtpu: 0.0.40
codegen_flags: <defaults>
</compile_context>

<pallas_src>
import jax
import jax.numpy as jnp
from jax.experimental import pallas as pl
from jax.experimental.pallas import tpu as pltpu

IN_FEATURES = 784          # 28 * 28, matches x.view(B, -1)
K_PAD = 896                # 784 padded up to a multiple of 128 lanes
OUT_CLASSES = 10
OUT_PAD = 128              # fc4 output padded to one full lane tile
H1, H2, H3 = 1024, 512, 128
EPS = 1e-5


def _round_up(x, m):
    return (x + m - 1) // m * m


def mlp_kernel(x_ref,
               w1_ref, b1_ref,
               w2_ref, b2_ref,
               w3_ref, b3_ref,
               w4_ref, b4_ref,
               o_ref):
    """One (TM, K_PAD) row tile of the batch through all four fused layers.

    x and the BN-folded weights are bf16 (MXU-native); shifts are f32 (1, N).
    Every matmul accumulates in f32 on the MXU; shift + ReLU run in f32 on the
    VPU and the activation is stored back as bf16 to cut vreg/spill traffic.
    """
    # fc1 (+ folded bn1) + relu      (dropout = identity in eval mode)
    h = jnp.dot(x_ref[...], w1_ref[...], preferred_element_type=jnp.float32)
    h = jnp.maximum(h + b1_ref[...], 0.0).astype(jnp.bfloat16)

    # fc2 (+ folded bn2) + relu
    h = jnp.dot(h, w2_ref[...], preferred_element_type=jnp.float32)
    h = jnp.maximum(h + b2_ref[...], 0.0).astype(jnp.bfloat16)

    # fc3 (+ folded bn3) + relu
    h = jnp.dot(h, w3_ref[...], preferred_element_type=jnp.float32)
    h = jnp.maximum(h + b3_ref[...], 0.0).astype(jnp.bfloat16)

    # fc4 (plain linear; output padded to 128 lanes -> unmasked lane-dense store)
    o_ref[...] = (jnp.dot(h, w4_ref[...], preferred_element_type=jnp.float32)
                  + b4_ref[...])


def prepare_params(params):
    """One-time (offline) parameter preparation.

    Folds BatchNorm into the preceding Linear layer:
        BN(x @ W + b) = x @ (W * scale) + (b * scale + beta - mean * scale)
    then casts the folded weights to bf16 and pads to lane-dense shapes.
    """
    (w1, lb1, g1, be1, m1, v1,
     w2, lb2, g2, be2, m2, v2,
     w3, lb3, g3, be3, m3, v3,
     w4, lb4) = params

    def fold(w, lin_b, gamma, beta, mean, var):
        scale = gamma / jnp.sqrt(var + EPS)                     # (N,)
        w_f = (w * scale[None, :]).astype(jnp.bfloat16)         # (K, N) bf16
        shift = lin_b * scale + beta - mean * scale             # (N,) f32
        return w_f, shift.reshape(1, -1).astype(jnp.float32)

    w1f, b1f = fold(w1, lb1, g1, be1, m1, v1)
    w1f = jnp.pad(w1f, ((0, K_PAD - IN_FEATURES), (0, 0)))      # zero rows -> inert
    w2f, b2f = fold(w2, lb2, g2, be2, m2, v2)
    w3f, b3f = fold(w3, lb3, g3, be3, m3, v3)
    w4f = jnp.pad(w4.astype(jnp.bfloat16), ((0, 0), (0, OUT_PAD - OUT_CLASSES)))
    b4f = jnp.pad(lb4.reshape(1, -1).astype(jnp.float32),
                  ((0, 0), (0, OUT_PAD - OUT_CLASSES)))
    return (w1f, b1f, w2f, b2f, w3f, b3f, w4f, b4f)


def _choose_tiling(B, tile_m):
    """Pick (tm, b_pad) such that:
      * tm divides b_pad exactly (no partial tail tile),
      * tm is a multiple of 16 (bf16 packs 16 rows per vreg sublane-wise),
      * batch padding waste is bounded by 127 rows (128-granularity pad),
      * any batch > 128 rows gets >= 2 grid steps so the "parallel" batch axis
        is actually split across both TensorCores on v7x.
    """
    if B <= 128:
        tm = _round_up(max(B, 1), 16)        # single sublane-16-aligned tile
        return tm, tm
    b_pad = _round_up(B, 128)                # <=127 rows of dead padding
    k = b_pad // 128
    n = min(max(2, pl.cdiv(b_pad, tile_m)), k)   # >=2 steps for v7x megacore
    while k % n:                             # equal 128-multiple tiles, no tail waste
        n += 1
    return b_pad // n, b_pad


def mlp_forward(x_nchw, prepared, *, tile_m=512):
    """Eval-mode forward pass.

    tile_m: upper bound on batch rows per grid step.  512 amortizes the ~0.35 us
    per-grid-step overhead on v6e/v5e (128 MiB VMEM); keep >=256 on v5e.  The
    working set at tile_m<=1024 stays well under the 32 MiB VMEM limit on v7x.
    """
    B = x_nchw.shape[0]
    x = x_nchw.reshape(B, -1)                                   # == x.view(B, -1)
    assert x.shape[1] == IN_FEATURES

    tm, b_pad = _choose_tiling(B, max(128, tile_m))
    # bf16 input halves the activation HBM->VMEM DMA and feeds the MXU its
    # native dtype; padding rows/cols are zero and mathematically inert.
    x = jnp.pad(x.astype(jnp.bfloat16),
                ((0, b_pad - B), (0, K_PAD - IN_FEATURES)))

    (w1f, b1f, w2f, b2f, w3f, b3f, w4f, b4f) = prepared

    const = lambda i: (0, 0)   # weights / shifts stay resident across the batch grid

    out = pl.pallas_call(
        mlp_kernel,
        out_shape=jax.ShapeDtypeStruct((b_pad, OUT_PAD), jnp.float32),
        grid_spec=pltpu.PrefetchScalarGridSpec(
            num_scalar_prefetch=0,
            grid=(b_pad // tm,),
            in_specs=[
                pl.BlockSpec((tm, K_PAD), lambda i: (i, 0)),    # x row tile (bf16)
                pl.BlockSpec((K_PAD, H1), const),               # w1 (bf16, BN-folded)
                pl.BlockSpec((1, H1), const),                   # shift1 (f32)
                pl.BlockSpec((H1, H2), const),                  # w2
                pl.BlockSpec((1, H2), const),                   # shift2
                pl.BlockSpec((H2, H3), const),                  # w3
                pl.BlockSpec((1, H3), const),                   # shift3
                pl.BlockSpec((H3, OUT_PAD), const),             # w4 (padded to 128 cols)
                pl.BlockSpec((1, OUT_PAD), const),              # b4 (padded)
            ],
            out_specs=pl.BlockSpec((tm, OUT_PAD), lambda i: (i, 0)),
        ),
        compiler_params=pltpu.CompilerParams(
            dimension_semantics=("parallel",),    # shard batch tiles across TCs on v7x
            vmem_limit_bytes=32 << 20,            # under v7x's 64 MiB physical VMEM
        ),
    )(x, w1f, b1f, w2f, b2f, w3f, b3f, w4f, b4f)

    return out[:B, :OUT_CLASSES]


def init_params(key):
    ks = jax.random.split(key, 16)
    dims = [(784, 1024), (1024, 512), (512, 128), (128, 10)]
    params = []
    ki = 0
    for li, (din, dout) in enumerate(dims):
        w = (jax.random.normal(ks[ki], (din, dout), jnp.float32)
             * (1.0 / jnp.sqrt(din)))                           # weight, stored (in, out)
        ki += 1
        lb = jax.random.normal(ks[ki], (dout,), jnp.float32) * 0.01
        ki += 1
        params.extend([w, lb])
        if li < 3:  # BatchNorm params for bn1/bn2/bn3
            gamma = 1.0 + 0.1 * jax.random.normal(ks[ki], (dout,), jnp.float32)
            ki += 1
            beta = 0.05 * jax.random.normal(ks[ki], (dout,), jnp.float32)
            ki += 1
            mean = 0.02 * jnp.arange(dout, dtype=jnp.float32) / dout
            var = 1.0 + 0.1 * jnp.cos(jnp.arange(dout, dtype=jnp.float32))
            params.extend([gamma, beta, mean, var])
    return tuple(params)


def reference_forward(x_nchw, params):
    """Full f32 reference matching the PyTorch module (eval mode)."""
    B = x_nchw.shape[0]
    x = x_nchw.reshape(B, -1).astype(jnp.float32)
    (w1, lb1, g1, be1, m1, v1,
     w2, lb2, g2, be2, m2, v2,
     w3, lb3, g3, be3, m3, v3,
     w4, lb4) = params

    def layer(h, w, lb, g, be, m, v):
        h = h @ w + lb
        h = (h - m) / jnp.sqrt(v + EPS) * g + be
        return jnp.maximum(h, 0.0)

    h = layer(x, w1, lb1, g1, be1, m1, v1)
    h = layer(h, w2, lb2, g2, be2, m2, v2)
    h = layer(h, w3, lb3, g3, be3, m3, v3)
    return h @ w4 + lb4


def emulated_forward(x_nchw, prepared):
    """Plain-JAX emulation of the kernel's bf16-input / f32-accumulate math."""
    B = x_nchw.shape[0]
    x = x_nchw.reshape(B, -1).astype(jnp.bfloat16)
    x = jnp.pad(x, ((0, 0), (0, K_PAD - IN_FEATURES)))
    (w1f, b1f, w2f, b2f, w3f, b3f, w4f, b4f) = prepared
    h = jnp.maximum(jnp.dot(x, w1f, preferred_element_type=jnp.float32) + b1f,
                    0.0).astype(jnp.bfloat16)
    h = jnp.maximum(jnp.dot(h, w2f, preferred_element_type=jnp.float32) + b2f,
                    0.0).astype(jnp.bfloat16)
    h = jnp.maximum(jnp.dot(h, w3f, preferred_element_type=jnp.float32) + b3f,
                    0.0).astype(jnp.bfloat16)
    out = jnp.dot(h, w4f, preferred_element_type=jnp.float32) + b4f
    return out[:, :OUT_CLASSES]


if __name__ == "__main__":
    key = jax.random.PRNGKey(0)
    pkey, xkey1, xkey2 = jax.random.split(key, 3)
    params = init_params(pkey)
    prepared = prepare_params(params)   # offline: fold BN, cast bf16, pad

    # MNIST-like input: batch=8, NCHW (8, 1, 28, 28) -> flattened 784 features.
    x = jax.random.normal(xkey1, (8, 1, 28, 28), jnp.float32)
    out = jax.block_until_ready(mlp_forward(x, prepared))
    assert out.shape == (8, 10)

    # Tight check against a plain-JAX emulation of the same bf16 math.
    ref_bf16 = emulated_forward(x, prepared)
    err_bf16 = float(jnp.max(jnp.abs(out - ref_bf16)))
    assert jnp.allclose(out, ref_bf16, atol=5e-3, rtol=5e-3), err_bf16

    # Looser check against the full-precision f32 reference (bf16 rounding).
    ref_f32 = reference_forward(x, params)
    err_f32 = float(jnp.max(jnp.abs(out - ref_f32)))
    assert jnp.allclose(out, ref_f32, atol=2e-1, rtol=2e-1), err_f32

    # Awkward batch (300 rows): exercises the multi-step grid, the 128-granularity
    # batch padding, and the >=2-step megacore path.
    x2 = jax.random.normal(xkey2, (300, 1, 28, 28), jnp.float32)
    out2 = jax.block_until_ready(mlp_forward(x2, prepared))
    assert out2.shape == (300, 10)
    ref2 = emulated_forward(x2, prepared)
    err2 = float(jnp.max(jnp.abs(out2 - ref2)))
    assert jnp.allclose(out2, ref2, atol=5e-3, rtol=5e-3), err2

    print("KERNEL_OK")
</pallas_src>

<mosaic_0001>
module attributes {stable_mosaic.version = 11 : i64} {
  func.func @mlp_kernel(%arg0: i32, %arg1: memref<16x896xbf16, #tpu.memory_space<vmem>>, %arg2: memref<896x1024xbf16, #tpu.memory_space<vmem>>, %arg3: memref<1x1024xf32, #tpu.memory_space<vmem>>, %arg4: memref<1024x512xbf16, #tpu.memory_space<vmem>>, %arg5: memref<1x512xf32, #tpu.memory_space<vmem>>, %arg6: memref<512x128xbf16, #tpu.memory_space<vmem>>, %arg7: memref<1x128xf32, #tpu.memory_space<vmem>>, %arg8: memref<128x128xbf16, #tpu.memory_space<vmem>>, %arg9: memref<1x128xf32, #tpu.memory_space<vmem>>, %arg10: memref<16x128xf32, #tpu.memory_space<vmem>>) attributes {dimension_semantics = [#tpu.dimension_semantics<parallel>], iteration_bounds = array<i64: 1>, scalar_prefetch = 0 : i64, scratch_operands = 0 : i64, tpu.core_type = #tpu.core_type<tc>, window_params = [{transform_indices = @transform_0, window_bounds = array<i64: 16, 896>}, {pipeline_mode = #tpu.pipeline_mode<synchronous>, transform_indices = @transform_1, window_bounds = array<i64: 896, 1024>}, {pipeline_mode = #tpu.pipeline_mode<synchronous>, transform_indices = @transform_2, window_bounds = array<i64: 1, 1024>}, {pipeline_mode = #tpu.pipeline_mode<synchronous>, transform_indices = @transform_3, window_bounds = array<i64: 1024, 512>}, {pipeline_mode = #tpu.pipeline_mode<synchronous>, transform_indices = @transform_4, window_bounds = array<i64: 1, 512>}, {pipeline_mode = #tpu.pipeline_mode<synchronous>, transform_indices = @transform_5, window_bounds = array<i64: 512, 128>}, {pipeline_mode = #tpu.pipeline_mode<synchronous>, transform_indices = @transform_6, window_bounds = array<i64: 1, 128>}, {pipeline_mode = #tpu.pipeline_mode<synchronous>, transform_indices = @transform_7, window_bounds = array<i64: 128, 128>}, {pipeline_mode = #tpu.pipeline_mode<synchronous>, transform_indices = @transform_8, window_bounds = array<i64: 1, 128>}, {transform_indices = @transform_9, window_bounds = array<i64: 16, 128>}]} {
    %c0 = arith.constant 0 : index
    %c0_0 = arith.constant 0 : index
    %0 = vector.load %arg1[%c0, %c0_0] : memref<16x896xbf16, #tpu.memory_space<vmem>>, vector<16x896xbf16>
    %c0_1 = arith.constant 0 : index
    %c0_2 = arith.constant 0 : index
    %1 = vector.load %arg2[%c0_1, %c0_2] : memref<896x1024xbf16, #tpu.memory_space<vmem>>, vector<896x1024xbf16>
    %cst = arith.constant dense<0.000000e+00> : vector<16x1024xf32>
    %2 = tpu.matmul %0, %1, %cst {dimension_numbers = #tpu.dot_dimension_numbers<[1], [0], [0], [1], [0, 0, 1, 1], [], []>} : vector<16x896xbf16>, vector<896x1024xbf16>, vector<16x1024xf32> -> vector<16x1024xf32>
    %c0_3 = arith.constant 0 : index
    %c0_4 = arith.constant 0 : index
    %3 = vector.load %arg3[%c0_3, %c0_4] : memref<1x1024xf32, #tpu.memory_space<vmem>>, vector<1x1024xf32>
    %4 = vector.broadcast %3 : vector<1x1024xf32> to vector<16x1024xf32>
    %5 = arith.addf %2, %4 : vector<16x1024xf32>
    %cst_5 = arith.constant 0.000000e+00 : f32
    %6 = vector.broadcast %cst_5 : f32 to vector<16x1024xf32>
    %7 = arith.maximumf %5, %6 : vector<16x1024xf32>
    %8 = arith.truncf %7 : vector<16x1024xf32> to vector<16x1024xbf16>
    %c0_6 = arith.constant 0 : index
    %c0_7 = arith.constant 0 : index
    %9 = vector.load %arg4[%c0_6, %c0_7] : memref<1024x512xbf16, #tpu.memory_space<vmem>>, vector<1024x512xbf16>
    %cst_8 = arith.constant dense<0.000000e+00> : vector<16x512xf32>
    %10 = tpu.matmul %8, %9, %cst_8 {dimension_numbers = #tpu.dot_dimension_numbers<[1], [0], [0], [1], [0, 0, 1, 1], [], []>} : vector<16x1024xbf16>, vector<1024x512xbf16>, vector<16x512xf32> -> vector<16x512xf32>
    %c0_9 = arith.constant 0 : index
    %c0_10 = arith.constant 0 : index
    %11 = vector.load %arg5[%c0_9, %c0_10] : memref<1x512xf32, #tpu.memory_space<vmem>>, vector<1x512xf32>
    %12 = vector.broadcast %11 : vector<1x512xf32> to vector<16x512xf32>
    %13 = arith.addf %10, %12 : vector<16x512xf32>
    %cst_11 = arith.constant 0.000000e+00 : f32
    %14 = vector.broadcast %cst_11 : f32 to vector<16x512xf32>
    %15 = arith.maximumf %13, %14 : vector<16x512xf32>
    %16 = arith.truncf %15 : vector<16x512xf32> to vector<16x512xbf16>
    %c0_12 = arith.constant 0 : index
    %c0_13 = arith.constant 0 : index
    %17 = vector.load %arg6[%c0_12, %c0_13] : memref<512x128xbf16, #tpu.memory_space<vmem>>, vector<512x128xbf16>
    %cst_14 = arith.constant dense<0.000000e+00> : vector<16x128xf32>
    %18 = tpu.matmul %16, %17, %cst_14 {dimension_numbers = #tpu.dot_dimension_numbers<[1], [0], [0], [1], [0, 0, 1, 1], [], []>} : vector<16x512xbf16>, vector<512x128xbf16>, vector<16x128xf32> -> vector<16x128xf32>
    %c0_15 = arith.constant 0 : index
    %c0_16 = arith.constant 0 : index
    %19 = vector.load %arg7[%c0_15, %c0_16] : memref<1x128xf32, #tpu.memory_space<vmem>>, vector<1x128xf32>
    %20 = vector.broadcast %19 : vector<1x128xf32> to vector<16x128xf32>
    %21 = arith.addf %18, %20 : vector<16x128xf32>
    %cst_17 = arith.constant 0.000000e+00 : f32
    %22 = vector.broadcast %cst_17 : f32 to vector<16x128xf32>
    %23 = arith.maximumf %21, %22 : vector<16x128xf32>
    %24 = arith.truncf %23 : vector<16x128xf32> to vector<16x128xbf16>
    %c0_18 = arith.constant 0 : index
    %c0_19 = arith.constant 0 : index
    %25 = vector.load %arg8[%c0_18, %c0_19] : memref<128x128xbf16, #tpu.memory_space<vmem>>, vector<128x128xbf16>
    %cst_20 = arith.constant dense<0.000000e+00> : vector<16x128xf32>
    %26 = tpu.matmul %24, %25, %cst_20 {dimension_numbers = #tpu.dot_dimension_numbers<[1], [0], [0], [1], [0, 0, 1, 1], [], []>} : vector<16x128xbf16>, vector<128x128xbf16>, vector<16x128xf32> -> vector<16x128xf32>
    %c0_21 = arith.constant 0 : index
    %c0_22 = arith.constant 0 : index
    %27 = vector.load %arg9[%c0_21, %c0_22] : memref<1x128xf32, #tpu.memory_space<vmem>>, vector<1x128xf32>
    %28 = vector.broadcast %27 : vector<1x128xf32> to vector<16x128xf32>
    %29 = arith.addf %26, %28 : vector<16x128xf32>
    %c0_23 = arith.constant 0 : index
    %c0_24 = arith.constant 0 : index
    %30 = vector.load %arg10[%c0_23, %c0_24] : memref<16x128xf32, #tpu.memory_space<vmem>>, vector<16x128xf32>
    tpu.vector_store %arg10[%c0_23, %c0_24], %29 {strides = array<i32>} : memref<16x128xf32, #tpu.memory_space<vmem>>, vector<16x128xf32>,
    return
  }
  func.func @transform_0(%arg0: i32) -> (i32, i32) {
    %c0_i32 = arith.constant 0 : i32
    %c0_i32_0 = arith.constant 0 : i32
    return %arg0, %c0_i32 : i32, i32
  }
  func.func @transform_1(%arg0: i32) -> (i32, i32) {
    %c0_i32 = arith.constant 0 : i32
    %c0_i32_0 = arith.constant 0 : i32
    %c0_i32_1 = arith.constant 0 : i32
    return %c0_i32, %c0_i32_0 : i32, i32
  }
  func.func @transform_2(%arg0: i32) -> (i32, i32) {
    %c0_i32 = arith.constant 0 : i32
    %c0_i32_0 = arith.constant 0 : i32
    %c0_i32_1 = arith.constant 0 : i32
    return %c0_i32, %c0_i32_0 : i32, i32
  }
  func.func @transform_3(%arg0: i32) -> (i32, i32) {
    %c0_i32 = arith.constant 0 : i32
    %c0_i32_0 = arith.constant 0 : i32
    %c0_i32_1 = arith.constant 0 : i32
    return %c0_i32, %c0_i32_0 : i32, i32
  }
  func.func @transform_4(%arg0: i32) -> (i32, i32) {
    %c0_i32 = arith.constant 0 : i32
    %c0_i32_0 = arith.constant 0 : i32
    %c0_i32_1 = arith.constant 0 : i32
    return %c0_i32, %c0_i32_0 : i32, i32
  }
  func.func @transform_5(%arg0: i32) -> (i32, i32) {
    %c0_i32 = arith.constant 0 : i32
    %c0_i32_0 = arith.constant 0 : i32
    %c0_i32_1 = arith.constant 0 : i32
    return %c0_i32, %c0_i32_0 : i32, i32
  }
  func.func @transform_6(%arg0: i32) -> (i32, i32) {
    %c0_i32 = arith.constant 0 : i32
    %c0_i32_0 = arith.constant 0 : i32
    %c0_i32_1 = arith.constant 0 : i32
    return %c0_i32, %c0_i32_0 : i32, i32
  }
  func.func @transform_7(%arg0: i32) -> (i32, i32) {
    %c0_i32 = arith.constant 0 : i32
    %c0_i32_0 = arith.constant 0 : i32
    %c0_i32_1 = arith.constant 0 : i32
    return %c0_i32, %c0_i32_0 : i32, i32
  }
  func.func @transform_8(%arg0: i32) -> (i32, i32) {
    %c0_i32 = arith.constant 0 : i32
    %c0_i32_0 = arith.constant 0 : i32
    %c0_i32_1 = arith.constant 0 : i32
    return %c0_i32, %c0_i32_0 : i32, i32
  }
  func.func @transform_9(%arg0: i32) -> (i32, i32) {
    %c0_i32 = arith.constant 0 : i32
    %c0_i32_0 = arith.constant 0 : i32
    return %arg0, %c0_i32 : i32, i32
  }
}

</mosaic_0001>

<bundles_post_ra>
// kernel: tpu_custom_call.1
= control target key start
LH: loop header
LB: loop body
LE: loop exit
PB: predicated region body
PF: predicated region fallthrough
CT: control target
= control target key end

     0   :  { %14 = vsyncpa [#allocation3], 0  ;;  %s7907_s0 = inlined_call_operand.hbm [shape: bf16[16,896], index: 0, kind: input, shape index: {}]   ;;  %s7908_s1 = inlined_call_operand.hbm [shape: bf16[896,1024], index: 1, kind: input, shape index: {}]   ;;  %s7909_s2 = inlined_call_operand.hbm [shape: f32[1,1024], index: 2, kind: input, shape index: {}]   ;;  %s7910_s3 = inlined_call_operand.hbm [shape: bf16[1024,512], index: 3, kind: input, shape index: {}]   ;;  %s7911_s4 = inlined_call_operand.hbm [shape: f32[1,512], index: 4, kind: input, shape index: {}]   ;;  %s7912_s5 = inlined_call_operand.hbm [shape: bf16[512,128], index: 5, kind: input, shape index: {}]   ;;  %s7913_s6 = inlined_call_operand.hbm [shape: f32[1,128], index: 6, kind: input, shape index: {}]   ;;  %s7914_s7 = inlined_call_operand.hbm [shape: bf16[128,128], index: 7, kind: input, shape index: {}]   ;;  %s7915_s8 = inlined_call_operand.hbm [shape: f32[1,128], index: 8, kind: input, shape index: {}]   ;;  %s7916_s9 = inlined_call_operand.hbm [shape: f32[16,128], index: 9, kind: output, shape index: {}]  }
   0x1   :  { %15 = vsyncpa [#allocation6], 0 }
   0x2   :  { %16 = vsyncpa [#allocation9], 0 }
   0x3   :  { %17 = vsyncpa [#allocation12], 0 }
   0x4   :  { %18 = vsyncpa [#allocation15], 0 }
   0x5   :  { %19 = vsyncpa [#allocation4], 0  ;;  %s7649_s30 = smov [#allocation5]   ;;  %s7417_s13 = scalar_lea.hbm %s7908_s1, 57344 }
   0x6   :  { %s37_s10 = sshll.u32 %s7649_s30, 4  ;;  %p7418_p0 = scmp.ne.s32.totalorder %s7908_s1, %s7417_s13  ;;  %s38_s10 = int_to_ptr.vmem [resolvable:$true] %s37_s10 }
   0x7   :  { %p7421_p1 = scmp.lt.u32.totalorder %s7417_s13, %s7908_s1 }
   0x9   :  { %p7423_p2 = pnand %p7421_p1, %p7418_p0 }
   0xb   :  { %7426 = shalt.err (!%p7423_p2)
}
   0xc   :  { %s7427_s18 = scalar_lea.vmem %s38_s10, 57344  ;;  %p7432_p4 = scmp.lt.s32.totalorder %s38_s10, %s38_s10 }
   0xd   :  { %p7428_p3 = scmp.ne.s32.totalorder %s38_s10, %s7427_s18  ;;  %p7433_p5 = scmp.lt.s32.totalorder %s7427_s18, %s7427_s18 }
   0xf   :  { %p7434_p6 = por %p7433_p5, %p7432_p4 }
  0x11   :  { %p7435_p7 = pnand %p7434_p6, %p7428_p3 }
  0x13   :  { %7438 = shalt.err (!%p7435_p7)
}
  0x14   :  { %s7650_s19 = smov 512   ;;  %s7651_s20 = smov 32  }
  0x15   :  { %43 = dma.hbm_to_vmem [thread:$0]  %s7908_s1, 57344, %s38_s10, [#allocation6], %s7650_s19, %s7650_s19, %s7651_s20  }
  0x16   :  { %s7652_s23 = smov [#allocation8]   ;;  %s7439_s27 = scalar_lea.hbm %s7910_s3, 32768 }
  0x17   :  { %s59_s24 = sshll.u32 %s7652_s23, 4  ;;  %p7440_p8 = scmp.ne.s32.totalorder %s7910_s3, %s7439_s27  ;;  %s60_s24 = int_to_ptr.vmem [resolvable:$true] %s59_s24 }
  0x18   :  { %p7443_p9 = scmp.lt.u32.totalorder %s7439_s27, %s7910_s3 }
  0x1a   :  { %p7445_p10 = pnand %p7443_p9, %p7440_p8 }
  0x1c   :  { %7448 = shalt.err (!%p7445_p10)
}
  0x1d   :  { %s7449_s12 = scalar_lea.vmem %s60_s24, 32768  ;;  %p7454_p12 = scmp.lt.s32.totalorder %s60_s24, %s60_s24 }
  0x1e   :  { %p7450_p11 = scmp.ne.s32.totalorder %s60_s24, %s7449_s12  ;;  %p7455_p13 = scmp.lt.s32.totalorder %s7449_s12, %s7449_s12 }
  0x20   :  { %p7456_p0 = por %p7455_p13, %p7454_p12 }
  0x22   :  { %p7457_p1 = pnand %p7456_p0, %p7450_p11 }
  0x24   :  { %7460 = shalt.err (!%p7457_p1)
}
  0x25   :  { %s7653_s1 = smov 256   ;;  %s7654_s10 = smov 16  }
  0x26   :  { %65 = dma.hbm_to_vmem [thread:$0]  %s7910_s3, 32768, %s60_s24, [#allocation9], %s7653_s1, %s7653_s1, %s7654_s10  }
  0x27   :  { %s7655_s15 = smov [#allocation11]   ;;  %s7461_s19 = scalar_lea.hbm %s7912_s5, 4096 }
  0x28   :  { %s81_s16 = sshll.u32 %s7655_s15, 4  ;;  %p7462_p2 = scmp.ne.s32.totalorder %s7912_s5, %s7461_s19  ;;  %s82_s16 = int_to_ptr.vmem [resolvable:$true] %s81_s16 }
  0x29   :  { %p7465_p3 = scmp.lt.u32.totalorder %s7461_s19, %s7912_s5 }
  0x2b   :  { %p7467_p4 = pnand %p7465_p3, %p7462_p2 }
  0x2d   :  { %7470 = shalt.err (!%p7467_p4)
}
  0x2e   :  { %s7471_s25 = scalar_lea.vmem %s82_s16, 4096  ;;  %p7476_p6 = scmp.lt.s32.totalorder %s82_s16, %s82_s16 }
  0x2f   :  { %p7472_p5 = scmp.ne.s32.totalorder %s82_s16, %s7471_s25  ;;  %p7477_p7 = scmp.lt.s32.totalorder %s7471_s25, %s7471_s25 }
  0x31   :  { %p7478_p8 = por %p7477_p7, %p7476_p6 }
  0x33   :  { %p7479_p9 = pnand %p7478_p8, %p7472_p5 }
  0x35   :  { %7482 = shalt.err (!%p7479_p9)
}
  0x36   :  { %s7656_s3 = smov 64   ;;  %s7657_s24 = smov 4  }
  0x37   :  { %87 = dma.hbm_to_vmem [thread:$0]  %s7912_s5, 4096, %s82_s16, [#allocation12], %s7656_s3, %s7656_s3, %s7657_s24  }
  0x38   :  { %s7658_s28 = smov [#allocation14]   ;;  %s7659_s30 = smov [#allocation2]  }
  0x39   :  { %s103_s29 = sshll.u32 %s7658_s28, 4  ;;  %s25_s11 = sshll.u32 %s7659_s30, 4  ;;  %s104_s29 = int_to_ptr.vmem [resolvable:$true] %s103_s29  ;;  %s26_s11 = int_to_ptr.vmem [resolvable:$true] %s25_s11 }
  0x3a   :  { %s7483_s10 = scalar_lea.hbm %s7914_s7, 1024 }
  0x3b   :  { %p7484_p10 = scmp.ne.s32.totalorder %s7914_s7, %s7483_s10  ;;  %p7487_p11 = scmp.lt.u32.totalorder %s7483_s10, %s7914_s7 }
  0x3d   :  { %p7489_p12 = pnand %p7487_p11, %p7484_p10 }
  0x3f   :  { %7492 = shalt.err (!%p7489_p12)
}
  0x40   :  { %s7493_s5 = scalar_lea.vmem %s104_s29, 1024  ;;  %p7498_p0 = scmp.lt.s32.totalorder %s104_s29, %s104_s29 }
  0x41   :  { %p7494_p13 = scmp.ne.s32.totalorder %s104_s29, %s7493_s5  ;;  %p7499_p1 = scmp.lt.s32.totalorder %s7493_s5, %s7493_s5 }
  0x43   :  { %p7500_p2 = por %p7499_p1, %p7498_p0 }
  0x45   :  { %p7501_p3 = pnand %p7500_p2, %p7494_p13 }
  0x47   :  { %7504 = shalt.err (!%p7501_p3)
}
  0x48   :  { %109 = dma.hbm_to_vmem [thread:$0]  %s7914_s7, 1024, %s104_s29, [#allocation15], %s7656_s3, %s7656_s3, %s7657_s24  }
  0x49   :  { %s7505_s21 = scalar_lea.hbm %s7907_s0, 896 }
  0x4a   :  { %p7506_p4 = scmp.ne.s32.totalorder %s7907_s0, %s7505_s21  ;;  %p7509_p5 = scmp.lt.u32.totalorder %s7505_s21, %s7907_s0 }
  0x4c   :  { %p7511_p6 = pnand %p7509_p5, %p7506_p4 }
  0x4e   :  { %7514 = shalt.err (!%p7511_p6)
}
  0x4f   :  { %s7515_s27 = scalar_lea.vmem %s26_s11, 896  ;;  %p7520_p8 = scmp.lt.s32.totalorder %s26_s11, %s26_s11 }
  0x50   :  { %p7516_p7 = scmp.ne.s32.totalorder %s26_s11, %s7515_s27  ;;  %p7521_p9 = scmp.lt.s32.totalorder %s7515_s27, %s7515_s27 }
  0x52   :  { %p7522_p10 = por %p7521_p9, %p7520_p8 }
  0x54   :  { %p7523_p11 = pnand %p7522_p10, %p7516_p7 }
  0x56   :  { %7526 = shalt.err (!%p7523_p11)
}
  0x57   :  { %s7660_s7 = smov 448   ;;  %s7661_s3 = smov 28  }
  0x58   :  { %31 = dma.hbm_to_vmem [thread:$0]  %s7907_s0, 896, %s26_s11, [#allocation3], %s7660_s7, %s7660_s7, %s7661_s3  }
  0x59   :  { %s7662_s29 = smov [#allocation7]   ;;  %s7663_s12 = smov [#allocation10]  }
  0x5a   :  { %s50_s30 = sshll.u32 %s7662_s29, 4  ;;  %s72_s1 = sshll.u32 %s7663_s12, 4  ;;  %s51_s30 = int_to_ptr.vmem [resolvable:$true] %s50_s30  ;;  %s73_s1 = int_to_ptr.vmem [resolvable:$true] %s72_s1 }
  0x5b   :  { %s7527_s14 = scalar_lea.hbm %s7909_s2, 128 }
  0x5c   :  { %p7528_p12 = scmp.ne.s32.totalorder %s7909_s2, %s7527_s14  ;;  %p7531_p13 = scmp.lt.u32.totalorder %s7527_s14, %s7909_s2 }
  0x5e   :  { %p7533_p0 = pnand %p7531_p13, %p7528_p12 }
  0x60   :  { %7536 = shalt.err (!%p7533_p0)
}
  0x61   :  { %s7537_s0 = scalar_lea.vmem %s51_s30, 128  ;;  %p7542_p2 = scmp.lt.s32.totalorder %s51_s30, %s51_s30 }
  0x62   :  { %p7538_p1 = scmp.ne.s32.totalorder %s51_s30, %s7537_s0  ;;  %p7543_p3 = scmp.lt.s32.totalorder %s7537_s0, %s7537_s0 }
  0x64   :  { %p7544_p4 = por %p7543_p3, %p7542_p2 }
  0x66   :  { %p7545_p5 = pnand %p7544_p4, %p7538_p1 }
  0x68   :  { %7548 = shalt.err (!%p7545_p5)
}
  0x69   :  { %53 = dma.hbm_to_vmem [thread:$0]  %s7909_s2, 128, %s51_s30, [#allocation6]  }
  0x6a   :  { %s7549_s21 = scalar_lea.hbm %s7911_s4, 64 }
  0x6b   :  { %p7550_p6 = scmp.ne.s32.totalorder %s7911_s4, %s7549_s21  ;;  %p7553_p7 = scmp.lt.u32.totalorder %s7549_s21, %s7911_s4 }
  0x6d   :  { %p7555_p8 = pnand %p7553_p7, %p7550_p6 }
  0x6f   :  { %7558 = shalt.err (!%p7555_p8)
}
  0x70   :  { %s7559_s27 = scalar_lea.vmem %s73_s1, 64  ;;  %p7564_p10 = scmp.lt.s32.totalorder %s73_s1, %s73_s1 }
  0x71   :  { %p7560_p9 = scmp.ne.s32.totalorder %s73_s1, %s7559_s27  ;;  %p7565_p11 = scmp.lt.s32.totalorder %s7559_s27, %s7559_s27 }
  0x73   :  { %p7566_p12 = por %p7565_p11, %p7564_p10 }
  0x75   :  { %p7567_p13 = pnand %p7566_p12, %p7560_p9 }
  0x77   :  { %7570 = shalt.err (!%p7567_p13)
}
  0x78   :  { %75 = dma.hbm_to_vmem [thread:$0]  %s7911_s4, 64, %s73_s1, [#allocation9]  }
  0x79   :  { %s7664_s3 = smov [#allocation13]   ;;  %s7665_s28 = smov [#allocation16]  }
  0x7a   :  { %s94_s24 = sshll.u32 %s7664_s3, 4  ;;  %s116_s29 = sshll.u32 %s7665_s28, 4  ;;  %s95_s24 = int_to_ptr.vmem [resolvable:$true] %s94_s24  ;;  %s117_s29 = int_to_ptr.vmem [resolvable:$true] %s116_s29 }
  0x7b   :  { %s7571_s10 = scalar_lea.hbm %s7913_s6, 16 }
  0x7c   :  { %p7572_p0 = scmp.ne.s32.totalorder %s7913_s6, %s7571_s10  ;;  %p7575_p1 = scmp.lt.u32.totalorder %s7571_s10, %s7913_s6 }
  0x7e   :  { %p7577_p2 = pnand %p7575_p1, %p7572_p0 }
  0x80   :  { %7580 = shalt.err (!%p7577_p2)
}
  0x81   :  { %s7581_s4 = scalar_lea.vmem %s95_s24, 16  ;;  %s7585_s1 = scalar_lea.vmem %s95_s24, 32 }
  0x82   :  { %p7582_p3 = scmp.ne.s32.totalorder %s95_s24, %s7581_s4  ;;  %p7586_p4 = scmp.lt.s32.totalorder %s95_s24, %s95_s24 }
  0x83   :  { %p7587_p5 = scmp.lt.s32.totalorder %s7585_s1, %s7581_s4 }
  0x85   :  { %p7588_p6 = por %p7587_p5, %p7586_p4 }
  0x87   :  { %p7589_p7 = pnand %p7588_p6, %p7582_p3 }
  0x89   :  { %7592 = shalt.err (!%p7589_p7)
}
  0x8a   :  { %97 = dma.hbm_to_vmem [thread:$0]  %s7913_s6, 16, %s95_s24, [#allocation12]  }
  0x8b   :  { %s7593_s18 = scalar_lea.hbm %s7915_s8, 16 }
  0x8c   :  { %p7594_p8 = scmp.ne.s32.totalorder %s7915_s8, %s7593_s18  ;;  %p7597_p9 = scmp.lt.u32.totalorder %s7593_s18, %s7915_s8 }
  0x8e   :  { %p7599_p10 = pnand %p7597_p9, %p7594_p8 }
  0x90   :  { %7602 = shalt.err (!%p7599_p10)
}
  0x91   :  { %s7603_s23 = scalar_lea.vmem %s117_s29, 16  ;;  %s7607_s25 = scalar_lea.vmem %s117_s29, 32 }
  0x92   :  { %p7604_p11 = scmp.ne.s32.totalorder %s117_s29, %s7603_s23  ;;  %p7608_p12 = scmp.lt.s32.totalorder %s117_s29, %s117_s29 }
  0x93   :  { %p7609_p13 = scmp.lt.s32.totalorder %s7607_s25, %s7603_s23 }
  0x95   :  { %p7610_p0 = por %p7609_p13, %p7608_p12 }
  0x97   :  { %p7611_p1 = pnand %p7610_p0, %p7604_p11 }
  0x99   :  { %7614 = shalt.err (!%p7611_p1)
}
  0x9a   :  { %119 = dma.hbm_to_vmem [thread:$0]  %s7915_s8, 16, %s117_s29, [#allocation15]  }
  0x9b   :  { %7637 = dma.done.wait [#allocation3], 896  }
  0x9c   :  { %7638 = vsyncadd [#allocation3], 4294966400 }
  0x9d   :  { %7639 = dma.done.wait [#allocation6], 57472  }
  0x9e   :  { %7640 = vsyncadd [#allocation6], 4294909824 }
  0x9f   :  { %7641 = dma.done.wait [#allocation9], 32832  }
  0xa0   :  { %7642 = vsyncadd [#allocation9], 4294934464 }
  0xa1   :  { %7643 = dma.done.wait [#allocation12], 4112  }
  0xa2   :  { %7644 = vsyncadd [#allocation12], 4294963184 }
  0xa3   :  { %7645 = dma.done.wait [#allocation15], 1040  }
  0xa4   :  { %7646 = vsyncadd [#allocation15], 4294966256  ;;  %v156_v0 = vld [vmem:[#allocation5] sm:$0xff]  ;;  %v157_v2 = vld [vmem:[#allocation5 + $0x8] sm:$0xff]  ;;  %vm7668_vm0 = vmmov 0   ;;  %s7669_s8 = smov [#allocation17]  }
  0xa5   :  { %v160_v1 = vld [vmem:[#allocation5 + $0x20] sm:$0xff]  ;;  %v161_v4 = vld [vmem:[#allocation5 + $0x28] sm:$0xff]  ;;  %s6015_s27 = sshll.u32 %s7669_s8, 4  ;;  %s6016_s27 = int_to_ptr.vmem [resolvable:$true] %s6015_s27 }
  0xa6   :  { %v6039_v3 = vcombine.high %v156_v0, %v160_v1  ;;  %v6038_v5 = vcombine.low %v156_v0, %v160_v1  ;;  %v164_v6 = vld [vmem:[#allocation5 + $0x40] sm:$0xff]  ;;  %v6041_v8 = vcombine.high %v157_v2, %v161_v4  ;;  %v6040_v9 = vcombine.low %v157_v2, %v161_v4  ;;  %v165_v11 = vld [vmem:[#allocation5 + $0x48] sm:$0xff]  ;;  %s7615_s2 = scalar_lea.vmem %s6016_s27, 256  ;;  %p7620_p3 = scmp.lt.s32.totalorder %s6016_s27, %s6016_s27 }
  0xa7   :  { %v168_v7 = vld [vmem:[#allocation5 + $0x60] sm:$0xff]  ;;  %v169_v12 = vld [vmem:[#allocation5 + $0x68] sm:$0xff]  ;;  %p7616_p2 = scmp.ne.s32.totalorder %s6016_s27, %s7615_s2  ;;  %p7621_p4 = scmp.lt.s32.totalorder %s7615_s2, %s7615_s2 }
  0xa8   :  { %v6047_v10 = vcombine.high %v164_v6, %v168_v7  ;;  %v172_v13 = vld [vmem:[#allocation5 + $0x80] sm:$0xff]  ;;  %2922 = vmatprep.subr.bf16.mxu0 %v6039_v3  ;;  %v6049_v14 = vcombine.high %v165_v11, %v169_v12  ;;  %v173_v16 = vld [vmem:[#allocation5 + $0x88] sm:$0xff]  ;;  %3094 = vmatprep.subr.bf16.mxu1 %v6041_v8  ;;  %v6046_v18 = vcombine.low %v164_v6, %v168_v7 }
  0xa9   :  { %v176_v15 = vld [vmem:[#allocation5 + $0xa0] sm:$0xff]  ;;  %v177_v17 = vld [vmem:[#allocation5 + $0xa8] sm:$0xff]  ;;  %2923 = vmatpush1.bf16.msra.mxu0 %v6038_v5  ;;  %3095 = vmatpush1.bf16.msra.mxu1 %v6040_v9  ;;  %v6048_v19 = vcombine.low %v165_v11, %v169_v12  ;;  %p7622_p5 = por %p7621_p4, %p7620_p3 }
  0xaa   :  { %2924 = vmatprep.subr.bf16.mxu0 %v6047_v10  ;;  %v6055_v20 = vcombine.high %v172_v13, %v176_v15  ;;  %3096 = vmatprep.subr.bf16.mxu1 %v6049_v14  ;;  %v6057_v21 = vcombine.high %v173_v16, %v177_v17  ;;  %v180_v22 = vld [vmem:[#allocation5 + $0xc0] sm:$0xff]  ;;  %v181_v24 = vld [vmem:[#allocation5 + $0xc8] sm:$0xff]  ;;  %v6054_v26 = vcombine.low %v172_v13, %v176_v15 }
  0xab   :  { %v184_v23 = vld [vmem:[#allocation5 + $0xe0] sm:$0xff]  ;;  %v185_v25 = vld [vmem:[#allocation5 + $0xe8] sm:$0xff]  ;;  %v6056_v27 = vcombine.low %v173_v16, %v177_v17  ;;  %p7623_p6 = pnand %p7622_p5, %p7616_p2 }
  0xac   :  { %v6063_v28 = vcombine.high %v180_v22, %v184_v23  ;;  %v6065_v29 = vcombine.high %v181_v24, %v185_v25  ;;  %v188_v30 = vld [vmem:[#allocation5 + $0x100] sm:$0xff]  ;;  %v189_v32 = vld [vmem:[#allocation5 + $0x108] sm:$0xff]  ;;  %v6062_v34 = vcombine.low %v180_v22, %v184_v23  ;;  %v6064_v35 = vcombine.low %v181_v24, %v185_v25 }
  0xad   :  { %2925 = vmatpush1.bf16.msra.mxu0 %v6046_v18  ;;  %3097 = vmatpush1.bf16.msra.mxu1 %v6048_v19  ;;  %v192_v31 = vld [vmem:[#allocation5 + $0x120] sm:$0xff]  ;;  %v193_v33 = vld [vmem:[#allocation5 + $0x128] sm:$0xff] }
  0xae   :  { %2926 = vmatprep.subr.bf16.mxu0 %v6055_v20  ;;  %3098 = vmatprep.subr.bf16.mxu1 %v6057_v21  ;;  %v6071_v36 = vcombine.high %v188_v30, %v192_v31  ;;  %v6073_v37 = vcombine.high %v189_v32, %v193_v33  ;;  %v196_v38 = vld [vmem:[#allocation5 + $0x140] sm:$0xff]  ;;  %v197_v40 = vld [vmem:[#allocation5 + $0x148] sm:$0xff]  ;;  %v6070_v42 = vcombine.low %v188_v30, %v192_v31 }
  0xaf   :  { %v200_v39 = vld [vmem:[#allocation5 + $0x160] sm:$0xff]  ;;  %v201_v41 = vld [vmem:[#allocation5 + $0x168] sm:$0xff]  ;;  %v6072_v43 = vcombine.low %v189_v32, %v193_v33 }
  0xb0   :  { %v6079_v44 = vcombine.high %v196_v38, %v200_v39  ;;  %v6081_v45 = vcombine.high %v197_v40, %v201_v41  ;;  %v204_v46 = vld [vmem:[#allocation5 + $0x180] sm:$0xff]  ;;  %v205_v48 = vld [vmem:[#allocation5 + $0x188] sm:$0xff]  ;;  %v6078_v50 = vcombine.low %v196_v38, %v200_v39  ;;  %v6080_v51 = vcombine.low %v197_v40, %v201_v41 }
  0xb1   :  { %2927 = vmatpush1.bf16.msra.mxu0 %v6054_v26  ;;  %3099 = vmatpush1.bf16.msra.mxu1 %v6056_v27  ;;  %v208_v47 = vld [vmem:[#allocation5 + $0x1a0] sm:$0xff]  ;;  %v209_v49 = vld [vmem:[#allocation5 + $0x1a8] sm:$0xff] }
  0xb2   :  { %2928 = vmatprep.subr.bf16.mxu0 %v6063_v28  ;;  %3100 = vmatprep.subr.bf16.mxu1 %v6065_v29  ;;  %v6087_v52 = vcombine.high %v204_v46, %v208_v47  ;;  %v6089_v53 = vcombine.high %v205_v48, %v209_v49  ;;  %v212_v54 = vld [vmem:[#allocation5 + $0x1c0] sm:$0xff]  ;;  %v6976_v56 = vld [vmem:[#allocation2 + $0x4] ss:$28 sps:$4 sm:$0xff]   ;;  %v6086_v59 = vcombine.low %v204_v46, %v208_v47 }
  0xb3   :  { %v216_v55 = vld [vmem:[#allocation5 + $0x1e0] sm:$0xff]  ;;  %v213_v57 = vld [vmem:[#allocation5 + $0x1c8] sm:$0xff]  ;;  %2954 = vmatprep.mubr.bf16.mxu0 %v6976_v56  ;;  %v6088_v60 = vcombine.low %v205_v48, %v209_v49  ;;  %3126 = vmatprep.mubr.bf16.mxu1 %v6976_v56 }
  0xb4   :  { %v217_v58 = vld [vmem:[#allocation5 + $0x1e8] sm:$0xff]  ;;  %v6095_v61 = vcombine.high %v212_v54, %v216_v55  ;;  %v220_v63 = vld [vmem:[#allocation5 + $0x200] sm:$0xff]  ;;  %v6094_v3 = vcombine.low %v212_v54, %v216_v55 }
  0xb5   :  { %2929 = vmatpush1.bf16.msra.mxu0 %v6062_v34  ;;  %3101 = vmatpush1.bf16.msra.mxu1 %v6064_v35  ;;  %v6097_v62 = vcombine.high %v213_v57, %v217_v58  ;;  %v224_v0 = vld [vmem:[#allocation5 + $0x220] sm:$0xff]  ;;  %v221_v1 = vld [vmem:[#allocation5 + $0x208] sm:$0xff]  ;;  %v6096_v4 = vcombine.low %v213_v57, %v217_v58 }
  0xb6   :  { %2930 = vmatprep.subr.bf16.mxu0 %v6071_v36  ;;  %3102 = vmatprep.subr.bf16.mxu1 %v6073_v37  ;;  %v225_v2 = vld [vmem:[#allocation5 + $0x228] sm:$0xff]  ;;  %v6103_v5 = vcombine.high %v220_v63, %v224_v0  ;;  %v228_v7 = vld [vmem:[#allocation5 + $0x240] sm:$0xff]  ;;  %v6102_v11 = vcombine.low %v220_v63, %v224_v0 }
  0xb7   :  { %v6105_v6 = vcombine.high %v221_v1, %v225_v2  ;;  %v232_v8 = vld [vmem:[#allocation5 + $0x260] sm:$0xff]  ;;  %v229_v9 = vld [vmem:[#allocation5 + $0x248] sm:$0xff]  ;;  %v6104_v12 = vcombine.low %v221_v1, %v225_v2 }
  0xb8   :  { %v233_v10 = vld [vmem:[#allocation5 + $0x268] sm:$0xff]  ;;  %v6111_v13 = vcombine.high %v228_v7, %v232_v8  ;;  %v236_v15 = vld [vmem:[#allocation5 + $0x280] sm:$0xff]  ;;  %v6110_v19 = vcombine.low %v228_v7, %v232_v8 }
  0xb9   :  { %2931 = vmatpush1.bf16.msra.mxu0 %v6070_v42  ;;  %3103 = vmatpush1.bf16.msra.mxu1 %v6072_v43  ;;  %v6113_v14 = vcombine.high %v229_v9, %v233_v10  ;;  %v240_v16 = vld [vmem:[#allocation5 + $0x2a0] sm:$0xff]  ;;  %v237_v17 = vld [vmem:[#allocation5 + $0x288] sm:$0xff]  ;;  %v6112_v20 = vcombine.low %v229_v9, %v233_v10 }
  0xba   :  { %2932 = vmatprep.subr.bf16.mxu0 %v6079_v44  ;;  %3104 = vmatprep.subr.bf16.mxu1 %v6081_v45  ;;  %v241_v18 = vld [vmem:[#allocation5 + $0x2a8] sm:$0xff]  ;;  %v6119_v21 = vcombine.high %v236_v15, %v240_v16  ;;  %v244_v23 = vld [vmem:[#allocation5 + $0x2c0] sm:$0xff]  ;;  %v6118_v27 = vcombine.low %v236_v15, %v240_v16 }
  0xbb   :  { %v6121_v22 = vcombine.high %v237_v17, %v241_v18  ;;  %v248_v24 = vld [vmem:[#allocation5 + $0x2e0] sm:$0xff]  ;;  %v245_v25 = vld [vmem:[#allocation5 + $0x2c8] sm:$0xff]  ;;  %v6120_v28 = vcombine.low %v237_v17, %v241_v18  ;;  %v6979_v18 = vld [vmem:[#allocation2 + $0xc] ss:$28 sps:$4 sm:$0xff]  }
  0xbc   :  { %v249_v26 = vld [vmem:[#allocation5 + $0x2e8] sm:$0xff]  ;;  %v6127_v29 = vcombine.high %v244_v23, %v248_v24  ;;  %v252_v31 = vld [vmem:[#allocation5 + $0x300] sm:$0xff]  ;;  %v6126_v35 = vcombine.low %v244_v23, %v248_v24 }
  0xbd   :  { %2933 = vmatpush1.bf16.msra.mxu0 %v6078_v50  ;;  %3105 = vmatpush1.bf16.msra.mxu1 %v6080_v51  ;;  %v6129_v30 = vcombine.high %v245_v25, %v249_v26  ;;  %v256_v32 = vld [vmem:[#allocation5 + $0x320] sm:$0xff]  ;;  %v253_v33 = vld [vmem:[#allocation5 + $0x308] sm:$0xff]  ;;  %v6128_v36 = vcombine.low %v245_v25, %v249_v26 }
  0xbe   :  { %2934 = vmatprep.subr.bf16.mxu0 %v6087_v52  ;;  %3106 = vmatprep.subr.bf16.mxu1 %v6089_v53  ;;  %v257_v34 = vld [vmem:[#allocation5 + $0x328] sm:$0xff]  ;;  %v6135_v37 = vcombine.high %v252_v31, %v256_v32  ;;  %v260_v39 = vld [vmem:[#allocation5 + $0x340] sm:$0xff]  ;;  %v6134_v43 = vcombine.low %v252_v31, %v256_v32 }
  0xbf   :  { %v6137_v38 = vcombine.high %v253_v33, %v257_v34  ;;  %v264_v40 = vld [vmem:[#allocation5 + $0x360] sm:$0xff]  ;;  %v261_v41 = vld [vmem:[#allocation5 + $0x348] sm:$0xff]  ;;  %v6136_v44 = vcombine.low %v253_v33, %v257_v34 }
  0xc0   :  { %v265_v42 = vld [vmem:[#allocation5 + $0x368] sm:$0xff]  ;;  %v6143_v45 = vcombine.high %v260_v39, %v264_v40  ;;  %v268_v47 = vld [vmem:[#allocation5 + $0x380] sm:$0xff]  ;;  %v6142_v51 = vcombine.low %v260_v39, %v264_v40 }
  0xc1   :  { %2935 = vmatpush1.bf16.msra.mxu0 %v6086_v59  ;;  %3107 = vmatpush1.bf16.msra.mxu1 %v6088_v60  ;;  %v6145_v46 = vcombine.high %v261_v41, %v265_v42  ;;  %v272_v48 = vld [vmem:[#allocation5 + $0x3a0] sm:$0xff]  ;;  %v269_v49 = vld [vmem:[#allocation5 + $0x388] sm:$0xff]  ;;  %v6144_v52 = vcombine.low %v261_v41, %v265_v42 }
  0xc2   :  { %2936 = vmatprep.subr.bf16.mxu0 %v6095_v61  ;;  %3108 = vmatprep.subr.bf16.mxu1 %v6097_v62  ;;  %v273_v50 = vld [vmem:[#allocation5 + $0x3a8] sm:$0xff]  ;;  %v6151_v53 = vcombine.high %v268_v47, %v272_v48  ;;  %v276_v55 = vld [vmem:[#allocation5 + $0x3c0] sm:$0xff]  ;;  %v6150_v59 = vcombine.low %v268_v47, %v272_v48 }
  0xc3   :  { %v6153_v54 = vcombine.high %v269_v49, %v273_v50  ;;  %v280_v56 = vld [vmem:[#allocation5 + $0x3e0] sm:$0xff]  ;;  %v277_v57 = vld [vmem:[#allocation5 + $0x3c8] sm:$0xff]  ;;  %v6152_v60 = vcombine.low %v269_v49, %v273_v50 }
  0xc4   :  { %v281_v58 = vld [vmem:[#allocation5 + $0x3e8] sm:$0xff]  ;;  %v6159_v61 = vcombine.high %v276_v55, %v280_v56  ;;  %v284_v63 = vld [vmem:[#allocation5 + $0x400] sm:$0xff] }
  0xc5   :  { %2937 = vmatpush1.bf16.msra.mxu0 %v6094_v3  ;;  %3109 = vmatpush1.bf16.msra.mxu1 %v6096_v4  ;;  %v6161_v62 = vcombine.high %v277_v57, %v281_v58  ;;  %v288_v0 = vld [vmem:[#allocation5 + $0x420] sm:$0xff]  ;;  %v285_v1 = vld [vmem:[#allocation5 + $0x408] sm:$0xff]  ;;  %v6158_v3 = vcombine.low %v276_v55, %v280_v56  ;;  %v6160_v4 = vcombine.low %v277_v57, %v281_v58 }
  0xc6   :  { %2938 = vmatprep.subr.bf16.mxu0 %v6103_v5  ;;  %3110 = vmatprep.subr.bf16.mxu1 %v6105_v6  ;;  %v289_v2 = vld [vmem:[#allocation5 + $0x428] sm:$0xff]  ;;  %v6167_v5 = vcombine.high %v284_v63, %v288_v0  ;;  %v292_v7 = vld [vmem:[#allocation5 + $0x440] sm:$0xff] }
  0xc7   :  { %v6169_v6 = vcombine.high %v285_v1, %v289_v2  ;;  %v296_v8 = vld [vmem:[#allocation5 + $0x460] sm:$0xff]  ;;  %v293_v10 = vld [vmem:[#allocation5 + $0x448] sm:$0xff] }
  0xc8   :  { %v6978_v9 = vld [vmem:[#allocation2] ss:$28 sps:$4 sm:$0xff]  }
  0xc9   :  { %2939 = vmatpush1.bf16.msra.mxu0 %v6102_v11  ;;  %3111 = vmatpush1.bf16.msra.mxu1 %v6104_v12  ;;  %v297_v11 = vld [vmem:[#allocation5 + $0x468] sm:$0xff]  ;;  %v6166_v12 = vcombine.low %v284_v63, %v288_v0  ;;  %v300_v15 = vld [vmem:[#allocation5 + $0x480] sm:$0xff] }
  0xca   :  { %2940 = vmatprep.subr.bf16.mxu0 %v6111_v13  ;;  %3112 = vmatprep.subr.bf16.mxu1 %v6113_v14  ;;  %v6168_v13 = vcombine.low %v285_v1, %v289_v2  ;;  %v6175_v14 = vcombine.high %v292_v7, %v296_v8  ;;  %v6177_v16 = vcombine.high %v293_v10, %v297_v11  ;;  %v304_v17 = vld [vmem:[#allocation5 + $0x4a0] sm:$0xff]  ;;  %v317_v34 = vld [vmem:[#allocation5 + $0x508] sm:$0xff] }
  0xcb   :  { %v6183_v23 = vcombine.high %v300_v15, %v304_v17  ;;  %v308_v24 = vld [vmem:[#allocation5 + $0x4c0] sm:$0xff]  ;;  %v325_v42 = vld [vmem:[#allocation5 + $0x548] sm:$0xff] }
  0xcc   :  { %v312_v25 = vld [vmem:[#allocation5 + $0x4e0] sm:$0xff]  ;;  %v333_v50 = vld [vmem:[#allocation5 + $0x588] sm:$0xff] }
  0xcd   :  { %2941 = vmatpush1.bf16.msra.mxu0 %v6110_v19  ;;  %3113 = vmatpush1.bf16.msra.mxu1 %v6112_v20  ;;  %v301_v19 = vld [vmem:[#allocation5 + $0x488] sm:$0xff]  ;;  %v6191_v31 = vcombine.high %v308_v24, %v312_v25  ;;  %v316_v32 = vld [vmem:[#allocation5 + $0x500] sm:$0xff] }
  0xce   :  { %2942 = vmatprep.subr.bf16.mxu0 %v6119_v21  ;;  %3114 = vmatprep.subr.bf16.mxu1 %v6121_v22  ;;  %v305_v20 = vld [vmem:[#allocation5 + $0x4a8] sm:$0xff]  ;;  %v6174_v21 = vcombine.low %v292_v7, %v296_v8  ;;  %v6176_v22 = vcombine.low %v293_v10, %v297_v11  ;;  %v320_v33 = vld [vmem:[#allocation5 + $0x520] sm:$0xff] }
  0xcf   :  { %v6185_v26 = vcombine.high %v301_v19, %v305_v20  ;;  %v6199_v39 = vcombine.high %v316_v32, %v320_v33  ;;  %v324_v40 = vld [vmem:[#allocation5 + $0x540] sm:$0xff]  ;;  %v341_v58 = vld [vmem:[#allocation5 + $0x5c8] sm:$0xff] }
  0xd0   :  { %v328_v41 = vld [vmem:[#allocation5 + $0x560] sm:$0xff]  ;;  %v349_v2 = vld [vmem:[#allocation5 + $0x608] sm:$0xff] }
  0xd1   :  { %2943 = vmatpush1.bf16.msra.mxu0 %v6118_v27  ;;  %3115 = vmatpush1.bf16.msra.mxu1 %v6120_v28  ;;  %v309_v27 = vld [vmem:[#allocation5 + $0x4c8] sm:$0xff]  ;;  %v6207_v47 = vcombine.high %v324_v40, %v328_v41  ;;  %v332_v48 = vld [vmem:[#allocation5 + $0x580] sm:$0xff] }
  0xd2   :  { %2944 = vmatprep.subr.bf16.mxu0 %v6127_v29  ;;  %3116 = vmatprep.subr.bf16.mxu1 %v6129_v30  ;;  %v313_v28 = vld [vmem:[#allocation5 + $0x4e8] sm:$0xff]  ;;  %v6182_v29 = vcombine.low %v300_v15, %v304_v17  ;;  %v6184_v30 = vcombine.low %v301_v19, %v305_v20  ;;  %v336_v49 = vld [vmem:[#allocation5 + $0x5a0] sm:$0xff] }
  0xd3   :  { %v6215_v55 = vcombine.high %v332_v48, %v336_v49  ;;  %v340_v56 = vld [vmem:[#allocation5 + $0x5c0] sm:$0xff]  ;;  %v357_v10 = vld [vmem:[#allocation5 + $0x648] sm:$0xff] }
  0xd4   :  { %v344_v57 = vld [vmem:[#allocation5 + $0x5e0] sm:$0xff]  ;;  %v365_v19 = vld [vmem:[#allocation5 + $0x688] sm:$0xff] }
  0xd5   :  { %2945 = vmatpush1.bf16.msra.mxu0 %v6126_v35  ;;  %3117 = vmatpush1.bf16.msra.mxu1 %v6128_v36  ;;  %v6193_v35 = vcombine.high %v309_v27, %v313_v28  ;;  %v321_v36 = vld [vmem:[#allocation5 + $0x528] sm:$0xff]  ;;  %v6223_v63 = vcombine.high %v340_v56, %v344_v57  ;;  %v348_v0 = vld [vmem:[#allocation5 + $0x600] sm:$0xff] }
  0xd6   :  { %2946 = vmatprep.subr.bf16.mxu0 %v6135_v37  ;;  %3118 = vmatprep.subr.bf16.mxu1 %v6137_v38  ;;  %v6190_v37 = vcombine.low %v308_v24, %v312_v25  ;;  %v6192_v38 = vcombine.low %v309_v27, %v313_v28  ;;  %v352_v1 = vld [vmem:[#allocation5 + $0x620] sm:$0xff]  ;;  %v369_v20 = vld [vmem:[#allocation5 + $0x6a8] sm:$0xff] }
  0xd7   :  { %v6231_v7 = vcombine.high %v348_v0, %v352_v1  ;;  %v356_v8 = vld [vmem:[#allocation5 + $0x640] sm:$0xff]  ;;  %v6249_v27 = vcombine.high %v365_v19, %v369_v20  ;;  %v377_v28 = vld [vmem:[#allocation5 + $0x6e8] sm:$0xff] }
  0xd8   :  { %v368_v17 = vld [vmem:[#allocation5 + $0x6a0] sm:$0xff] }
  0xd9   :  { %2947 = vmatpush1.bf16.msra.mxu0 %v6134_v43  ;;  %3119 = vmatpush1.bf16.msra.mxu1 %v6136_v44  ;;  %v6201_v43 = vcombine.high %v317_v34, %v321_v36  ;;  %v329_v44 = vld [vmem:[#allocation5 + $0x568] sm:$0xff]  ;;  %v372_v24 = vld [vmem:[#allocation5 + $0x6c0] sm:$0xff] }
  0xda   :  { %2948 = vmatprep.subr.bf16.mxu0 %v6143_v45  ;;  %3120 = vmatprep.subr.bf16.mxu1 %v6145_v46  ;;  %v6198_v45 = vcombine.low %v316_v32, %v320_v33  ;;  %v6200_v46 = vcombine.low %v317_v34, %v321_v36  ;;  %v376_v25 = vld [vmem:[#allocation5 + $0x6e0] sm:$0xff]  ;;  %v381_v34 = vld [vmem:[#allocation5 + $0x708] sm:$0xff] }
  0xdb   :  { %v380_v32 = vld [vmem:[#allocation5 + $0x700] sm:$0xff]  ;;  %v385_v36 = vld [vmem:[#allocation5 + $0x728] sm:$0xff] }
  0xdc   :  { %v384_v33 = vld [vmem:[#allocation5 + $0x720] sm:$0xff] }
  0xdd   :  { %2949 = vmatpush1.bf16.msra.mxu0 %v6142_v51  ;;  %3121 = vmatpush1.bf16.msra.mxu1 %v6144_v52  ;;  %v6209_v51 = vcombine.high %v325_v42, %v329_v44  ;;  %v337_v52 = vld [vmem:[#allocation5 + $0x5a8] sm:$0xff] }
  0xde   :  { %2950 = vmatprep.subr.bf16.mxu0 %v6151_v53  ;;  %3122 = vmatprep.subr.bf16.mxu1 %v6153_v54  ;;  %v6206_v53 = vcombine.low %v324_v40, %v328_v41  ;;  %v6208_v54 = vcombine.low %v325_v42, %v329_v44  ;;  %v388_v40 = vld [vmem:[#allocation5 + $0x740] sm:$0xff]  ;;  %v389_v42 = vld [vmem:[#allocation5 + $0x748] sm:$0xff] }
  0xdf   :  { %v392_v41 = vld [vmem:[#allocation5 + $0x760] sm:$0xff]  ;;  %v393_v44 = vld [vmem:[#allocation5 + $0x768] sm:$0xff] }
  0xe1   :  { %2951 = vmatpush1.bf16.msra.mxu0 %v6150_v59  ;;  %3123 = vmatpush1.bf16.msra.mxu1 %v6152_v60  ;;  %v6217_v59 = vcombine.high %v333_v50, %v337_v52  ;;  %v345_v60 = vld [vmem:[#allocation5 + $0x5e8] sm:$0xff] }
  0xe2   :  { %2952 = vmatprep.subr.bf16.mxu0 %v6159_v61  ;;  %3124 = vmatprep.subr.bf16.mxu1 %v6161_v62  ;;  %v6214_v61 = vcombine.low %v332_v48, %v336_v49  ;;  %v6216_v62 = vcombine.low %v333_v50, %v337_v52  ;;  %v396_v48 = vld [vmem:[#allocation5 + $0x780] sm:$0xff]  ;;  %v397_v50 = vld [vmem:[#allocation5 + $0x788] sm:$0xff] }
  0xe3   :  { %v400_v49 = vld [vmem:[#allocation5 + $0x7a0] sm:$0xff]  ;;  %v401_v52 = vld [vmem:[#allocation5 + $0x7a8] sm:$0xff] }
  0xe5   :  { %2953 = vmatpush1.bf16.msra.mxu0 %v6158_v3  ;;  %3125 = vmatpush1.bf16.msra.mxu1 %v6160_v4  ;;  %v6225_v3 = vcombine.high %v341_v58, %v345_v60  ;;  %v353_v4 = vld [vmem:[#allocation5 + $0x628] sm:$0xff] }
  0xe6   :  { %2965 = vmatprep.subr.bf16.mxu0 %v6167_v5  ;;  %3137 = vmatprep.subr.bf16.mxu1 %v6169_v6  ;;  %v6222_v5 = vcombine.low %v340_v56, %v344_v57  ;;  %v6224_v6 = vcombine.low %v341_v58, %v345_v60  ;;  %v6233_v11 = vcombine.high %v349_v2, %v353_v4  ;;  %v404_v56 = vld [vmem:[#allocation5 + $0x7c0] sm:$0xff]  ;;  %v405_v58 = vld [vmem:[#allocation5 + $0x7c8] sm:$0xff] }
  0xe7   :  { %v408_v57 = vld [vmem:[#allocation5 + $0x7e0] sm:$0xff]  ;;  %v409_v60 = vld [vmem:[#allocation5 + $0x7e8] sm:$0xff] }
  0xe8   :  { %2955 = vmatmul.mubr.bf16.vlgmr.msra.gmra.mrb[0].mxu0 %v6978_v9  ;;  %3127 = vmatmul.mubr.bf16.vlgmr.msra.gmra.mrb[0].mxu1 %v6978_v9  ;;  %v360_v9 = vld [vmem:[#allocation5 + $0x660] sm:$0xff] }
  0xe9   :  { %2966 = vmatpush1.bf16.msra.mxu0 %v6166_v12  ;;  %3138 = vmatpush1.bf16.msra.mxu1 %v6168_v13  ;;  %v361_v12 = vld [vmem:[#allocation5 + $0x668] sm:$0xff]  ;;  %v6230_v13 = vcombine.low %v348_v0, %v352_v1  ;;  %v6239_v15 = vcombine.high %v356_v8, %v360_v9  ;;  %v412_v0 = vld [vmem:[#allocation5 + $0x800] sm:$0xff] }
  0xea   :  { %2967 = vmatprep.subr.bf16.mxu0 %v6175_v14  ;;  %3139 = vmatprep.subr.bf16.mxu1 %v6177_v16  ;;  %v6232_v14 = vcombine.low %v349_v2, %v353_v4  ;;  %v364_v16 = vld [vmem:[#allocation5 + $0x680] sm:$0xff]  ;;  %v413_v2 = vld [vmem:[#allocation5 + $0x808] sm:$0xff] }
  0xeb   :  { %2997 = vmatprep.mubr.bf16.mxu0 %v6979_v18  ;;  %3169 = vmatprep.mubr.bf16.mxu1 %v6979_v18  ;;  %v6241_v18 = vcombine.high %v357_v10, %v361_v12  ;;  %v416_v1 = vld [vmem:[#allocation5 + $0x820] sm:$0xff]  ;;  %v417_v4 = vld [vmem:[#allocation5 + $0x828] sm:$0xff] }
  0xed   :  { %2968 = vmatpush1.bf16.msra.mxu0 %v6174_v21  ;;  %3140 = vmatpush1.bf16.msra.mxu1 %v6176_v22  ;;  %v6238_v21 = vcombine.low %v356_v8, %v360_v9  ;;  %v6240_v22 = vcombine.low %v357_v10, %v361_v12  ;;  %v6981_v8 = vld [vmem:[#allocation2 + $0x8] ss:$28 sps:$4 sm:$0xff]   ;;  %v420_v9 = vld [vmem:[#allocation5 + $0x840] sm:$0xff]  ;;  %v6297_v12 = vcombine.high %v413_v2, %v417_v4 }
  0xee   :  { %2969 = vmatprep.subr.bf16.mxu0 %v6183_v23  ;;  %3141 = vmatprep.subr.bf16.mxu1 %v6185_v26  ;;  %v6247_v23 = vcombine.high %v364_v16, %v368_v17  ;;  %v373_v26 = vld [vmem:[#allocation5 + $0x6c8] sm:$0xff]  ;;  %v424_v10 = vld [vmem:[#allocation5 + $0x860] sm:$0xff] }
  0xf1   :  { %2970 = vmatpush1.bf16.msra.mxu0 %v6182_v29  ;;  %3142 = vmatpush1.bf16.msra.mxu1 %v6184_v30  ;;  %v6246_v29 = vcombine.low %v364_v16, %v368_v17  ;;  %v6248_v30 = vcombine.low %v365_v19, %v369_v20  ;;  %v6296_v16 = vcombine.low %v413_v2, %v417_v4  ;;  %v429_v19 = vld [vmem:[#allocation5 + $0x888] sm:$0xff]  ;;  %v476_v2 = vld [vmem:[#allocation5 + $0xa00] sm:$0xff] }
  0xf2   :  { %2971 = vmatprep.subr.bf16.mxu0 %v6191_v31  ;;  %3143 = vmatprep.subr.bf16.mxu1 %v6193_v35  ;;  %v6255_v31 = vcombine.high %v372_v24, %v376_v25  ;;  %v6257_v35 = vcombine.high %v373_v26, %v377_v28  ;;  %v6303_v17 = vcombine.high %v420_v9, %v424_v10  ;;  %v433_v20 = vld [vmem:[#allocation5 + $0x8a8] sm:$0xff] }
  0xf3   :  { %v477_v4 = vld [vmem:[#allocation5 + $0xa08] sm:$0xff] }
  0xf5   :  { %2972 = vmatpush1.bf16.msra.mxu0 %v6190_v37  ;;  %3144 = vmatpush1.bf16.msra.mxu1 %v6192_v38  ;;  %v6254_v37 = vcombine.low %v372_v24, %v376_v25  ;;  %v6256_v38 = vcombine.low %v373_v26, %v377_v28  ;;  %v436_v26 = vld [vmem:[#allocation5 + $0x8c0] sm:$0xff]  ;;  %v437_v28 = vld [vmem:[#allocation5 + $0x8c8] sm:$0xff] }
  0xf6   :  { %2973 = vmatprep.subr.bf16.mxu0 %v6199_v39  ;;  %3145 = vmatprep.subr.bf16.mxu1 %v6201_v43  ;;  %v6263_v39 = vcombine.high %v380_v32, %v384_v33  ;;  %v6265_v43 = vcombine.high %v381_v34, %v385_v36 }
  0xf9   :  { %2974 = vmatpush1.bf16.msra.mxu0 %v6198_v45  ;;  %3146 = vmatpush1.bf16.msra.mxu1 %v6200_v46  ;;  %v6262_v45 = vcombine.low %v380_v32, %v384_v33  ;;  %v6264_v46 = vcombine.low %v381_v34, %v385_v36  ;;  %v6312_v32 = vcombine.low %v429_v19, %v433_v20  ;;  %v444_v34 = vld [vmem:[#allocation5 + $0x900] sm:$0xff]  ;;  %v445_v36 = vld [vmem:[#allocation5 + $0x908] sm:$0xff] }
  0xfa   :  { %2975 = vmatprep.subr.bf16.mxu0 %v6207_v47  ;;  %3147 = vmatprep.subr.bf16.mxu1 %v6209_v51  ;;  %v6271_v47 = vcombine.high %v388_v40, %v392_v41  ;;  %v6273_v51 = vcombine.high %v389_v42, %v393_v44 }
  0xfd   :  { %2976 = vmatpush1.bf16.msra.mxu0 %v6206_v53  ;;  %3148 = vmatpush1.bf16.msra.mxu1 %v6208_v54  ;;  %v6270_v53 = vcombine.low %v388_v40, %v392_v41  ;;  %v6272_v54 = vcombine.low %v389_v42, %v393_v44  ;;  %v452_v42 = vld [vmem:[#allocation5 + $0x940] sm:$0xff]  ;;  %v453_v44 = vld [vmem:[#allocation5 + $0x948] sm:$0xff] }
  0xfe   :  { %2977 = vmatprep.subr.bf16.mxu0 %v6215_v55  ;;  %3149 = vmatprep.subr.bf16.mxu1 %v6217_v59  ;;  %v6279_v55 = vcombine.high %v396_v48, %v400_v49  ;;  %v6281_v59 = vcombine.high %v397_v50, %v401_v52 }
 0x101   :  { %2978 = vmatpush1.bf16.msra.mxu0 %v6214_v61  ;;  %3150 = vmatpush1.bf16.msra.mxu1 %v6216_v62  ;;  %v6278_v61 = vcombine.low %v396_v48, %v400_v49  ;;  %v6280_v62 = vcombine.low %v397_v50, %v401_v52  ;;  %v460_v50 = vld [vmem:[#allocation5 + $0x980] sm:$0xff]  ;;  %v461_v52 = vld [vmem:[#allocation5 + $0x988] sm:$0xff] }
 0x102   :  { %2979 = vmatprep.subr.bf16.mxu0 %v6223_v63  ;;  %3151 = vmatprep.subr.bf16.mxu1 %v6225_v3  ;;  %v6287_v63 = vcombine.high %v404_v56, %v408_v57  ;;  %v6289_v3 = vcombine.high %v405_v58, %v409_v60 }
 0x105   :  { %2980 = vmatpush1.bf16.msra.mxu0 %v6222_v5  ;;  %3152 = vmatpush1.bf16.msra.mxu1 %v6224_v6  ;;  %v6286_v5 = vcombine.low %v404_v56, %v408_v57  ;;  %v6288_v6 = vcombine.low %v405_v58, %v409_v60  ;;  %v468_v58 = vld [vmem:[#allocation5 + $0x9c0] sm:$0xff]  ;;  %v469_v60 = vld [vmem:[#allocation5 + $0x9c8] sm:$0xff] }
 0x106   :  { %2981 = vmatprep.subr.bf16.mxu0 %v6231_v7  ;;  %3153 = vmatprep.subr.bf16.mxu1 %v6233_v11  ;;  %v6295_v7 = vcombine.high %v412_v0, %v416_v1  ;;  %v421_v11 = vld [vmem:[#allocation5 + $0x848] sm:$0xff] }
 0x109   :  { %2982 = vmatpush1.bf16.msra.mxu0 %v6230_v13  ;;  %3154 = vmatpush1.bf16.msra.mxu1 %v6232_v14  ;;  %v425_v13 = vld [vmem:[#allocation5 + $0x868] sm:$0xff]  ;;  %v6294_v14 = vcombine.low %v412_v0, %v416_v1 }
 0x10a   :  { %2983 = vmatprep.subr.bf16.mxu0 %v6239_v15  ;;  %3155 = vmatprep.subr.bf16.mxu1 %v6241_v18  ;;  %v428_v15 = vld [vmem:[#allocation5 + $0x880] sm:$0xff]  ;;  %v6304_v24 = vcombine.low %v421_v11, %v425_v13 }
 0x10b   :  { %v432_v18 = vld [vmem:[#allocation5 + $0x8a0] sm:$0xff] }
 0x10c   :  { %v6311_v25 = vcombine.high %v428_v15, %v432_v18 }
 0x10d   :  { %2984 = vmatpush1.bf16.msra.mxu0 %v6238_v21  ;;  %3156 = vmatpush1.bf16.msra.mxu1 %v6240_v22  ;;  %v6305_v21 = vcombine.high %v421_v11, %v425_v13  ;;  %v6982_v22 = vld [vmem:[#allocation2 + $0x14] ss:$28 sps:$4 sm:$0xff]   ;;  %v488_v11 = vld [vmem:[#allocation5 + $0xa60] sm:$0xff] }
 0x10e   :  { %2985 = vmatprep.subr.bf16.mxu0 %v6247_v23  ;;  %3157 = vmatprep.subr.bf16.mxu1 %v6249_v27  ;;  %v6302_v23 = vcombine.low %v420_v9, %v424_v10  ;;  %v440_v27 = vld [vmem:[#allocation5 + $0x8e0] sm:$0xff] }
 0x10f   :  { %v6319_v33 = vcombine.high %v436_v26, %v440_v27  ;;  %v484_v10 = vld [vmem:[#allocation5 + $0xa40] sm:$0xff] }
 0x111   :  { %2986 = vmatpush1.bf16.msra.mxu0 %v6246_v29  ;;  %3158 = vmatpush1.bf16.msra.mxu1 %v6248_v30  ;;  %v6313_v29 = vcombine.high %v429_v19, %v433_v20  ;;  %v441_v30 = vld [vmem:[#allocation5 + $0x8e8] sm:$0xff]  ;;  %v496_v19 = vld [vmem:[#allocation5 + $0xaa0] sm:$0xff] }
 0x112   :  { %2987 = vmatprep.subr.bf16.mxu0 %v6255_v31  ;;  %3159 = vmatprep.subr.bf16.mxu1 %v6257_v35  ;;  %v6310_v31 = vcombine.low %v428_v15, %v432_v18  ;;  %v448_v35 = vld [vmem:[#allocation5 + $0x920] sm:$0xff]  ;;  %v6320_v40 = vcombine.low %v437_v28, %v441_v30  ;;  %v493_v20 = vld [vmem:[#allocation5 + $0xa88] sm:$0xff] }
 0x113   :  { %v6327_v41 = vcombine.high %v444_v34, %v448_v35  ;;  %v492_v18 = vld [vmem:[#allocation5 + $0xa80] sm:$0xff] }
 0x115   :  { %2988 = vmatpush1.bf16.msra.mxu0 %v6254_v37  ;;  %3160 = vmatpush1.bf16.msra.mxu1 %v6256_v38  ;;  %v6321_v37 = vcombine.high %v437_v28, %v441_v30  ;;  %v449_v38 = vld [vmem:[#allocation5 + $0x928] sm:$0xff] }
 0x116   :  { %2989 = vmatprep.subr.bf16.mxu0 %v6263_v39  ;;  %3161 = vmatprep.subr.bf16.mxu1 %v6265_v43  ;;  %v6318_v39 = vcombine.low %v436_v26, %v440_v27  ;;  %v456_v43 = vld [vmem:[#allocation5 + $0x960] sm:$0xff]  ;;  %v6328_v48 = vcombine.low %v445_v36, %v449_v38  ;;  %v501_v28 = vld [vmem:[#allocation5 + $0xac8] sm:$0xff] }
 0x117   :  { %v6335_v49 = vcombine.high %v452_v42, %v456_v43  ;;  %v500_v26 = vld [vmem:[#allocation5 + $0xac0] sm:$0xff]  ;;  %v505_v30 = vld [vmem:[#allocation5 + $0xae8] sm:$0xff] }
 0x118   :  { %v504_v27 = vld [vmem:[#allocation5 + $0xae0] sm:$0xff] }
 0x119   :  { %2990 = vmatpush1.bf16.msra.mxu0 %v6262_v45  ;;  %3162 = vmatpush1.bf16.msra.mxu1 %v6264_v46  ;;  %v6329_v45 = vcombine.high %v445_v36, %v449_v38  ;;  %v457_v46 = vld [vmem:[#allocation5 + $0x968] sm:$0xff] }
 0x11a   :  { %2991 = vmatprep.subr.bf16.mxu0 %v6271_v47  ;;  %3163 = vmatprep.subr.bf16.mxu1 %v6273_v51  ;;  %v6326_v47 = vcombine.low %v444_v34, %v448_v35  ;;  %v464_v51 = vld [vmem:[#allocation5 + $0x9a0] sm:$0xff]  ;;  %v6336_v56 = vcombine.low %v453_v44, %v457_v46  ;;  %v509_v36 = vld [vmem:[#allocation5 + $0xb08] sm:$0xff] }
 0x11b   :  { %v6343_v57 = vcombine.high %v460_v50, %v464_v51  ;;  %v508_v34 = vld [vmem:[#allocation5 + $0xb00] sm:$0xff]  ;;  %v513_v38 = vld [vmem:[#allocation5 + $0xb28] sm:$0xff] }
 0x11c   :  { %v512_v35 = vld [vmem:[#allocation5 + $0xb20] sm:$0xff] }
 0x11d   :  { %2992 = vmatpush1.bf16.msra.mxu0 %v6270_v53  ;;  %3164 = vmatpush1.bf16.msra.mxu1 %v6272_v54  ;;  %v6337_v53 = vcombine.high %v453_v44, %v457_v46  ;;  %v465_v54 = vld [vmem:[#allocation5 + $0x9a8] sm:$0xff] }
 0x11e   :  { %2993 = vmatprep.subr.bf16.mxu0 %v6279_v55  ;;  %3165 = vmatprep.subr.bf16.mxu1 %v6281_v59  ;;  %v6334_v55 = vcombine.low %v452_v42, %v456_v43  ;;  %v472_v59 = vld [vmem:[#allocation5 + $0x9e0] sm:$0xff]  ;;  %v6344_v0 = vcombine.low %v461_v52, %v465_v54  ;;  %v517_v44 = vld [vmem:[#allocation5 + $0xb48] sm:$0xff] }
 0x11f   :  { %v6351_v1 = vcombine.high %v468_v58, %v472_v59  ;;  %v516_v42 = vld [vmem:[#allocation5 + $0xb40] sm:$0xff]  ;;  %v521_v46 = vld [vmem:[#allocation5 + $0xb68] sm:$0xff] }
 0x120   :  { %v520_v43 = vld [vmem:[#allocation5 + $0xb60] sm:$0xff] }
 0x121   :  { %2994 = vmatpush1.bf16.msra.mxu0 %v6278_v61  ;;  %3166 = vmatpush1.bf16.msra.mxu1 %v6280_v62  ;;  %v6345_v61 = vcombine.high %v461_v52, %v465_v54  ;;  %v473_v62 = vld [vmem:[#allocation5 + $0x9e8] sm:$0xff] }
 0x122   :  { %2995 = vmatprep.subr.bf16.mxu0 %v6287_v63  ;;  %3167 = vmatprep.subr.bf16.mxu1 %v6289_v3  ;;  %v6342_v63 = vcombine.low %v460_v50, %v464_v51  ;;  %v480_v3 = vld [vmem:[#allocation5 + $0xa20] sm:$0xff]  ;;  %v525_v52 = vld [vmem:[#allocation5 + $0xb88] sm:$0xff] }
 0x123   :  { %v6359_v9 = vcombine.high %v476_v2, %v480_v3  ;;  %v6358_v15 = vcombine.low %v476_v2, %v480_v3  ;;  %v524_v50 = vld [vmem:[#allocation5 + $0xb80] sm:$0xff]  ;;  %v529_v54 = vld [vmem:[#allocation5 + $0xba8] sm:$0xff] }
 0x124   :  { %v528_v51 = vld [vmem:[#allocation5 + $0xba0] sm:$0xff] }
 0x125   :  { %2996 = vmatpush1.bf16.msra.mxu0 %v6286_v5  ;;  %3168 = vmatpush1.bf16.msra.mxu1 %v6288_v6  ;;  %v6353_v5 = vcombine.high %v469_v60, %v473_v62  ;;  %v481_v6 = vld [vmem:[#allocation5 + $0xa28] sm:$0xff]  ;;  %v540_v2 = vld [vmem:[#allocation5 + $0xc00] sm:$0xff] }
 0x126   :  { %3008 = vmatprep.subr.bf16.mxu0 %v6295_v7  ;;  %3180 = vmatprep.subr.bf16.mxu1 %v6297_v12  ;;  %v6350_v7 = vcombine.low %v468_v58, %v472_v59  ;;  %v485_v12 = vld [vmem:[#allocation5 + $0xa48] sm:$0xff]  ;;  %v6361_v13 = vcombine.high %v477_v4, %v481_v6  ;;  %v532_v58 = vld [vmem:[#allocation5 + $0xbc0] sm:$0xff] }
 0x127   :  { %v536_v59 = vld [vmem:[#allocation5 + $0xbe0] sm:$0xff] }
 0x128   :  { %2998 = vmatmul.mubr.bf16.vlgmr.msra.gmra.mrb[0].mxu0 %v6981_v8  ;;  %3170 = vmatmul.mubr.bf16.vlgmr.msra.gmra.mrb[0].mxu1 %v6981_v8  ;;  %v6352_v8 = vcombine.low %v469_v60, %v473_v62  ;;  %v533_v60 = vld [vmem:[#allocation5 + $0xbc8] sm:$0xff]  ;;  %v544_v3 = vld [vmem:[#allocation5 + $0xc20] sm:$0xff] }
 0x129   :  { %3009 = vmatpush1.bf16.msra.mxu0 %v6294_v14  ;;  %3181 = vmatpush1.bf16.msra.mxu1 %v6296_v16  ;;  %v489_v14 = vld [vmem:[#allocation5 + $0xa68] sm:$0xff]  ;;  %v6360_v16 = vcombine.low %v477_v4, %v481_v6 }
 0x12a   :  { %3010 = vmatprep.subr.bf16.mxu0 %v6303_v17  ;;  %3182 = vmatprep.subr.bf16.mxu1 %v6305_v21  ;;  %v6367_v17 = vcombine.high %v484_v10, %v488_v11  ;;  %v6369_v21 = vcombine.high %v485_v12, %v489_v14  ;;  %v537_v62 = vld [vmem:[#allocation5 + $0xbe8] sm:$0xff] }
 0x12b   :  { %3040 = vmatprep.mubr.bf16.mxu0 %v6982_v22  ;;  %3212 = vmatprep.mubr.bf16.mxu1 %v6982_v22  ;;  %v497_v22 = vld [vmem:[#allocation5 + $0xaa8] sm:$0xff] }
 0x12c   :  { %v541_v4 = vld [vmem:[#allocation5 + $0xc08] sm:$0xff] }
 0x12d   :  { %3011 = vmatpush1.bf16.msra.mxu0 %v6302_v23  ;;  %3183 = vmatpush1.bf16.msra.mxu1 %v6304_v24  ;;  %v6366_v23 = vcombine.low %v484_v10, %v488_v11  ;;  %v6368_v24 = vcombine.low %v485_v12, %v489_v14  ;;  %v545_v6 = vld [vmem:[#allocation5 + $0xc28] sm:$0xff]  ;;  %v6984_v10 = vld [vmem:[#allocation2 + $0x10] ss:$28 sps:$4 sm:$0xff]   ;;  %v548_v11 = vld [vmem:[#allocation5 + $0xc40] sm:$0xff] }
 0x12e   :  { %3012 = vmatprep.subr.bf16.mxu0 %v6311_v25  ;;  %3184 = vmatprep.subr.bf16.mxu1 %v6313_v29  ;;  %v6375_v25 = vcombine.high %v492_v18, %v496_v19  ;;  %v6377_v29 = vcombine.high %v493_v20, %v497_v22  ;;  %v552_v12 = vld [vmem:[#allocation5 + $0xc60] sm:$0xff]  ;;  %v6425_v14 = vcombine.high %v541_v4, %v545_v6 }
 0x131   :  { %3013 = vmatpush1.bf16.msra.mxu0 %v6310_v31  ;;  %3185 = vmatpush1.bf16.msra.mxu1 %v6312_v32  ;;  %v6374_v31 = vcombine.low %v492_v18, %v496_v19  ;;  %v6376_v32 = vcombine.low %v493_v20, %v497_v22  ;;  %v6431_v18 = vcombine.high %v548_v11, %v552_v12  ;;  %v556_v19 = vld [vmem:[#allocation5 + $0xc80] sm:$0xff] }
 0x132   :  { %3014 = vmatprep.subr.bf16.mxu0 %v6319_v33  ;;  %3186 = vmatprep.subr.bf16.mxu1 %v6321_v37  ;;  %v6383_v33 = vcombine.high %v500_v26, %v504_v27  ;;  %v6385_v37 = vcombine.high %v501_v28, %v505_v30  ;;  %v560_v20 = vld [vmem:[#allocation5 + $0xca0] sm:$0xff] }
 0x135   :  { %3015 = vmatpush1.bf16.msra.mxu0 %v6318_v39  ;;  %3187 = vmatpush1.bf16.msra.mxu1 %v6320_v40  ;;  %v6382_v39 = vcombine.low %v500_v26, %v504_v27  ;;  %v6384_v40 = vcombine.low %v501_v28, %v505_v30  ;;  %v6439_v26 = vcombine.high %v556_v19, %v560_v20  ;;  %v564_v27 = vld [vmem:[#allocation5 + $0xcc0] sm:$0xff] }
 0x136   :  { %3016 = vmatprep.subr.bf16.mxu0 %v6327_v41  ;;  %3188 = vmatprep.subr.bf16.mxu1 %v6329_v45  ;;  %v6391_v41 = vcombine.high %v508_v34, %v512_v35  ;;  %v6393_v45 = vcombine.high %v509_v36, %v513_v38  ;;  %v568_v28 = vld [vmem:[#allocation5 + $0xce0] sm:$0xff] }
 0x139   :  { %3017 = vmatpush1.bf16.msra.mxu0 %v6326_v47  ;;  %3189 = vmatpush1.bf16.msra.mxu1 %v6328_v48  ;;  %v6390_v47 = vcombine.low %v508_v34, %v512_v35  ;;  %v6392_v48 = vcombine.low %v509_v36, %v513_v38  ;;  %v6447_v35 = vcombine.high %v564_v27, %v568_v28  ;;  %v572_v36 = vld [vmem:[#allocation5 + $0xd00] sm:$0xff]  ;;  %v573_v38 = vld [vmem:[#allocation5 + $0xd08] sm:$0xff] }
 0x13a   :  { %3018 = vmatprep.subr.bf16.mxu0 %v6335_v49  ;;  %3190 = vmatprep.subr.bf16.mxu1 %v6337_v53  ;;  %v6399_v49 = vcombine.high %v516_v42, %v520_v43  ;;  %v6401_v53 = vcombine.high %v517_v44, %v521_v46 }
 0x13d   :  { %3019 = vmatpush1.bf16.msra.mxu0 %v6334_v55  ;;  %3191 = vmatpush1.bf16.msra.mxu1 %v6336_v56  ;;  %v6398_v55 = vcombine.low %v516_v42, %v520_v43  ;;  %v6400_v56 = vcombine.low %v517_v44, %v521_v46  ;;  %v580_v44 = vld [vmem:[#allocation5 + $0xd40] sm:$0xff]  ;;  %v581_v46 = vld [vmem:[#allocation5 + $0xd48] sm:$0xff] }
 0x13e   :  { %3020 = vmatprep.subr.bf16.mxu0 %v6343_v57  ;;  %3192 = vmatprep.subr.bf16.mxu1 %v6345_v61  ;;  %v6407_v57 = vcombine.high %v524_v50, %v528_v51  ;;  %v6409_v61 = vcombine.high %v525_v52, %v529_v54 }
 0x141   :  { %3021 = vmatpush1.bf16.msra.mxu0 %v6342_v63  ;;  %3193 = vmatpush1.bf16.msra.mxu1 %v6344_v0  ;;  %v6406_v63 = vcombine.low %v524_v50, %v528_v51  ;;  %v6408_v0 = vcombine.low %v525_v52, %v529_v54  ;;  %v588_v52 = vld [vmem:[#allocation5 + $0xd80] sm:$0xff]  ;;  %v589_v54 = vld [vmem:[#allocation5 + $0xd88] sm:$0xff] }
 0x142   :  { %3022 = vmatprep.subr.bf16.mxu0 %v6351_v1  ;;  %3194 = vmatprep.subr.bf16.mxu1 %v6353_v5  ;;  %v6415_v1 = vcombine.high %v532_v58, %v536_v59  ;;  %v6417_v5 = vcombine.high %v533_v60, %v537_v62 }
 0x145   :  { %3023 = vmatpush1.bf16.msra.mxu0 %v6350_v7  ;;  %3195 = vmatpush1.bf16.msra.mxu1 %v6352_v8  ;;  %v6414_v7 = vcombine.low %v532_v58, %v536_v59  ;;  %v6416_v8 = vcombine.low %v533_v60, %v537_v62  ;;  %v596_v60 = vld [vmem:[#allocation5 + $0xdc0] sm:$0xff]  ;;  %v597_v62 = vld [vmem:[#allocation5 + $0xdc8] sm:$0xff] }
 0x146   :  { %3024 = vmatprep.subr.bf16.mxu0 %v6359_v9  ;;  %3196 = vmatprep.subr.bf16.mxu1 %v6361_v13  ;;  %v6423_v9 = vcombine.high %v540_v2, %v544_v3  ;;  %v549_v13 = vld [vmem:[#allocation5 + $0xc48] sm:$0xff] }
 0x149   :  { %3025 = vmatpush1.bf16.msra.mxu0 %v6358_v15  ;;  %3197 = vmatpush1.bf16.msra.mxu1 %v6360_v16  ;;  %v553_v15 = vld [vmem:[#allocation5 + $0xc68] sm:$0xff]  ;;  %v6422_v16 = vcombine.low %v540_v2, %v544_v3 }
 0x14a   :  { %3026 = vmatprep.subr.bf16.mxu0 %v6367_v17  ;;  %3198 = vmatprep.subr.bf16.mxu1 %v6369_v21  ;;  %v6424_v17 = vcombine.low %v541_v4, %v545_v6  ;;  %v557_v21 = vld [vmem:[#allocation5 + $0xc88] sm:$0xff]  ;;  %v6433_v22 = vcombine.high %v549_v13, %v553_v15  ;;  %v158_v4 = vld [vmem:[#allocation5 + $0x10] sm:$0xff]  ;;  %v159_v6 = vld [vmem:[#allocation5 + $0x18] sm:$0xff] }
 0x14d   :  { %3027 = vmatpush1.bf16.msra.mxu0 %v6366_v23  ;;  %3199 = vmatpush1.bf16.msra.mxu1 %v6368_v24  ;;  %v561_v23 = vld [vmem:[#allocation5 + $0xca8] sm:$0xff]  ;;  %v6430_v24 = vcombine.low %v548_v11, %v552_v12  ;;  %v6985_v11 = vld [vmem:[#allocation2 + $0x18] ss:$28 sps:$4 sm:$0xff]  }
 0x14e   :  { %3028 = vmatprep.subr.bf16.mxu0 %v6375_v25  ;;  %3200 = vmatprep.subr.bf16.mxu1 %v6377_v29  ;;  %v6432_v25 = vcombine.low %v549_v13, %v553_v15  ;;  %v565_v29 = vld [vmem:[#allocation5 + $0xcc8] sm:$0xff]  ;;  %v6441_v30 = vcombine.high %v557_v21, %v561_v23  ;;  %v6440_v34 = vcombine.low %v557_v21, %v561_v23  ;;  %v166_v13 = vld [vmem:[#allocation5 + $0x50] sm:$0xff]  ;;  %v167_v15 = vld [vmem:[#allocation5 + $0x58] sm:$0xff] }
 0x14f   :  { %v174_v21 = vld [vmem:[#allocation5 + $0x90] sm:$0xff]  ;;  %v175_v23 = vld [vmem:[#allocation5 + $0x98] sm:$0xff] }
 0x151   :  { %3029 = vmatpush1.bf16.msra.mxu0 %v6374_v31  ;;  %3201 = vmatpush1.bf16.msra.mxu1 %v6376_v32  ;;  %v569_v31 = vld [vmem:[#allocation5 + $0xce8] sm:$0xff]  ;;  %v7666_v32 = vmov 0  }
 0x152   :  { %3030 = vmatprep.subr.bf16.mxu0 %v6383_v33  ;;  %3202 = vmatprep.subr.bf16.mxu1 %v6385_v37  ;;  %v6438_v33 = vcombine.low %v556_v19, %v560_v20  ;;  %v576_v37 = vld [vmem:[#allocation5 + $0xd20] sm:$0xff]  ;;  %v6448_v42 = vcombine.low %v565_v29, %v569_v31 }
 0x153   :  { %v6455_v43 = vcombine.high %v572_v36, %v576_v37 }
 0x155   :  { %3031 = vmatpush1.bf16.msra.mxu0 %v6382_v39  ;;  %3203 = vmatpush1.bf16.msra.mxu1 %v6384_v40  ;;  %v6449_v39 = vcombine.high %v565_v29, %v569_v31  ;;  %v577_v40 = vld [vmem:[#allocation5 + $0xd28] sm:$0xff]  ;;  %v182_v29 = vld [vmem:[#allocation5 + $0xd0] sm:$0xff]  ;;  %v183_v31 = vld [vmem:[#allocation5 + $0xd8] sm:$0xff] }
 0x156   :  { %3032 = vmatprep.subr.bf16.mxu0 %v6391_v41  ;;  %3204 = vmatprep.subr.bf16.mxu1 %v6393_v45  ;;  %v6446_v41 = vcombine.low %v564_v27, %v568_v28  ;;  %v584_v45 = vld [vmem:[#allocation5 + $0xd60] sm:$0xff]  ;;  %v6456_v50 = vcombine.low %v573_v38, %v577_v40 }
 0x157   :  { %v6463_v51 = vcombine.high %v580_v44, %v584_v45 }
 0x159   :  { %3033 = vmatpush1.bf16.msra.mxu0 %v6390_v47  ;;  %3205 = vmatpush1.bf16.msra.mxu1 %v6392_v48  ;;  %v6457_v47 = vcombine.high %v573_v38, %v577_v40  ;;  %v585_v48 = vld [vmem:[#allocation5 + $0xd68] sm:$0xff]  ;;  %v194_v40 = vld [vmem:[#allocation5 + $0x130] sm:$0xff] }
 0x15a   :  { %3034 = vmatprep.subr.bf16.mxu0 %v6399_v49  ;;  %3206 = vmatprep.subr.bf16.mxu1 %v6401_v53  ;;  %v6454_v49 = vcombine.low %v572_v36, %v576_v37  ;;  %v592_v53 = vld [vmem:[#allocation5 + $0xda0] sm:$0xff]  ;;  %v6464_v58 = vcombine.low %v581_v46, %v585_v48 }
 0x15b   :  { %v6471_v59 = vcombine.high %v588_v52, %v592_v53 }
 0x15d   :  { %3035 = vmatpush1.bf16.msra.mxu0 %v6398_v55  ;;  %3207 = vmatpush1.bf16.msra.mxu1 %v6400_v56  ;;  %v6465_v55 = vcombine.high %v581_v46, %v585_v48  ;;  %v593_v56 = vld [vmem:[#allocation5 + $0xda8] sm:$0xff]  ;;  %v202_v48 = vld [vmem:[#allocation5 + $0x170] sm:$0xff] }
 0x15e   :  { %3036 = vmatprep.subr.bf16.mxu0 %v6407_v57  ;;  %3208 = vmatprep.subr.bf16.mxu1 %v6409_v61  ;;  %v6462_v57 = vcombine.low %v580_v44, %v584_v45  ;;  %v600_v61 = vld [vmem:[#allocation5 + $0xde0] sm:$0xff]  ;;  %v6472_v2 = vcombine.low %v589_v54, %v593_v56 }
 0x15f   :  { %v6479_v3 = vcombine.high %v596_v60, %v600_v61 }
 0x161   :  { %3037 = vmatpush1.bf16.msra.mxu0 %v6406_v63  ;;  %3209 = vmatpush1.bf16.msra.mxu1 %v6408_v0  ;;  %v6473_v63 = vcombine.high %v589_v54, %v593_v56  ;;  %v601_v0 = vld [vmem:[#allocation5 + $0xde8] sm:$0xff]  ;;  %v206_v56 = vld [vmem:[#allocation5 + $0x190] sm:$0xff] }
 0x162   :  { %3038 = vmatprep.subr.bf16.mxu0 %v6415_v1  ;;  %3210 = vmatprep.subr.bf16.mxu1 %v6417_v5  ;;  %v6470_v1 = vcombine.low %v588_v52, %v592_v53  ;;  %v162_v5 = vld [vmem:[#allocation5 + $0x30] sm:$0xff] }
 0x163   :  { %v6043_v12 = vcombine.high %v158_v4, %v162_v5 }
 0x165   :  { %3039 = vmatpush1.bf16.msra.mxu0 %v6414_v7  ;;  %3211 = vmatpush1.bf16.msra.mxu1 %v6416_v8  ;;  %v6481_v7 = vcombine.high %v597_v62, %v601_v0  ;;  %v163_v8 = vld [vmem:[#allocation5 + $0x38] sm:$0xff] }
 0x166   :  { %3051 = vmatprep.subr.bf16.mxu0 %v6423_v9  ;;  %3223 = vmatprep.subr.bf16.mxu1 %v6425_v14  ;;  %v6478_v9 = vcombine.low %v596_v60, %v600_v61  ;;  %v170_v14 = vld [vmem:[#allocation5 + $0x70] sm:$0xff]  ;;  %v6044_v19 = vcombine.low %v159_v6, %v163_v8 }
 0x167   :  { %v6051_v20 = vcombine.high %v166_v13, %v170_v14 }
 0x168   :  { %3041 = vmatmul.mubr.bf16.vlgmr.msra.gmra.mrb[0].mxu0 %v6984_v10  ;;  %3213 = vmatmul.mubr.bf16.vlgmr.msra.gmra.mrb[0].mxu1 %v6984_v10  ;;  %v6480_v10 = vcombine.low %v597_v62, %v601_v0  ;;  %v214_v0 = vld [vmem:[#allocation5 + $0x1d0] sm:$0xff] }
 0x169   :  { %3052 = vmatpush1.bf16.msra.mxu0 %v6422_v16  ;;  %3224 = vmatpush1.bf16.msra.mxu1 %v6424_v17  ;;  %v6045_v16 = vcombine.high %v159_v6, %v163_v8  ;;  %v171_v17 = vld [vmem:[#allocation5 + $0x78] sm:$0xff]  ;;  %v222_v8 = vld [vmem:[#allocation5 + $0x210] sm:$0xff] }
 0x16a   :  { %3053 = vmatprep.subr.bf16.mxu0 %v6431_v18  ;;  %3225 = vmatprep.subr.bf16.mxu1 %v6433_v22  ;;  %v6042_v18 = vcombine.low %v158_v4, %v162_v5  ;;  %v178_v22 = vld [vmem:[#allocation5 + $0xb0] sm:$0xff]  ;;  %v6052_v27 = vcombine.low %v167_v15, %v171_v17 }
 0x16b   :  { %3083 = vmatprep.mubr.bf16.mxu0 %v7666_v32  ;;  %3255 = vmatprep.mubr.bf16.mxu1 %v7666_v32  ;;  %v6059_v28 = vcombine.high %v174_v21, %v178_v22  ;;  %v6058_v36 = vcombine.low %v174_v21, %v178_v22 }
 0x16d   :  { %3054 = vmatpush1.bf16.msra.mxu0 %v6430_v24  ;;  %3226 = vmatpush1.bf16.msra.mxu1 %v6432_v25  ;;  %v6053_v24 = vcombine.high %v167_v15, %v171_v17  ;;  %v179_v25 = vld [vmem:[#allocation5 + $0xb8] sm:$0xff]  ;;  %v234_v17 = vld [vmem:[#allocation5 + $0x270] sm:$0xff] }
 0x16e   :  { %3055 = vmatprep.subr.bf16.mxu0 %v6439_v26  ;;  %3227 = vmatprep.subr.bf16.mxu1 %v6441_v30  ;;  %v6050_v26 = vcombine.low %v166_v13, %v170_v14  ;;  %v186_v30 = vld [vmem:[#allocation5 + $0xf0] sm:$0xff]  ;;  %v6060_v37 = vcombine.low %v175_v23, %v179_v25 }
 0x16f   :  { %v6067_v38 = vcombine.high %v182_v29, %v186_v30  ;;  %v6066_v44 = vcombine.low %v182_v29, %v186_v30 }
 0x171   :  { %3056 = vmatpush1.bf16.msra.mxu0 %v6438_v33  ;;  %3228 = vmatpush1.bf16.msra.mxu1 %v6440_v34  ;;  %v6061_v33 = vcombine.high %v175_v23, %v179_v25  ;;  %v187_v34 = vld [vmem:[#allocation5 + $0xf8] sm:$0xff]  ;;  %v242_v25 = vld [vmem:[#allocation5 + $0x2b0] sm:$0xff] }
 0x172   :  { %3057 = vmatprep.subr.bf16.mxu0 %v6447_v35  ;;  %3229 = vmatprep.subr.bf16.mxu1 %v6449_v39  ;;  %v7410_v35 = vld [vmem:[#allocation2 + $0x4] ss:$28 sps:$4 sm:$0xff]   ;;  %v190_v39 = vld [vmem:[#allocation5 + $0x110] sm:$0xff]  ;;  %v6068_v45 = vcombine.low %v183_v31, %v187_v34 }
 0x173   :  { %v6075_v46 = vcombine.high %v190_v39, %v194_v40  ;;  %v6074_v52 = vcombine.low %v190_v39, %v194_v40 }
 0x175   :  { %3058 = vmatpush1.bf16.msra.mxu0 %v6446_v41  ;;  %3230 = vmatpush1.bf16.msra.mxu1 %v6448_v42  ;;  %v191_v41 = vld [vmem:[#allocation5 + $0x118] sm:$0xff]  ;;  %v6069_v42 = vcombine.high %v183_v31, %v187_v34  ;;  %v250_v34 = vld [vmem:[#allocation5 + $0x2f0] sm:$0xff] }
 0x176   :  { %3059 = vmatprep.subr.bf16.mxu0 %v6455_v43  ;;  %3231 = vmatprep.subr.bf16.mxu1 %v6457_v47  ;;  %v195_v43 = vld [vmem:[#allocation5 + $0x138] sm:$0xff]  ;;  %v198_v47 = vld [vmem:[#allocation5 + $0x150] sm:$0xff] }
 0x177   :  { %v6076_v53 = vcombine.low %v191_v41, %v195_v43  ;;  %v6083_v54 = vcombine.high %v198_v47, %v202_v48  ;;  %v6082_v60 = vcombine.low %v198_v47, %v202_v48 }
 0x179   :  { %3060 = vmatpush1.bf16.msra.mxu0 %v6454_v49  ;;  %3232 = vmatpush1.bf16.msra.mxu1 %v6456_v50  ;;  %v6077_v49 = vcombine.high %v191_v41, %v195_v43  ;;  %v199_v50 = vld [vmem:[#allocation5 + $0x158] sm:$0xff]  ;;  %v254_v41 = vld [vmem:[#allocation5 + $0x310] sm:$0xff] }
 0x17a   :  { %3061 = vmatprep.subr.bf16.mxu0 %v6463_v51  ;;  %3233 = vmatprep.subr.bf16.mxu1 %v6465_v55  ;;  %v203_v51 = vld [vmem:[#allocation5 + $0x178] sm:$0xff] }
 0x17b   :  { %v6085_v55 = vcombine.high %v199_v50, %v203_v51  ;;  %v6084_v61 = vcombine.low %v199_v50, %v203_v51  ;;  %v255_v43 = vld [vmem:[#allocation5 + $0x318] sm:$0xff]  ;;  %v266_v50 = vld [vmem:[#allocation5 + $0x370] sm:$0xff] }
 0x17c   :  { %v263_v51 = vld [vmem:[#allocation5 + $0x358] sm:$0xff] }
 0x17d   :  { %3062 = vmatpush1.bf16.msra.mxu0 %v6462_v57  ;;  %3234 = vmatpush1.bf16.msra.mxu1 %v6464_v58  ;;  %v210_v57 = vld [vmem:[#allocation5 + $0x1b0] sm:$0xff]  ;;  %v207_v58 = vld [vmem:[#allocation5 + $0x198] sm:$0xff] }
 0x17e   :  { %3063 = vmatprep.subr.bf16.mxu0 %v6471_v59  ;;  %3235 = vmatprep.subr.bf16.mxu1 %v6473_v63  ;;  %v211_v59 = vld [vmem:[#allocation5 + $0x1b8] sm:$0xff]  ;;  %v6091_v62 = vcombine.high %v206_v56, %v210_v57  ;;  %v6090_v4 = vcombine.low %v206_v56, %v210_v57  ;;  %v270_v57 = vld [vmem:[#allocation5 + $0x390] sm:$0xff] }
 0x17f   :  { %v6093_v63 = vcombine.high %v207_v58, %v211_v59  ;;  %v6092_v5 = vcombine.low %v207_v58, %v211_v59  ;;  %v274_v58 = vld [vmem:[#allocation5 + $0x3b0] sm:$0xff]  ;;  %v271_v59 = vld [vmem:[#allocation5 + $0x398] sm:$0xff] }
 0x181   :  { %3064 = vmatpush1.bf16.msra.mxu0 %v6470_v1  ;;  %3236 = vmatpush1.bf16.msra.mxu1 %v6472_v2  ;;  %v218_v1 = vld [vmem:[#allocation5 + $0x1f0] sm:$0xff]  ;;  %v215_v2 = vld [vmem:[#allocation5 + $0x1d8] sm:$0xff] }
 0x182   :  { %3065 = vmatprep.subr.bf16.mxu0 %v6479_v3  ;;  %3237 = vmatprep.subr.bf16.mxu1 %v6481_v7  ;;  %v219_v3 = vld [vmem:[#allocation5 + $0x1f8] sm:$0xff]  ;;  %v6099_v6 = vcombine.high %v214_v0, %v218_v1 }
 0x183   :  { %v6101_v7 = vcombine.high %v215_v2, %v219_v3  ;;  %v6100_v13 = vcombine.low %v215_v2, %v219_v3  ;;  %v282_v2 = vld [vmem:[#allocation5 + $0x3f0] sm:$0xff]  ;;  %v279_v3 = vld [vmem:[#allocation5 + $0x3d8] sm:$0xff] }
 0x185   :  { %3066 = vmatpush1.bf16.msra.mxu0 %v6478_v9  ;;  %3238 = vmatpush1.bf16.msra.mxu1 %v6480_v10  ;;  %v226_v9 = vld [vmem:[#allocation5 + $0x230] sm:$0xff]  ;;  %v223_v10 = vld [vmem:[#allocation5 + $0x218] sm:$0xff] }
 0x186   :  { %3266 = vmatprep.subr.bf16.mxu0 %v6043_v12  ;;  %3438 = vmatprep.subr.bf16.mxu1 %v6045_v16  ;;  %v6098_v12 = vcombine.low %v214_v0, %v218_v1  ;;  %v6107_v14 = vcombine.high %v222_v8, %v226_v9  ;;  %v230_v16 = vld [vmem:[#allocation5 + $0x250] sm:$0xff] }
 0x187   :  { %v6115_v22 = vcombine.high %v230_v16, %v234_v17  ;;  %v278_v1 = vld [vmem:[#allocation5 + $0x3d0] sm:$0xff] }
 0x188   :  { %3084 = vmatmul.mubr.bf16.vlgmr.msra.gmra.mrb[0].mxu0 %v6985_v11  ;;  %3256 = vmatmul.mubr.bf16.vlgmr.msra.gmra.mrb[0].mxu1 %v6985_v11  ;;  %v227_v11 = vld [vmem:[#allocation5 + $0x238] sm:$0xff] }
 0x189   :  { %3267 = vmatpush1.bf16.msra.mxu0 %v6042_v18  ;;  %3439 = vmatpush1.bf16.msra.mxu1 %v6044_v19  ;;  %v6109_v15 = vcombine.high %v223_v10, %v227_v11  ;;  %v231_v18 = vld [vmem:[#allocation5 + $0x258] sm:$0xff]  ;;  %v6108_v21 = vcombine.low %v223_v10, %v227_v11  ;;  %v290_v10 = vld [vmem:[#allocation5 + $0x430] sm:$0xff] }
 0x18a   :  { %3268 = vmatprep.subr.bf16.mxu0 %v6051_v20  ;;  %3440 = vmatprep.subr.bf16.mxu1 %v6053_v24  ;;  %v235_v19 = vld [vmem:[#allocation5 + $0x278] sm:$0xff]  ;;  %v6106_v20 = vcombine.low %v222_v8, %v226_v9  ;;  %v238_v24 = vld [vmem:[#allocation5 + $0x290] sm:$0xff] }
 0x18b   :  { %3298 = vmatprep.mubr.bf16.mxu0 %v7410_v35  ;;  %3470 = vmatprep.mubr.bf16.mxu1 %v7410_v35  ;;  %v6117_v23 = vcombine.high %v231_v18, %v235_v19  ;;  %v6116_v29 = vcombine.low %v231_v18, %v235_v19  ;;  %v6123_v30 = vcombine.high %v238_v24, %v242_v25  ;;  %v247_v35 = vld [vmem:[#allocation5 + $0x2d8] sm:$0xff]  ;;  %v286_v9 = vld [vmem:[#allocation5 + $0x410] sm:$0xff] }
 0x18c   :  { %v287_v11 = vld [vmem:[#allocation5 + $0x418] sm:$0xff]  ;;  %v298_v18 = vld [vmem:[#allocation5 + $0x470] sm:$0xff] }
 0x18d   :  { %3269 = vmatpush1.bf16.msra.mxu0 %v6050_v26  ;;  %3441 = vmatpush1.bf16.msra.mxu1 %v6052_v27  ;;  %v239_v26 = vld [vmem:[#allocation5 + $0x298] sm:$0xff] }
 0x18e   :  { %3270 = vmatprep.subr.bf16.mxu0 %v6059_v28  ;;  %3442 = vmatprep.subr.bf16.mxu1 %v6061_v33  ;;  %v243_v27 = vld [vmem:[#allocation5 + $0x2b8] sm:$0xff]  ;;  %v6114_v28 = vcombine.low %v230_v16, %v234_v17  ;;  %v246_v33 = vld [vmem:[#allocation5 + $0x2d0] sm:$0xff] }
 0x18f   :  { %v6125_v31 = vcombine.high %v239_v26, %v243_v27  ;;  %v6131_v39 = vcombine.high %v246_v33, %v250_v34  ;;  %v294_v17 = vld [vmem:[#allocation5 + $0x450] sm:$0xff]  ;;  %v295_v19 = vld [vmem:[#allocation5 + $0x458] sm:$0xff] }
 0x191   :  { %3271 = vmatpush1.bf16.msra.mxu0 %v6058_v36  ;;  %3443 = vmatpush1.bf16.msra.mxu1 %v6060_v37  ;;  %v251_v36 = vld [vmem:[#allocation5 + $0x2f8] sm:$0xff]  ;;  %v6122_v37 = vcombine.low %v238_v24, %v242_v25  ;;  %v302_v25 = vld [vmem:[#allocation5 + $0x490] sm:$0xff] }
 0x192   :  { %3272 = vmatprep.subr.bf16.mxu0 %v6067_v38  ;;  %3444 = vmatprep.subr.bf16.mxu1 %v6069_v42  ;;  %v6124_v38 = vcombine.low %v239_v26, %v243_v27  ;;  %v6133_v40 = vcombine.high %v247_v35, %v251_v36  ;;  %v258_v42 = vld [vmem:[#allocation5 + $0x330] sm:$0xff]  ;;  %v7411_v27 = vld [vmem:[#allocation2] ss:$28 sps:$4 sm:$0xff]  }
 0x193   :  { %v6139_v47 = vcombine.high %v254_v41, %v258_v42  ;;  %v306_v26 = vld [vmem:[#allocation5 + $0x4b0] sm:$0xff] }
 0x195   :  { %3273 = vmatpush1.bf16.msra.mxu0 %v6066_v44  ;;  %3445 = vmatpush1.bf16.msra.mxu1 %v6068_v45  ;;  %v259_v44 = vld [vmem:[#allocation5 + $0x338] sm:$0xff]  ;;  %v6130_v45 = vcombine.low %v246_v33, %v250_v34  ;;  %v6187_v33 = vcombine.high %v302_v25, %v306_v26 }
 0x196   :  { %3274 = vmatprep.subr.bf16.mxu0 %v6075_v46  ;;  %3446 = vmatprep.subr.bf16.mxu1 %v6077_v49  ;;  %v6132_v46 = vcombine.low %v247_v35, %v251_v36  ;;  %v6141_v48 = vcombine.high %v255_v43, %v259_v44  ;;  %v262_v49 = vld [vmem:[#allocation5 + $0x350] sm:$0xff] }
 0x197   :  { %v310_v35 = vld [vmem:[#allocation5 + $0x4d0] sm:$0xff] }
 0x198   :  { %v314_v36 = vld [vmem:[#allocation5 + $0x4f0] sm:$0xff] }
 0x199   :  { %3275 = vmatpush1.bf16.msra.mxu0 %v6074_v52  ;;  %3447 = vmatpush1.bf16.msra.mxu1 %v6076_v53  ;;  %v267_v52 = vld [vmem:[#allocation5 + $0x378] sm:$0xff]  ;;  %v6138_v53 = vcombine.low %v254_v41, %v258_v42  ;;  %v6195_v42 = vcombine.high %v310_v35, %v314_v36 }
 0x19a   :  { %3276 = vmatprep.subr.bf16.mxu0 %v6083_v54  ;;  %3448 = vmatprep.subr.bf16.mxu1 %v6085_v55  ;;  %v6140_v54 = vcombine.low %v255_v43, %v259_v44  ;;  %v6147_v55 = vcombine.high %v262_v49, %v266_v50  ;;  %v6149_v56 = vcombine.high %v263_v51, %v267_v52  ;;  %v318_v44 = vld [vmem:[#allocation5 + $0x510] sm:$0xff] }
 0x19d   :  { %3277 = vmatpush1.bf16.msra.mxu0 %v6082_v60  ;;  %3449 = vmatpush1.bf16.msra.mxu1 %v6084_v61  ;;  %v275_v60 = vld [vmem:[#allocation5 + $0x3b8] sm:$0xff]  ;;  %v6146_v61 = vcombine.low %v262_v49, %v266_v50 }
 0x19e   :  { %3278 = vmatprep.subr.bf16.mxu0 %v6091_v62  ;;  %3450 = vmatprep.subr.bf16.mxu1 %v6093_v63  ;;  %v6148_v62 = vcombine.low %v263_v51, %v267_v52  ;;  %v6155_v63 = vcombine.high %v270_v57, %v274_v58  ;;  %v6157_v0 = vcombine.high %v271_v59, %v275_v60  ;;  %v326_v52 = vld [vmem:[#allocation5 + $0x550] sm:$0xff] }
 0x1a1   :  { %3279 = vmatpush1.bf16.msra.mxu0 %v6090_v4  ;;  %3451 = vmatpush1.bf16.msra.mxu1 %v6092_v5  ;;  %v283_v4 = vld [vmem:[#allocation5 + $0x3f8] sm:$0xff]  ;;  %v6154_v5 = vcombine.low %v270_v57, %v274_v58 }
 0x1a2   :  { %3280 = vmatprep.subr.bf16.mxu0 %v6099_v6  ;;  %3452 = vmatprep.subr.bf16.mxu1 %v6101_v7  ;;  %v6156_v6 = vcombine.low %v271_v59, %v275_v60  ;;  %v6163_v7 = vcombine.high %v278_v1, %v282_v2  ;;  %v6165_v8 = vcombine.high %v279_v3, %v283_v4  ;;  %v334_v60 = vld [vmem:[#allocation5 + $0x590] sm:$0xff] }
 0x1a5   :  { %3281 = vmatpush1.bf16.msra.mxu0 %v6098_v12  ;;  %3453 = vmatpush1.bf16.msra.mxu1 %v6100_v13  ;;  %v291_v12 = vld [vmem:[#allocation5 + $0x438] sm:$0xff]  ;;  %v6162_v13 = vcombine.low %v278_v1, %v282_v2 }
 0x1a6   :  { %3282 = vmatprep.subr.bf16.mxu0 %v6107_v14  ;;  %3454 = vmatprep.subr.bf16.mxu1 %v6109_v15  ;;  %v6164_v14 = vcombine.low %v279_v3, %v283_v4  ;;  %v6171_v15 = vcombine.high %v286_v9, %v290_v10  ;;  %v6173_v16 = vcombine.high %v287_v11, %v291_v12  ;;  %v342_v4 = vld [vmem:[#allocation5 + $0x5d0] sm:$0xff] }
 0x1a9   :  { %3283 = vmatpush1.bf16.msra.mxu0 %v6106_v20  ;;  %3455 = vmatpush1.bf16.msra.mxu1 %v6108_v21  ;;  %v299_v20 = vld [vmem:[#allocation5 + $0x478] sm:$0xff]  ;;  %v6170_v21 = vcombine.low %v286_v9, %v290_v10 }
 0x1aa   :  { %3284 = vmatprep.subr.bf16.mxu0 %v6115_v22  ;;  %3456 = vmatprep.subr.bf16.mxu1 %v6117_v23  ;;  %v6172_v22 = vcombine.low %v287_v11, %v291_v12  ;;  %v6179_v23 = vcombine.high %v294_v17, %v298_v18  ;;  %v6181_v24 = vcombine.high %v295_v19, %v299_v20  ;;  %v350_v12 = vld [vmem:[#allocation5 + $0x610] sm:$0xff] }
 0x1ad   :  { %3285 = vmatpush1.bf16.msra.mxu0 %v6114_v28  ;;  %3457 = vmatpush1.bf16.msra.mxu1 %v6116_v29  ;;  %v303_v28 = vld [vmem:[#allocation5 + $0x498] sm:$0xff] }
 0x1ae   :  { %3286 = vmatprep.subr.bf16.mxu0 %v6123_v30  ;;  %3458 = vmatprep.subr.bf16.mxu1 %v6125_v31  ;;  %v307_v29 = vld [vmem:[#allocation5 + $0x4b8] sm:$0xff]  ;;  %v6178_v30 = vcombine.low %v294_v17, %v298_v18  ;;  %v6180_v31 = vcombine.low %v295_v19, %v299_v20  ;;  %v358_v20 = vld [vmem:[#allocation5 + $0x650] sm:$0xff] }
 0x1af   :  { %v6189_v34 = vcombine.high %v303_v28, %v307_v29  ;;  %v6188_v41 = vcombine.low %v303_v28, %v307_v29  ;;  %v366_v28 = vld [vmem:[#allocation5 + $0x690] sm:$0xff] }
 0x1b0   :  { %v370_v29 = vld [vmem:[#allocation5 + $0x6b0] sm:$0xff] }
 0x1b1   :  { %3287 = vmatpush1.bf16.msra.mxu0 %v6122_v37  ;;  %3459 = vmatpush1.bf16.msra.mxu1 %v6124_v38  ;;  %v7412_v37 = vld [vmem:[#allocation2 + $0xc] ss:$28 sps:$4 sm:$0xff]   ;;  %v311_v38 = vld [vmem:[#allocation5 + $0x4d8] sm:$0xff] }
 0x1b2   :  { %3288 = vmatprep.subr.bf16.mxu0 %v6131_v39  ;;  %3460 = vmatprep.subr.bf16.mxu1 %v6133_v40  ;;  %v315_v39 = vld [vmem:[#allocation5 + $0x4f8] sm:$0xff]  ;;  %v6186_v40 = vcombine.low %v302_v25, %v306_v26 }
 0x1b3   :  { %v6197_v43 = vcombine.high %v311_v38, %v315_v39  ;;  %v6196_v49 = vcombine.low %v311_v38, %v315_v39  ;;  %v378_v38 = vld [vmem:[#allocation5 + $0x6f0] sm:$0xff]  ;;  %v375_v39 = vld [vmem:[#allocation5 + $0x6d8] sm:$0xff] }
 0x1b5   :  { %3289 = vmatpush1.bf16.msra.mxu0 %v6130_v45  ;;  %3461 = vmatpush1.bf16.msra.mxu1 %v6132_v46  ;;  %v322_v45 = vld [vmem:[#allocation5 + $0x530] sm:$0xff]  ;;  %v319_v46 = vld [vmem:[#allocation5 + $0x518] sm:$0xff] }
 0x1b6   :  { %3290 = vmatprep.subr.bf16.mxu0 %v6139_v47  ;;  %3462 = vmatprep.subr.bf16.mxu1 %v6141_v48  ;;  %v323_v47 = vld [vmem:[#allocation5 + $0x538] sm:$0xff]  ;;  %v6194_v48 = vcombine.low %v310_v35, %v314_v36  ;;  %v6203_v50 = vcombine.high %v318_v44, %v322_v45  ;;  %v6251_v35 = vcombine.high %v366_v28, %v370_v29 }
 0x1b7   :  { %v6205_v51 = vcombine.high %v319_v46, %v323_v47  ;;  %v6204_v57 = vcombine.low %v319_v46, %v323_v47  ;;  %v386_v46 = vld [vmem:[#allocation5 + $0x730] sm:$0xff]  ;;  %v383_v47 = vld [vmem:[#allocation5 + $0x718] sm:$0xff] }
 0x1b9   :  { %3291 = vmatpush1.bf16.msra.mxu0 %v6138_v53  ;;  %3463 = vmatpush1.bf16.msra.mxu1 %v6140_v54  ;;  %v330_v53 = vld [vmem:[#allocation5 + $0x570] sm:$0xff]  ;;  %v327_v54 = vld [vmem:[#allocation5 + $0x558] sm:$0xff] }
 0x1ba   :  { %3292 = vmatprep.subr.bf16.mxu0 %v6147_v55  ;;  %3464 = vmatprep.subr.bf16.mxu1 %v6149_v56  ;;  %v331_v55 = vld [vmem:[#allocation5 + $0x578] sm:$0xff]  ;;  %v6202_v56 = vcombine.low %v318_v44, %v322_v45  ;;  %v6211_v58 = vcombine.high %v326_v52, %v330_v53  ;;  %v382_v45 = vld [vmem:[#allocation5 + $0x710] sm:$0xff] }
 0x1bb   :  { %v6213_v59 = vcombine.high %v327_v54, %v331_v55  ;;  %v6212_v1 = vcombine.low %v327_v54, %v331_v55  ;;  %v394_v54 = vld [vmem:[#allocation5 + $0x770] sm:$0xff]  ;;  %v391_v55 = vld [vmem:[#allocation5 + $0x758] sm:$0xff] }
 0x1bd   :  { %3293 = vmatpush1.bf16.msra.mxu0 %v6146_v61  ;;  %3465 = vmatpush1.bf16.msra.mxu1 %v6148_v62  ;;  %v338_v61 = vld [vmem:[#allocation5 + $0x5b0] sm:$0xff]  ;;  %v335_v62 = vld [vmem:[#allocation5 + $0x598] sm:$0xff] }
 0x1be   :  { %3294 = vmatprep.subr.bf16.mxu0 %v6155_v63  ;;  %3466 = vmatprep.subr.bf16.mxu1 %v6157_v0  ;;  %v339_v63 = vld [vmem:[#allocation5 + $0x5b8] sm:$0xff]  ;;  %v6210_v0 = vcombine.low %v326_v52, %v330_v53  ;;  %v6219_v2 = vcombine.high %v334_v60, %v338_v61  ;;  %v390_v53 = vld [vmem:[#allocation5 + $0x750] sm:$0xff] }
 0x1bf   :  { %v6221_v3 = vcombine.high %v335_v62, %v339_v63  ;;  %v6220_v9 = vcombine.low %v335_v62, %v339_v63  ;;  %v402_v62 = vld [vmem:[#allocation5 + $0x7b0] sm:$0xff]  ;;  %v399_v63 = vld [vmem:[#allocation5 + $0x798] sm:$0xff] }
 0x1c1   :  { %3295 = vmatpush1.bf16.msra.mxu0 %v6154_v5  ;;  %3467 = vmatpush1.bf16.msra.mxu1 %v6156_v6  ;;  %v346_v5 = vld [vmem:[#allocation5 + $0x5f0] sm:$0xff]  ;;  %v343_v6 = vld [vmem:[#allocation5 + $0x5d8] sm:$0xff] }
 0x1c2   :  { %3296 = vmatprep.subr.bf16.mxu0 %v6163_v7  ;;  %3468 = vmatprep.subr.bf16.mxu1 %v6165_v8  ;;  %v347_v7 = vld [vmem:[#allocation5 + $0x5f8] sm:$0xff]  ;;  %v6218_v8 = vcombine.low %v334_v60, %v338_v61  ;;  %v6227_v10 = vcombine.high %v342_v4, %v346_v5  ;;  %v398_v61 = vld [vmem:[#allocation5 + $0x790] sm:$0xff] }
 0x1c3   :  { %v6229_v11 = vcombine.high %v343_v6, %v347_v7  ;;  %v6228_v17 = vcombine.low %v343_v6, %v347_v7  ;;  %v410_v6 = vld [vmem:[#allocation5 + $0x7f0] sm:$0xff]  ;;  %v407_v7 = vld [vmem:[#allocation5 + $0x7d8] sm:$0xff] }
 0x1c5   :  { %3297 = vmatpush1.bf16.msra.mxu0 %v6162_v13  ;;  %3469 = vmatpush1.bf16.msra.mxu1 %v6164_v14  ;;  %v354_v13 = vld [vmem:[#allocation5 + $0x630] sm:$0xff]  ;;  %v351_v14 = vld [vmem:[#allocation5 + $0x618] sm:$0xff] }
 0x1c6   :  { %3309 = vmatprep.subr.bf16.mxu0 %v6171_v15  ;;  %3481 = vmatprep.subr.bf16.mxu1 %v6173_v16  ;;  %v355_v15 = vld [vmem:[#allocation5 + $0x638] sm:$0xff]  ;;  %v6226_v16 = vcombine.low %v342_v4, %v346_v5  ;;  %v6235_v18 = vcombine.high %v350_v12, %v354_v13  ;;  %v406_v5 = vld [vmem:[#allocation5 + $0x7d0] sm:$0xff] }
 0x1c7   :  { %v6237_v19 = vcombine.high %v351_v14, %v355_v15  ;;  %v6236_v25 = vcombine.low %v351_v14, %v355_v15  ;;  %v418_v14 = vld [vmem:[#allocation5 + $0x830] sm:$0xff]  ;;  %v415_v15 = vld [vmem:[#allocation5 + $0x818] sm:$0xff] }
 0x1c8   :  { %3299 = vmatmul.mubr.bf16.vlgmr.msra.gmra.mrb[4].mxu0 %v7411_v27  ;;  %3471 = vmatmul.mubr.bf16.vlgmr.msra.gmra.mrb[4].mxu1 %v7411_v27 }
 0x1c9   :  { %3310 = vmatpush1.bf16.msra.mxu0 %v6170_v21  ;;  %3482 = vmatpush1.bf16.msra.mxu1 %v6172_v22  ;;  %v362_v21 = vld [vmem:[#allocation5 + $0x670] sm:$0xff]  ;;  %v359_v22 = vld [vmem:[#allocation5 + $0x658] sm:$0xff] }
 0x1ca   :  { %3311 = vmatprep.subr.bf16.mxu0 %v6179_v23  ;;  %3483 = vmatprep.subr.bf16.mxu1 %v6181_v24  ;;  %v363_v23 = vld [vmem:[#allocation5 + $0x678] sm:$0xff]  ;;  %v6234_v24 = vcombine.low %v350_v12, %v354_v13  ;;  %v6243_v26 = vcombine.high %v358_v20, %v362_v21  ;;  %v414_v13 = vld [vmem:[#allocation5 + $0x810] sm:$0xff] }
 0x1cb   :  { %3341 = vmatprep.mubr.bf16.mxu0 %v7412_v37  ;;  %3513 = vmatprep.mubr.bf16.mxu1 %v7412_v37  ;;  %v6245_v27 = vcombine.high %v359_v22, %v363_v23  ;;  %v374_v37 = vld [vmem:[#allocation5 + $0x6d0] sm:$0xff] }
 0x1cd   :  { %3312 = vmatpush1.bf16.msra.mxu0 %v6178_v30  ;;  %3484 = vmatpush1.bf16.msra.mxu1 %v6180_v31  ;;  %v367_v30 = vld [vmem:[#allocation5 + $0x698] sm:$0xff] }
 0x1ce   :  { %3313 = vmatprep.subr.bf16.mxu0 %v6187_v33  ;;  %3485 = vmatprep.subr.bf16.mxu1 %v6189_v34  ;;  %v371_v31 = vld [vmem:[#allocation5 + $0x6b8] sm:$0xff]  ;;  %v6242_v33 = vcombine.low %v358_v20, %v362_v21  ;;  %v6244_v34 = vcombine.low %v359_v22, %v363_v23  ;;  %v422_v21 = vld [vmem:[#allocation5 + $0x850] sm:$0xff] }
 0x1cf   :  { %v6253_v36 = vcombine.high %v367_v30, %v371_v31  ;;  %v426_v22 = vld [vmem:[#allocation5 + $0x870] sm:$0xff]  ;;  %v423_v23 = vld [vmem:[#allocation5 + $0x858] sm:$0xff] }
 0x1d1   :  { %3314 = vmatpush1.bf16.msra.mxu0 %v6186_v40  ;;  %3486 = vmatpush1.bf16.msra.mxu1 %v6188_v41  ;;  %v379_v40 = vld [vmem:[#allocation5 + $0x6f8] sm:$0xff]  ;;  %v6250_v41 = vcombine.low %v366_v28, %v370_v29  ;;  %v430_v29 = vld [vmem:[#allocation5 + $0x890] sm:$0xff] }
 0x1d2   :  { %3315 = vmatprep.subr.bf16.mxu0 %v6195_v42  ;;  %3487 = vmatprep.subr.bf16.mxu1 %v6197_v43  ;;  %v6252_v42 = vcombine.low %v367_v30, %v371_v31  ;;  %v6259_v43 = vcombine.high %v374_v37, %v378_v38  ;;  %v6261_v44 = vcombine.high %v375_v39, %v379_v40  ;;  %v434_v30 = vld [vmem:[#allocation5 + $0x8b0] sm:$0xff] }
 0x1d3   :  { %v7413_v31 = vld [vmem:[#allocation2 + $0x8] ss:$28 sps:$4 sm:$0xff]  }
 0x1d5   :  { %3316 = vmatpush1.bf16.msra.mxu0 %v6194_v48  ;;  %3488 = vmatpush1.bf16.msra.mxu1 %v6196_v49  ;;  %v387_v48 = vld [vmem:[#allocation5 + $0x738] sm:$0xff]  ;;  %v6258_v49 = vcombine.low %v374_v37, %v378_v38  ;;  %v6315_v37 = vcombine.high %v430_v29, %v434_v30 }
 0x1d6   :  { %3317 = vmatprep.subr.bf16.mxu0 %v6203_v50  ;;  %3489 = vmatprep.subr.bf16.mxu1 %v6205_v51  ;;  %v6260_v50 = vcombine.low %v375_v39, %v379_v40  ;;  %v6267_v51 = vcombine.high %v382_v45, %v386_v46  ;;  %v6269_v52 = vcombine.high %v383_v47, %v387_v48  ;;  %v438_v39 = vld [vmem:[#allocation5 + $0x8d0] sm:$0xff] }
 0x1d7   :  { %v442_v40 = vld [vmem:[#allocation5 + $0x8f0] sm:$0xff] }
 0x1d9   :  { %3318 = vmatpush1.bf16.msra.mxu0 %v6202_v56  ;;  %3490 = vmatpush1.bf16.msra.mxu1 %v6204_v57  ;;  %v395_v56 = vld [vmem:[#allocation5 + $0x778] sm:$0xff]  ;;  %v6266_v57 = vcombine.low %v382_v45, %v386_v46  ;;  %v6323_v46 = vcombine.high %v438_v39, %v442_v40 }
 0x1da   :  { %3319 = vmatprep.subr.bf16.mxu0 %v6211_v58  ;;  %3491 = vmatprep.subr.bf16.mxu1 %v6213_v59  ;;  %v6268_v58 = vcombine.low %v383_v47, %v387_v48  ;;  %v6275_v59 = vcombine.high %v390_v53, %v394_v54  ;;  %v6277_v60 = vcombine.high %v391_v55, %v395_v56  ;;  %v446_v48 = vld [vmem:[#allocation5 + $0x910] sm:$0xff] }
 0x1dd   :  { %3320 = vmatpush1.bf16.msra.mxu0 %v6210_v0  ;;  %3492 = vmatpush1.bf16.msra.mxu1 %v6212_v1  ;;  %v403_v0 = vld [vmem:[#allocation5 + $0x7b8] sm:$0xff]  ;;  %v6274_v1 = vcombine.low %v390_v53, %v394_v54 }
 0x1de   :  { %3321 = vmatprep.subr.bf16.mxu0 %v6219_v2  ;;  %3493 = vmatprep.subr.bf16.mxu1 %v6221_v3  ;;  %v6276_v2 = vcombine.low %v391_v55, %v395_v56  ;;  %v6283_v3 = vcombine.high %v398_v61, %v402_v62  ;;  %v6285_v4 = vcombine.high %v399_v63, %v403_v0  ;;  %v454_v56 = vld [vmem:[#allocation5 + $0x950] sm:$0xff] }
 0x1e1   :  { %3322 = vmatpush1.bf16.msra.mxu0 %v6218_v8  ;;  %3494 = vmatpush1.bf16.msra.mxu1 %v6220_v9  ;;  %v411_v8 = vld [vmem:[#allocation5 + $0x7f8] sm:$0xff]  ;;  %v6282_v9 = vcombine.low %v398_v61, %v402_v62 }
 0x1e2   :  { %3323 = vmatprep.subr.bf16.mxu0 %v6227_v10  ;;  %3495 = vmatprep.subr.bf16.mxu1 %v6229_v11  ;;  %v6284_v10 = vcombine.low %v399_v63, %v403_v0  ;;  %v6291_v11 = vcombine.high %v406_v5, %v410_v6  ;;  %v6293_v12 = vcombine.high %v407_v7, %v411_v8  ;;  %v462_v0 = vld [vmem:[#allocation5 + $0x990] sm:$0xff] }
 0x1e5   :  { %3324 = vmatpush1.bf16.msra.mxu0 %v6226_v16  ;;  %3496 = vmatpush1.bf16.msra.mxu1 %v6228_v17  ;;  %v419_v16 = vld [vmem:[#allocation5 + $0x838] sm:$0xff]  ;;  %v6290_v17 = vcombine.low %v406_v5, %v410_v6 }
 0x1e6   :  { %3325 = vmatprep.subr.bf16.mxu0 %v6235_v18  ;;  %3497 = vmatprep.subr.bf16.mxu1 %v6237_v19  ;;  %v6292_v18 = vcombine.low %v407_v7, %v411_v8  ;;  %v6299_v19 = vcombine.high %v414_v13, %v418_v14  ;;  %v6301_v20 = vcombine.high %v415_v15, %v419_v16  ;;  %v470_v8 = vld [vmem:[#allocation5 + $0x9d0] sm:$0xff] }
 0x1e9   :  { %3326 = vmatpush1.bf16.msra.mxu0 %v6234_v24  ;;  %3498 = vmatpush1.bf16.msra.mxu1 %v6236_v25  ;;  %v427_v24 = vld [vmem:[#allocation5 + $0x878] sm:$0xff]  ;;  %v6298_v25 = vcombine.low %v414_v13, %v418_v14 }
 0x1ea   :  { %3327 = vmatprep.subr.bf16.mxu0 %v6243_v26  ;;  %3499 = vmatprep.subr.bf16.mxu1 %v6245_v27  ;;  %v6300_v26 = vcombine.low %v415_v15, %v419_v16  ;;  %v6307_v27 = vcombine.high %v422_v21, %v426_v22  ;;  %v6309_v28 = vcombine.high %v423_v23, %v427_v24  ;;  %v478_v16 = vld [vmem:[#allocation5 + $0xa10] sm:$0xff] }
 0x1ed   :  { %3328 = vmatpush1.bf16.msra.mxu0 %v6242_v33  ;;  %3500 = vmatpush1.bf16.msra.mxu1 %v6244_v34  ;;  %v431_v33 = vld [vmem:[#allocation5 + $0x898] sm:$0xff] }
 0x1ee   :  { %3329 = vmatprep.subr.bf16.mxu0 %v6251_v35  ;;  %3501 = vmatprep.subr.bf16.mxu1 %v6253_v36  ;;  %v435_v34 = vld [vmem:[#allocation5 + $0x8b8] sm:$0xff]  ;;  %v6306_v35 = vcombine.low %v422_v21, %v426_v22  ;;  %v6308_v36 = vcombine.low %v423_v23, %v427_v24  ;;  %v486_v24 = vld [vmem:[#allocation5 + $0xa50] sm:$0xff] }
 0x1ef   :  { %v6317_v38 = vcombine.high %v431_v33, %v435_v34  ;;  %v6316_v45 = vcombine.low %v431_v33, %v435_v34  ;;  %v494_v33 = vld [vmem:[#allocation5 + $0xa90] sm:$0xff] }
 0x1f0   :  { %v498_v34 = vld [vmem:[#allocation5 + $0xab0] sm:$0xff] }
 0x1f1   :  { %3330 = vmatpush1.bf16.msra.mxu0 %v6250_v41  ;;  %3502 = vmatpush1.bf16.msra.mxu1 %v6252_v42  ;;  %v7414_v41 = vld [vmem:[#allocation2 + $0x14] ss:$28 sps:$4 sm:$0xff]  }
 0x1f2   :  { %3331 = vmatprep.subr.bf16.mxu0 %v6259_v43  ;;  %3503 = vmatprep.subr.bf16.mxu1 %v6261_v44  ;;  %v439_v42 = vld [vmem:[#allocation5 + $0x8d8] sm:$0xff]  ;;  %v6314_v44 = vcombine.low %v430_v29, %v434_v30 }
 0x1f3   :  { %v443_v43 = vld [vmem:[#allocation5 + $0x8f8] sm:$0xff] }
 0x1f4   :  { %v6325_v47 = vcombine.high %v439_v42, %v443_v43  ;;  %v6324_v53 = vcombine.low %v439_v42, %v443_v43  ;;  %v506_v42 = vld [vmem:[#allocation5 + $0xaf0] sm:$0xff]  ;;  %v503_v43 = vld [vmem:[#allocation5 + $0xad8] sm:$0xff] }
 0x1f5   :  { %3332 = vmatpush1.bf16.msra.mxu0 %v6258_v49  ;;  %3504 = vmatpush1.bf16.msra.mxu1 %v6260_v50  ;;  %v450_v49 = vld [vmem:[#allocation5 + $0x930] sm:$0xff]  ;;  %v447_v50 = vld [vmem:[#allocation5 + $0x918] sm:$0xff] }
 0x1f6   :  { %3333 = vmatprep.subr.bf16.mxu0 %v6267_v51  ;;  %3505 = vmatprep.subr.bf16.mxu1 %v6269_v52  ;;  %v451_v51 = vld [vmem:[#allocation5 + $0x938] sm:$0xff]  ;;  %v6322_v52 = vcombine.low %v438_v39, %v442_v40  ;;  %v6331_v54 = vcombine.high %v446_v48, %v450_v49  ;;  %v6379_v39 = vcombine.high %v494_v33, %v498_v34 }
 0x1f7   :  { %v6333_v55 = vcombine.high %v447_v50, %v451_v51  ;;  %v6332_v61 = vcombine.low %v447_v50, %v451_v51  ;;  %v514_v50 = vld [vmem:[#allocation5 + $0xb30] sm:$0xff]  ;;  %v511_v51 = vld [vmem:[#allocation5 + $0xb18] sm:$0xff] }
 0x1f9   :  { %3334 = vmatpush1.bf16.msra.mxu0 %v6266_v57  ;;  %3506 = vmatpush1.bf16.msra.mxu1 %v6268_v58  ;;  %v458_v57 = vld [vmem:[#allocation5 + $0x970] sm:$0xff]  ;;  %v455_v58 = vld [vmem:[#allocation5 + $0x958] sm:$0xff] }
 0x1fa   :  { %3335 = vmatprep.subr.bf16.mxu0 %v6275_v59  ;;  %3507 = vmatprep.subr.bf16.mxu1 %v6277_v60  ;;  %v459_v59 = vld [vmem:[#allocation5 + $0x978] sm:$0xff]  ;;  %v6330_v60 = vcombine.low %v446_v48, %v450_v49  ;;  %v6339_v62 = vcombine.high %v454_v56, %v458_v57  ;;  %v510_v49 = vld [vmem:[#allocation5 + $0xb10] sm:$0xff] }
 0x1fb   :  { %v6341_v63 = vcombine.high %v455_v58, %v459_v59  ;;  %v6340_v5 = vcombine.low %v455_v58, %v459_v59  ;;  %v522_v58 = vld [vmem:[#allocation5 + $0xb70] sm:$0xff]  ;;  %v519_v59 = vld [vmem:[#allocation5 + $0xb58] sm:$0xff] }
 0x1fd   :  { %3336 = vmatpush1.bf16.msra.mxu0 %v6274_v1  ;;  %3508 = vmatpush1.bf16.msra.mxu1 %v6276_v2  ;;  %v466_v1 = vld [vmem:[#allocation5 + $0x9b0] sm:$0xff]  ;;  %v463_v2 = vld [vmem:[#allocation5 + $0x998] sm:$0xff] }
 0x1fe   :  { %3337 = vmatprep.subr.bf16.mxu0 %v6283_v3  ;;  %3509 = vmatprep.subr.bf16.mxu1 %v6285_v4  ;;  %v467_v3 = vld [vmem:[#allocation5 + $0x9b8] sm:$0xff]  ;;  %v6338_v4 = vcombine.low %v454_v56, %v458_v57  ;;  %v6347_v6 = vcombine.high %v462_v0, %v466_v1  ;;  %v518_v57 = vld [vmem:[#allocation5 + $0xb50] sm:$0xff] }
 0x1ff   :  { %v6349_v7 = vcombine.high %v463_v2, %v467_v3  ;;  %v6348_v13 = vcombine.low %v463_v2, %v467_v3  ;;  %v530_v2 = vld [vmem:[#allocation5 + $0xbb0] sm:$0xff]  ;;  %v527_v3 = vld [vmem:[#allocation5 + $0xb98] sm:$0xff] }
 0x201   :  { %3338 = vmatpush1.bf16.msra.mxu0 %v6282_v9  ;;  %3510 = vmatpush1.bf16.msra.mxu1 %v6284_v10  ;;  %v474_v9 = vld [vmem:[#allocation5 + $0x9f0] sm:$0xff]  ;;  %v471_v10 = vld [vmem:[#allocation5 + $0x9d8] sm:$0xff] }
 0x202   :  { %3339 = vmatprep.subr.bf16.mxu0 %v6291_v11  ;;  %3511 = vmatprep.subr.bf16.mxu1 %v6293_v12  ;;  %v475_v11 = vld [vmem:[#allocation5 + $0x9f8] sm:$0xff]  ;;  %v6346_v12 = vcombine.low %v462_v0, %v466_v1  ;;  %v6355_v14 = vcombine.high %v470_v8, %v474_v9  ;;  %v526_v1 = vld [vmem:[#allocation5 + $0xb90] sm:$0xff] }
 0x203   :  { %v6357_v15 = vcombine.high %v471_v10, %v475_v11  ;;  %v6356_v21 = vcombine.low %v471_v10, %v475_v11  ;;  %v538_v10 = vld [vmem:[#allocation5 + $0xbf0] sm:$0xff]  ;;  %v535_v11 = vld [vmem:[#allocation5 + $0xbd8] sm:$0xff] }
 0x205   :  { %3340 = vmatpush1.bf16.msra.mxu0 %v6290_v17  ;;  %3512 = vmatpush1.bf16.msra.mxu1 %v6292_v18  ;;  %v482_v17 = vld [vmem:[#allocation5 + $0xa30] sm:$0xff]  ;;  %v479_v18 = vld [vmem:[#allocation5 + $0xa18] sm:$0xff] }
 0x206   :  { %3352 = vmatprep.subr.bf16.mxu0 %v6299_v19  ;;  %3524 = vmatprep.subr.bf16.mxu1 %v6301_v20  ;;  %v483_v19 = vld [vmem:[#allocation5 + $0xa38] sm:$0xff]  ;;  %v6354_v20 = vcombine.low %v470_v8, %v474_v9  ;;  %v6363_v22 = vcombine.high %v478_v16, %v482_v17  ;;  %v534_v9 = vld [vmem:[#allocation5 + $0xbd0] sm:$0xff] }
 0x207   :  { %v6365_v23 = vcombine.high %v479_v18, %v483_v19  ;;  %v6364_v29 = vcombine.low %v479_v18, %v483_v19  ;;  %v546_v18 = vld [vmem:[#allocation5 + $0xc30] sm:$0xff]  ;;  %v543_v19 = vld [vmem:[#allocation5 + $0xc18] sm:$0xff] }
 0x208   :  { %3342 = vmatmul.mubr.bf16.vlgmr.msra.gmra.mrb[4].mxu0 %v7413_v31  ;;  %3514 = vmatmul.mubr.bf16.vlgmr.msra.gmra.mrb[4].mxu1 %v7413_v31 }
 0x209   :  { %3353 = vmatpush1.bf16.msra.mxu0 %v6298_v25  ;;  %3525 = vmatpush1.bf16.msra.mxu1 %v6300_v26  ;;  %v490_v25 = vld [vmem:[#allocation5 + $0xa70] sm:$0xff]  ;;  %v487_v26 = vld [vmem:[#allocation5 + $0xa58] sm:$0xff] }
 0x20a   :  { %3354 = vmatprep.subr.bf16.mxu0 %v6307_v27  ;;  %3526 = vmatprep.subr.bf16.mxu1 %v6309_v28  ;;  %v491_v27 = vld [vmem:[#allocation5 + $0xa78] sm:$0xff]  ;;  %v6362_v28 = vcombine.low %v478_v16, %v482_v17  ;;  %v6371_v30 = vcombine.high %v486_v24, %v490_v25  ;;  %v542_v17 = vld [vmem:[#allocation5 + $0xc10] sm:$0xff] }
 0x20b   :  { %3384 = vmatprep.mubr.bf16.mxu0 %v7414_v41  ;;  %3556 = vmatprep.mubr.bf16.mxu1 %v7414_v41  ;;  %v6373_v31 = vcombine.high %v487_v26, %v491_v27  ;;  %v502_v41 = vld [vmem:[#allocation5 + $0xad0] sm:$0xff] }
 0x20d   :  { %3355 = vmatpush1.bf16.msra.mxu0 %v6306_v35  ;;  %3527 = vmatpush1.bf16.msra.mxu1 %v6308_v36  ;;  %v495_v35 = vld [vmem:[#allocation5 + $0xa98] sm:$0xff] }
 0x20e   :  { %3356 = vmatprep.subr.bf16.mxu0 %v6315_v37  ;;  %3528 = vmatprep.subr.bf16.mxu1 %v6317_v38  ;;  %v499_v36 = vld [vmem:[#allocation5 + $0xab8] sm:$0xff]  ;;  %v6370_v37 = vcombine.low %v486_v24, %v490_v25  ;;  %v6372_v38 = vcombine.low %v487_v26, %v491_v27  ;;  %v550_v25 = vld [vmem:[#allocation5 + $0xc50] sm:$0xff] }
 0x20f   :  { %v6381_v40 = vcombine.high %v495_v35, %v499_v36  ;;  %v554_v26 = vld [vmem:[#allocation5 + $0xc70] sm:$0xff]  ;;  %v551_v27 = vld [vmem:[#allocation5 + $0xc58] sm:$0xff] }
 0x211   :  { %3357 = vmatpush1.bf16.msra.mxu0 %v6314_v44  ;;  %3529 = vmatpush1.bf16.msra.mxu1 %v6316_v45  ;;  %v507_v44 = vld [vmem:[#allocation5 + $0xaf8] sm:$0xff]  ;;  %v6378_v45 = vcombine.low %v494_v33, %v498_v34  ;;  %v558_v34 = vld [vmem:[#allocation5 + $0xc90] sm:$0xff] }
 0x212   :  { %3358 = vmatprep.subr.bf16.mxu0 %v6323_v46  ;;  %3530 = vmatprep.subr.bf16.mxu1 %v6325_v47  ;;  %v6380_v46 = vcombine.low %v495_v35, %v499_v36  ;;  %v6387_v47 = vcombine.high %v502_v41, %v506_v42  ;;  %v6389_v48 = vcombine.high %v503_v43, %v507_v44  ;;  %v562_v35 = vld [vmem:[#allocation5 + $0xcb0] sm:$0xff] }
 0x213   :  { %v7415_v36 = vld [vmem:[#allocation2 + $0x10] ss:$28 sps:$4 sm:$0xff]  }
 0x215   :  { %3359 = vmatpush1.bf16.msra.mxu0 %v6322_v52  ;;  %3531 = vmatpush1.bf16.msra.mxu1 %v6324_v53  ;;  %v515_v52 = vld [vmem:[#allocation5 + $0xb38] sm:$0xff]  ;;  %v6386_v53 = vcombine.low %v502_v41, %v506_v42  ;;  %v6443_v41 = vcombine.high %v558_v34, %v562_v35 }
 0x216   :  { %3360 = vmatprep.subr.bf16.mxu0 %v6331_v54  ;;  %3532 = vmatprep.subr.bf16.mxu1 %v6333_v55  ;;  %v6388_v54 = vcombine.low %v503_v43, %v507_v44  ;;  %v6395_v55 = vcombine.high %v510_v49, %v514_v50  ;;  %v6397_v56 = vcombine.high %v511_v51, %v515_v52  ;;  %v566_v43 = vld [vmem:[#allocation5 + $0xcd0] sm:$0xff] }
 0x217   :  { %v570_v44 = vld [vmem:[#allocation5 + $0xcf0] sm:$0xff] }
 0x219   :  { %3361 = vmatpush1.bf16.msra.mxu0 %v6330_v60  ;;  %3533 = vmatpush1.bf16.msra.mxu1 %v6332_v61  ;;  %v523_v60 = vld [vmem:[#allocation5 + $0xb78] sm:$0xff]  ;;  %v6394_v61 = vcombine.low %v510_v49, %v514_v50  ;;  %v6451_v50 = vcombine.high %v566_v43, %v570_v44 }
 0x21a   :  { %3362 = vmatprep.subr.bf16.mxu0 %v6339_v62  ;;  %3534 = vmatprep.subr.bf16.mxu1 %v6341_v63  ;;  %v6396_v62 = vcombine.low %v511_v51, %v515_v52  ;;  %v6403_v63 = vcombine.high %v518_v57, %v522_v58  ;;  %v6405_v0 = vcombine.high %v519_v59, %v523_v60  ;;  %v574_v52 = vld [vmem:[#allocation5 + $0xd10] sm:$0xff] }
 0x21d   :  { %3363 = vmatpush1.bf16.msra.mxu0 %v6338_v4  ;;  %3535 = vmatpush1.bf16.msra.mxu1 %v6340_v5  ;;  %v531_v4 = vld [vmem:[#allocation5 + $0xbb8] sm:$0xff]  ;;  %v6402_v5 = vcombine.low %v518_v57, %v522_v58  ;;  %v6450_v57 = vcombine.low %v566_v43, %v570_v44 }
 0x21e   :  { %3364 = vmatprep.subr.bf16.mxu0 %v6347_v6  ;;  %3536 = vmatprep.subr.bf16.mxu1 %v6349_v7  ;;  %v6404_v6 = vcombine.low %v519_v59, %v523_v60  ;;  %v6411_v7 = vcombine.high %v526_v1, %v530_v2  ;;  %v6413_v8 = vcombine.high %v527_v3, %v531_v4  ;;  %v582_v60 = vld [vmem:[#allocation5 + $0xd50] sm:$0xff] }
 0x221   :  { %3365 = vmatpush1.bf16.msra.mxu0 %v6346_v12  ;;  %3537 = vmatpush1.bf16.msra.mxu1 %v6348_v13  ;;  %v539_v12 = vld [vmem:[#allocation5 + $0xbf8] sm:$0xff]  ;;  %v6410_v13 = vcombine.low %v526_v1, %v530_v2  ;;  %v7837_v2 = vld [vmem:[#allocation7] sm:$0xff] }
 0x222   :  { %3366 = vmatprep.subr.bf16.mxu0 %v6355_v14  ;;  %3538 = vmatprep.subr.bf16.mxu1 %v6357_v15  ;;  %v6412_v14 = vcombine.low %v527_v3, %v531_v4  ;;  %v6419_v15 = vcombine.high %v534_v9, %v538_v10  ;;  %v6421_v16 = vcombine.high %v535_v11, %v539_v12 }
 0x225   :  { %3367 = vmatpush1.bf16.msra.mxu0 %v6354_v20  ;;  %3539 = vmatpush1.bf16.msra.mxu1 %v6356_v21  ;;  %v547_v20 = vld [vmem:[#allocation5 + $0xc38] sm:$0xff]  ;;  %v6418_v21 = vcombine.low %v534_v9, %v538_v10  ;;  %v590_v9 = vld [vmem:[#allocation5 + $0xd90] sm:$0xff] }
 0x226   :  { %3368 = vmatprep.subr.bf16.mxu0 %v6363_v22  ;;  %3540 = vmatprep.subr.bf16.mxu1 %v6365_v23  ;;  %v6420_v22 = vcombine.low %v535_v11, %v539_v12  ;;  %v6427_v23 = vcombine.high %v542_v17, %v546_v18  ;;  %v6429_v24 = vcombine.high %v543_v19, %v547_v20  ;;  %v594_v10 = vld [vmem:[#allocation5 + $0xdb0] sm:$0xff]  ;;  %v591_v12 = vld [vmem:[#allocation5 + $0xd98] sm:$0xff] }
 0x229   :  { %3369 = vmatpush1.bf16.msra.mxu0 %v6362_v28  ;;  %3541 = vmatpush1.bf16.msra.mxu1 %v6364_v29  ;;  %v555_v28 = vld [vmem:[#allocation5 + $0xc78] sm:$0xff]  ;;  %v6426_v29 = vcombine.low %v542_v17, %v546_v18 }
 0x22a   :  { %3370 = vmatprep.subr.bf16.mxu0 %v6371_v30  ;;  %3542 = vmatprep.subr.bf16.mxu1 %v6373_v31  ;;  %v6428_v30 = vcombine.low %v543_v19, %v547_v20  ;;  %v6435_v31 = vcombine.high %v550_v25, %v554_v26  ;;  %v6437_v33 = vcombine.high %v551_v27, %v555_v28 }
 0x22b   :  { %v6475_v19 = vcombine.high %v590_v9, %v594_v10 }
 0x22d   :  { %3371 = vmatpush1.bf16.msra.mxu0 %v6370_v37  ;;  %3543 = vmatpush1.bf16.msra.mxu1 %v6372_v38  ;;  %v559_v37 = vld [vmem:[#allocation5 + $0xc98] sm:$0xff] }
 0x22e   :  { %3372 = vmatprep.subr.bf16.mxu0 %v6379_v39  ;;  %3544 = vmatprep.subr.bf16.mxu1 %v6381_v40  ;;  %v563_v38 = vld [vmem:[#allocation5 + $0xcb8] sm:$0xff]  ;;  %v6434_v39 = vcombine.low %v550_v25, %v554_v26  ;;  %v6436_v40 = vcombine.low %v551_v27, %v555_v28 }
 0x22f   :  { %v6445_v42 = vcombine.high %v559_v37, %v563_v38  ;;  %v6444_v49 = vcombine.low %v559_v37, %v563_v38  ;;  %v599_v27 = vld [vmem:[#allocation5 + $0xdd8] sm:$0xff] }
 0x230   :  { %v603_v28 = vld [vmem:[#allocation5 + $0xdf8] sm:$0xff] }
 0x231   :  { %3373 = vmatpush1.bf16.msra.mxu0 %v6378_v45  ;;  %3545 = vmatpush1.bf16.msra.mxu1 %v6380_v46  ;;  %v567_v45 = vld [vmem:[#allocation5 + $0xcd8] sm:$0xff]  ;;  %v6485_v44 = vcombine.high %v599_v27, %v603_v28 }
 0x232   :  { %3374 = vmatprep.subr.bf16.mxu0 %v6387_v47  ;;  %3546 = vmatprep.subr.bf16.mxu1 %v6389_v48  ;;  %v571_v46 = vld [vmem:[#allocation5 + $0xcf8] sm:$0xff]  ;;  %v606_v47 = vlaneseq  ;;  %v6442_v48 = vcombine.low %v558_v34, %v562_v35  ;;  %v6474_v34 = vcombine.low %v590_v9, %v594_v10  ;;  %v6995_v9 = vld [vmem:[#allocation8 + $0x28] ss:$16 sps:$4 sm:$0xff]  }
 0x233   :  { %v6453_v51 = vcombine.high %v567_v45, %v571_v46  ;;  %v6452_v58 = vcombine.low %v567_v45, %v571_v46  ;;  %v7000_v10 = vld [vmem:[#allocation8 + $0x44] ss:$16 sps:$4 sm:$0xff]  }
 0x235   :  { %3375 = vmatpush1.bf16.msra.mxu0 %v6386_v53  ;;  %3547 = vmatpush1.bf16.msra.mxu1 %v6388_v54  ;;  %v578_v53 = vld [vmem:[#allocation5 + $0xd30] sm:$0xff]  ;;  %v575_v54 = vld [vmem:[#allocation5 + $0xd18] sm:$0xff] }
 0x236   :  { %3376 = vmatprep.subr.bf16.mxu0 %v6395_v55  ;;  %3548 = vmatprep.subr.bf16.mxu1 %v6397_v56  ;;  %v579_v55 = vld [vmem:[#allocation5 + $0xd38] sm:$0xff]  ;;  %v7834_v56 = vshrl.u32 %v606_v47, 7  ;;  %v6458_v1 = vcombine.low %v574_v52, %v578_v53 }
 0x237   :  { %v6461_v59 = vcombine.high %v575_v54, %v579_v55 }
 0x238   :  { %v616_v3 = vsub.s32 2, %v7834_v56  ;;  %v612_v4 = vsub.s32 1, %v7834_v56 }
 0x239   :  { %3377 = vmatpush1.bf16.msra.mxu0 %v6394_v61  ;;  %3549 = vmatpush1.bf16.msra.mxu1 %v6396_v62  ;;  %v586_v61 = vld [vmem:[#allocation5 + $0xd70] sm:$0xff]  ;;  %v608_v62 = vsub.s32 0, %v7834_v56 }
 0x23a   :  { %3378 = vmatprep.subr.bf16.mxu0 %v6403_v63  ;;  %3550 = vmatprep.subr.bf16.mxu1 %v6405_v0  ;;  %v583_v63 = vld [vmem:[#allocation5 + $0xd58] sm:$0xff] }
 0x23b   :  { %v587_v0 = vld [vmem:[#allocation5 + $0xd78] sm:$0xff]  ;;  %v609_v11 = vrot.slane %v7837_v2, %v608_v62 }
 0x23c   :  { %v6468_v18 = vcombine.low %v583_v63, %v587_v0 }
 0x23d   :  { %3379 = vmatpush1.bf16.msra.mxu0 %v6402_v5  ;;  %3551 = vmatpush1.bf16.msra.mxu1 %v6404_v6  ;;  %v6460_v5 = vcombine.low %v575_v54, %v579_v55  ;;  %v620_v6 = vsub.s32 3, %v7834_v56 }
 0x23e   :  { %3380 = vmatprep.subr.bf16.mxu0 %v6411_v7  ;;  %3552 = vmatprep.subr.bf16.mxu1 %v6413_v8  ;;  %v6467_v7 = vcombine.high %v582_v60, %v586_v61  ;;  %v6469_v8 = vcombine.high %v583_v63, %v587_v0  ;;  %v6986_v63 = vld [vmem:[#allocation8] ss:$16 sps:$4 sm:$0xff]   ;;  %v6989_v0 = vld [vmem:[#allocation8 + $0x8] ss:$16 sps:$4 sm:$0xff]  }
 0x23f   :  { %v621_v17 = vrot.slane %v7837_v2, %v620_v6 }
 0x241   :  { %3381 = vmatpush1.bf16.msra.mxu0 %v6410_v13  ;;  %3553 = vmatpush1.bf16.msra.mxu1 %v6412_v14  ;;  %v595_v13 = vld [vmem:[#allocation5 + $0xdb8] sm:$0xff]  ;;  %v617_v14 = vrot.slane %v7837_v2, %v616_v3 }
 0x242   :  { %3382 = vmatprep.subr.bf16.mxu0 %v6419_v15  ;;  %3554 = vmatprep.subr.bf16.mxu1 %v6421_v16  ;;  %v613_v15 = vrot.slane %v7837_v2, %v612_v4  ;;  %v6466_v16 = vcombine.low %v582_v60, %v586_v61  ;;  %v6476_v35 = vcombine.low %v591_v12, %v595_v13  ;;  %v6991_v60 = vld [vmem:[#allocation8 + $0xc] ss:$16 sps:$4 sm:$0xff]  }
 0x245   :  { %3383 = vmatpush1.bf16.msra.mxu0 %v6418_v21  ;;  %3555 = vmatpush1.bf16.msra.mxu1 %v6420_v22  ;;  %v6477_v21 = vcombine.high %v591_v12, %v595_v13  ;;  %v598_v22 = vld [vmem:[#allocation5 + $0xdd0] sm:$0xff]  ;;  %v6998_v12 = vld [vmem:[#allocation8 + $0x40] ss:$16 sps:$4 sm:$0xff]  }
 0x246   :  { %3395 = vmatprep.subr.bf16.mxu0 %v6427_v23  ;;  %3567 = vmatprep.subr.bf16.mxu1 %v6429_v24  ;;  %v602_v23 = vld [vmem:[#allocation5 + $0xdf0] sm:$0xff] }
 0x247   :  { %v7001_v13 = vld [vmem:[#allocation8 + $0x48] ss:$16 sps:$4 sm:$0xff]  }
 0x248   :  { %3385 = vmatmul.mubr.bf16.vlgmr.msra.gmra.mrb[4].mxu0 %v7415_v36  ;;  %3557 = vmatmul.mubr.bf16.vlgmr.msra.gmra.mrb[4].mxu1 %v7415_v36 }
 0x249   :  { %3396 = vmatpush1.bf16.msra.mxu0 %v6426_v29  ;;  %3568 = vmatpush1.bf16.msra.mxu1 %v6428_v30 }
 0x24a   :  { %3397 = vmatprep.subr.bf16.mxu0 %v6435_v31  ;;  %3569 = vmatprep.subr.bf16.mxu1 %v6437_v33 }
 0x24b   :  { %3427 = vmatprep.mubr.bf16.mxu0 %v7666_v32  ;;  %3599 = vmatprep.mubr.bf16.mxu1 %v7666_v32  ;;  %v6459_v32 = vcombine.high %v574_v52, %v578_v53 }
 0x24d   :  { %3398 = vmatpush1.bf16.msra.mxu0 %v6434_v39  ;;  %3570 = vmatpush1.bf16.msra.mxu1 %v6436_v40  ;;  %v6483_v40 = vcombine.high %v598_v22, %v602_v23 }
 0x24e   :  { %3399 = vmatprep.subr.bf16.mxu0 %v6443_v41  ;;  %3571 = vmatprep.subr.bf16.mxu1 %v6445_v42 }
 0x251   :  { %3400 = vmatpush1.bf16.msra.mxu0 %v6442_v48  ;;  %3572 = vmatpush1.bf16.msra.mxu1 %v6444_v49  ;;  %v6482_v48 = vcombine.low %v598_v22, %v602_v23  ;;  %v7018_v22 = vld [vmem:[#allocation8 + $0xa4] ss:$16 sps:$4 sm:$0xff]   ;;  %v7021_v23 = vld [vmem:[#allocation8 + $0xac] ss:$16 sps:$4 sm:$0xff]  }
 0x252   :  { %3401 = vmatprep.subr.bf16.mxu0 %v6451_v50  ;;  %3573 = vmatprep.subr.bf16.mxu1 %v6453_v51 }
 0x255   :  { %3402 = vmatpush1.bf16.msra.mxu0 %v6450_v57  ;;  %3574 = vmatpush1.bf16.msra.mxu1 %v6452_v58  ;;  %v6484_v57 = vcombine.low %v599_v27, %v603_v28  ;;  %v6988_v58 = vld [vmem:[#allocation8 + $0x4] ss:$16 sps:$4 sm:$0xff]   ;;  %v7027_v27 = vld [vmem:[#allocation8 + $0xcc] ss:$16 sps:$4 sm:$0xff]   ;;  %v7022_v28 = vld [vmem:[#allocation8 + $0xc0] ss:$16 sps:$4 sm:$0xff]  }
 0x256   :  { %3403 = vmatprep.subr.bf16.mxu0 %v6459_v32  ;;  %3575 = vmatprep.subr.bf16.mxu1 %v6461_v59 }
 0x259   :  { %3404 = vmatpush1.bf16.msra.mxu0 %v6458_v1  ;;  %3576 = vmatpush1.bf16.msra.mxu1 %v6460_v5  ;;  %v6994_v1 = vld [vmem:[#allocation8 + $0x24] ss:$16 sps:$4 sm:$0xff]  }
 0x25a   :  { %3405 = vmatprep.subr.bf16.mxu0 %v6467_v7  ;;  %3577 = vmatprep.subr.bf16.mxu1 %v6469_v8  ;;  %v7416_v5 = vld [vmem:[#allocation2 + $0x18] ss:$28 sps:$4 sm:$0xff]   ;;  %v6997_v7 = vld [vmem:[#allocation8 + $0x2c] ss:$16 sps:$4 sm:$0xff]   ;;  %v6992_v8 = vld [vmem:[#allocation8 + $0x20] ss:$16 sps:$4 sm:$0xff]  }
 0x25b   :  { %v3085_v20 = vpop.f32.mrb[0].mxu0  ;;  %v3257_v25 = vpop.f32.mrb[0].mxu1 }
 0x25c   :  { %v6857_v24 = vadd.f32 %v3085_v20, %v609_v11  ;;  %v3087_v26 = vpop.f32.mrb[1].mxu0  ;;  %v6861_v29 = vadd.f32 %v3257_v25, %v617_v14  ;;  %v3259_v31 = vpop.f32.mrb[1].mxu1  ;;  %v7010_v20 = vld [vmem:[#allocation8 + $0x80] ss:$16 sps:$4 sm:$0xff]   ;;  %v7019_v25 = vld [vmem:[#allocation8 + $0xa8] ss:$16 sps:$4 sm:$0xff]  }
 0x25d   :  { %v6858_v30 = vadd.f32 %v3087_v26, %v613_v15  ;;  %v3089_v33 = vpop.f32.mrb[2].mxu0  ;;  %3406 = vmatpush1.bf16.msra.mxu0 %v6466_v16  ;;  %v6862_v36 = vadd.f32 %v3259_v31, %v621_v17  ;;  %v3261_v38 = vpop.f32.mrb[2].mxu1  ;;  %3578 = vmatpush1.bf16.msra.mxu1 %v6468_v18  ;;  %v7004_v16 = vld [vmem:[#allocation8 + $0x60] ss:$16 sps:$4 sm:$0xff]   ;;  %v7012_v18 = vld [vmem:[#allocation8 + $0x84] ss:$16 sps:$4 sm:$0xff]  }
 0x25e   :  { %v6859_v37 = vadd.f32 %v3089_v33, %v609_v11  ;;  %v3091_v39 = vpop.f32.mrb[3].mxu0  ;;  %3407 = vmatprep.subr.bf16.mxu0 %v6475_v19  ;;  %v6863_v41 = vadd.f32 %v3261_v38, %v617_v14  ;;  %v3263_v43 = vpop.f32.mrb[3].mxu1  ;;  %3579 = vmatprep.subr.bf16.mxu1 %v6477_v21  ;;  %v3610_v45 = vmax.f32 %v6857_v24, 0.0  ;;  %v3612_v49 = vmax.f32 %v6861_v29, 0.0  ;;  %v7003_v11 = vld [vmem:[#allocation8 + $0x4c] ss:$16 sps:$4 sm:$0xff]  }
 0x25f   :  { %v6860_v42 = vadd.f32 %v3091_v39, %v613_v15  ;;  %v6864_v47 = vadd.f32 %v3263_v43, %v621_v17  ;;  %v3611_v50 = vmax.f32 %v6858_v30, 0.0  ;;  %v3613_v53 = vmax.f32 %v6862_v36, 0.0  ;;  %v7006_v14 = vld [vmem:[#allocation8 + $0x64] ss:$16 sps:$4 sm:$0xff]   ;;  %v7009_v15 = vld [vmem:[#allocation8 + $0x6c] ss:$16 sps:$4 sm:$0xff]  }
 0x260   :  { %v3618_v46 = vmax.f32 %v6859_v37, 0.0  ;;  %v3620_v51 = vmax.f32 %v6863_v41, 0.0  ;;  %v7007_v17 = vld [vmem:[#allocation8 + $0x68] ss:$16 sps:$4 sm:$0xff]   ;;  %v7015_v19 = vld [vmem:[#allocation8 + $0x8c] ss:$16 sps:$4 sm:$0xff]  }
 0x261   :  { %v3619_v52 = vmax.f32 %v6860_v42, 0.0  ;;  %3408 = vmatpush1.bf16.msra.mxu0 %v6474_v34  ;;  %v3621_v55 = vmax.f32 %v6864_v47, 0.0  ;;  %3580 = vmatpush1.bf16.msra.mxu1 %v6476_v35  ;;  %v7013_v21 = vld [vmem:[#allocation8 + $0x88] ss:$16 sps:$4 sm:$0xff]   ;;  %v7016_v24 = vld [vmem:[#allocation8 + $0xa0] ss:$16 sps:$4 sm:$0xff]  }
 0x262   :  { %v7854_v54 = vpack.c.bf16 %v3618_v46, %v3610_v45  ;;  %3409 = vmatprep.subr.bf16.mxu0 %v6483_v40  ;;  %v7856_v32 = vpack.c.bf16 %v3620_v51, %v3612_v49  ;;  %3581 = vmatprep.subr.bf16.mxu1 %v6485_v44  ;;  %v7024_v26 = vld [vmem:[#allocation8 + $0xc4] ss:$16 sps:$4 sm:$0xff]   ;;  %v7025_v29 = vld [vmem:[#allocation8 + $0xc8] ss:$16 sps:$4 sm:$0xff]   ;;  %v7033_v31 = vld [vmem:[#allocation8 + $0xec] ss:$16 sps:$4 sm:$0xff]  }
 0x263   :  { %v3627_v59 = vpack.c.bf16 %v3619_v52, %v3611_v50  ;;  %v7858_v61 = vpack.c.bf16 %v3621_v55, %v3613_v53  ;;  %v7030_v30 = vld [vmem:[#allocation8 + $0xe4] ss:$16 sps:$4 sm:$0xff]   ;;  %v7028_v33 = vld [vmem:[#allocation8 + $0xe0] ss:$16 sps:$4 sm:$0xff]   ;;  %v7031_v34 = vld [vmem:[#allocation8 + $0xe8] ss:$16 sps:$4 sm:$0xff]  }
 0x264   :  { %v7036_v35 = vld [vmem:[#allocation8 + $0x104] ss:$16 sps:$4 sm:$0xff]   ;;  %v7039_v36 = vld [vmem:[#allocation8 + $0x10c] ss:$16 sps:$4 sm:$0xff]   ;;  %v7034_v37 = vld [vmem:[#allocation8 + $0x100] ss:$16 sps:$4 sm:$0xff]  }
 0x265   :  { %3410 = vmatpush1.bf16.msra.mxu0 %v6482_v48  ;;  %3582 = vmatpush1.bf16.msra.mxu1 %v6484_v57  ;;  %v7037_v38 = vld [vmem:[#allocation8 + $0x108] ss:$16 sps:$4 sm:$0xff]   ;;  %v7042_v39 = vld [vmem:[#allocation8 + $0x124] ss:$16 sps:$4 sm:$0xff]   ;;  %v7045_v40 = vld [vmem:[#allocation8 + $0x12c] ss:$16 sps:$4 sm:$0xff]  }
 0x266   :  { %5192 = vmatprep.subr.bf16.mxu0 %v6988_v58  ;;  %5364 = vmatprep.subr.bf16.mxu1 %v6991_v60  ;;  %v7040_v41 = vld [vmem:[#allocation8 + $0x120] ss:$16 sps:$4 sm:$0xff]   ;;  %v7043_v42 = vld [vmem:[#allocation8 + $0x128] ss:$16 sps:$4 sm:$0xff]   ;;  %v7048_v43 = vld [vmem:[#allocation8 + $0x144] ss:$16 sps:$4 sm:$0xff]  }
 0x267   :  { %v7051_v44 = vld [vmem:[#allocation8 + $0x14c] ss:$16 sps:$4 sm:$0xff]   ;;  %v7046_v45 = vld [vmem:[#allocation8 + $0x140] ss:$16 sps:$4 sm:$0xff]   ;;  %v7049_v46 = vld [vmem:[#allocation8 + $0x148] ss:$16 sps:$4 sm:$0xff]  }
 0x268   :  { %3428 = vmatmul.mubr.bf16.vlgmr.msra.gmra.mrb[4].mxu0 %v7416_v5  ;;  %3600 = vmatmul.mubr.bf16.vlgmr.msra.gmra.mrb[4].mxu1 %v7416_v5  ;;  %v7054_v47 = vld [vmem:[#allocation8 + $0x164] ss:$16 sps:$4 sm:$0xff]   ;;  %v7057_v48 = vld [vmem:[#allocation8 + $0x16c] ss:$16 sps:$4 sm:$0xff]   ;;  %v7052_v49 = vld [vmem:[#allocation8 + $0x160] ss:$16 sps:$4 sm:$0xff]  }
 0x269   :  { %5193 = vmatpush1.bf16.msra.mxu0 %v6986_v63  ;;  %5224 = vmatprep.mubr.bf16.mxu0 %v3627_v59  ;;  %v7055_v50 = vld [vmem:[#allocation8 + $0x168] ss:$16 sps:$4 sm:$0xff]   ;;  %v7060_v51 = vld [vmem:[#allocation8 + $0x184] ss:$16 sps:$4 sm:$0xff]   ;;  %v7063_v52 = vld [vmem:[#allocation8 + $0x18c] ss:$16 sps:$4 sm:$0xff]  }
 0x26a   :  { %5365 = vmatpush1.bf16.msra.mxu1 %v6989_v0  ;;  %5396 = vmatprep.mubr.bf16.mxu1 %v3627_v59  ;;  %v7058_v53 = vld [vmem:[#allocation8 + $0x180] ss:$16 sps:$4 sm:$0xff]   ;;  %v7061_v55 = vld [vmem:[#allocation8 + $0x188] ss:$16 sps:$4 sm:$0xff]   ;;  %v7066_v57 = vld [vmem:[#allocation8 + $0x1a4] ss:$16 sps:$4 sm:$0xff]  }
 0x26b   :  { %5194 = vmatprep.subr.bf16.mxu0 %v6994_v1  ;;  %5366 = vmatprep.subr.bf16.mxu1 %v6997_v7  ;;  %v7069_v58 = vld [vmem:[#allocation8 + $0x1ac] ss:$16 sps:$4 sm:$0xff]   ;;  %v7064_v59 = vld [vmem:[#allocation8 + $0x1a0] ss:$16 sps:$4 sm:$0xff]   ;;  %v7067_v60 = vld [vmem:[#allocation8 + $0x1a8] ss:$16 sps:$4 sm:$0xff]  }
 0x26c   :  { %v7072_v63 = vld [vmem:[#allocation8 + $0x1c4] ss:$16 sps:$4 sm:$0xff]   ;;  %v7075_v0 = vld [vmem:[#allocation8 + $0x1cc] ss:$16 sps:$4 sm:$0xff]   ;;  %v7070_v1 = vld [vmem:[#allocation8 + $0x1c0] ss:$16 sps:$4 sm:$0xff]  }
 0x26d   :  { %5195 = vmatpush1.bf16.msra.mxu0 %v6992_v8  ;;  %v7073_v5 = vld [vmem:[#allocation8 + $0x1c8] ss:$16 sps:$4 sm:$0xff]   ;;  %v7078_v7 = vld [vmem:[#allocation8 + $0x1e4] ss:$16 sps:$4 sm:$0xff]   ;;  %v7081_v8 = vld [vmem:[#allocation8 + $0x1ec] ss:$16 sps:$4 sm:$0xff]  }
 0x26e   :  { %5367 = vmatpush1.bf16.msra.mxu1 %v6995_v9  ;;  %5196 = vmatprep.subr.bf16.mxu0 %v7000_v10  ;;  %v7076_v9 = vld [vmem:[#allocation8 + $0x1e0] ss:$16 sps:$4 sm:$0xff]   ;;  %v7079_v10 = vld [vmem:[#allocation8 + $0x1e8] ss:$16 sps:$4 sm:$0xff]  }
 0x26f   :  { %5368 = vmatprep.subr.bf16.mxu1 %v7003_v11  ;;  %v7084_v11 = vld [vmem:[#allocation8 + $0x204] ss:$16 sps:$4 sm:$0xff]  }
 0x271   :  { %5197 = vmatpush1.bf16.msra.mxu0 %v6998_v12  ;;  %v7087_v12 = vld [vmem:[#allocation8 + $0x20c] ss:$16 sps:$4 sm:$0xff]  }
 0x272   :  { %5369 = vmatpush1.bf16.msra.mxu1 %v7001_v13  ;;  %5198 = vmatprep.subr.bf16.mxu0 %v7006_v14  ;;  %v7082_v13 = vld [vmem:[#allocation8 + $0x200] ss:$16 sps:$4 sm:$0xff]   ;;  %v7085_v14 = vld [vmem:[#allocation8 + $0x208] ss:$16 sps:$4 sm:$0xff]  }
 0x273   :  { %5370 = vmatprep.subr.bf16.mxu1 %v7009_v15  ;;  %v7090_v15 = vld [vmem:[#allocation8 + $0x224] ss:$16 sps:$4 sm:$0xff]  }
 0x275   :  { %5199 = vmatpush1.bf16.msra.mxu0 %v7004_v16  ;;  %v7093_v16 = vld [vmem:[#allocation8 + $0x22c] ss:$16 sps:$4 sm:$0xff]  }
 0x276   :  { %5371 = vmatpush1.bf16.msra.mxu1 %v7007_v17  ;;  %5200 = vmatprep.subr.bf16.mxu0 %v7012_v18  ;;  %v7088_v17 = vld [vmem:[#allocation8 + $0x220] ss:$16 sps:$4 sm:$0xff]   ;;  %v7091_v18 = vld [vmem:[#allocation8 + $0x228] ss:$16 sps:$4 sm:$0xff]  }
 0x277   :  { %5372 = vmatprep.subr.bf16.mxu1 %v7015_v19  ;;  %v7096_v19 = vld [vmem:[#allocation8 + $0x244] ss:$16 sps:$4 sm:$0xff]  }
 0x279   :  { %5201 = vmatpush1.bf16.msra.mxu0 %v7010_v20  ;;  %v7099_v20 = vld [vmem:[#allocation8 + $0x24c] ss:$16 sps:$4 sm:$0xff]  }
 0x27a   :  { %5373 = vmatpush1.bf16.msra.mxu1 %v7013_v21  ;;  %5202 = vmatprep.subr.bf16.mxu0 %v7018_v22  ;;  %v7094_v21 = vld [vmem:[#allocation8 + $0x240] ss:$16 sps:$4 sm:$0xff]   ;;  %v7097_v22 = vld [vmem:[#allocation8 + $0x248] ss:$16 sps:$4 sm:$0xff]  }
 0x27b   :  { %5374 = vmatprep.subr.bf16.mxu1 %v7021_v23  ;;  %v7102_v23 = vld [vmem:[#allocation8 + $0x264] ss:$16 sps:$4 sm:$0xff]  }
 0x27d   :  { %5203 = vmatpush1.bf16.msra.mxu0 %v7016_v24  ;;  %v7100_v24 = vld [vmem:[#allocation8 + $0x260] ss:$16 sps:$4 sm:$0xff]  }
 0x27e   :  { %5375 = vmatpush1.bf16.msra.mxu1 %v7019_v25  ;;  %5204 = vmatprep.subr.bf16.mxu0 %v7024_v26  ;;  %v7103_v25 = vld [vmem:[#allocation8 + $0x268] ss:$16 sps:$4 sm:$0xff]   ;;  %v7108_v26 = vld [vmem:[#allocation8 + $0x284] ss:$16 sps:$4 sm:$0xff]  }
 0x27f   :  { %5376 = vmatprep.subr.bf16.mxu1 %v7027_v27  ;;  %v7111_v27 = vld [vmem:[#allocation8 + $0x28c] ss:$16 sps:$4 sm:$0xff]  }
 0x281   :  { %5205 = vmatpush1.bf16.msra.mxu0 %v7022_v28  ;;  %v7109_v28 = vld [vmem:[#allocation8 + $0x288] ss:$16 sps:$4 sm:$0xff]  }
 0x282   :  { %5377 = vmatpush1.bf16.msra.mxu1 %v7025_v29  ;;  %5206 = vmatprep.subr.bf16.mxu0 %v7030_v30  ;;  %v7114_v29 = vld [vmem:[#allocation8 + $0x2a4] ss:$16 sps:$4 sm:$0xff]   ;;  %v7117_v30 = vld [vmem:[#allocation8 + $0x2ac] ss:$16 sps:$4 sm:$0xff]  }
 0x283   :  { %5378 = vmatprep.subr.bf16.mxu1 %v7033_v31  ;;  %v7112_v31 = vld [vmem:[#allocation8 + $0x2a0] ss:$16 sps:$4 sm:$0xff]  }
 0x285   :  { %5207 = vmatpush1.bf16.msra.mxu0 %v7028_v33  ;;  %v7115_v33 = vld [vmem:[#allocation8 + $0x2a8] ss:$16 sps:$4 sm:$0xff]  }
 0x286   :  { %5379 = vmatpush1.bf16.msra.mxu1 %v7031_v34  ;;  %5208 = vmatprep.subr.bf16.mxu0 %v7036_v35  ;;  %v7120_v34 = vld [vmem:[#allocation8 + $0x2c4] ss:$16 sps:$4 sm:$0xff]   ;;  %v7123_v35 = vld [vmem:[#allocation8 + $0x2cc] ss:$16 sps:$4 sm:$0xff]  }
 0x287   :  { %5380 = vmatprep.subr.bf16.mxu1 %v7039_v36  ;;  %v7118_v36 = vld [vmem:[#allocation8 + $0x2c0] ss:$16 sps:$4 sm:$0xff]  }
 0x289   :  { %5209 = vmatpush1.bf16.msra.mxu0 %v7034_v37  ;;  %v7121_v37 = vld [vmem:[#allocation8 + $0x2c8] ss:$16 sps:$4 sm:$0xff]  }
 0x28a   :  { %5381 = vmatpush1.bf16.msra.mxu1 %v7037_v38  ;;  %5210 = vmatprep.subr.bf16.mxu0 %v7042_v39  ;;  %v7126_v38 = vld [vmem:[#allocation8 + $0x2e4] ss:$16 sps:$4 sm:$0xff]   ;;  %v7129_v39 = vld [vmem:[#allocation8 + $0x2ec] ss:$16 sps:$4 sm:$0xff]  }
 0x28b   :  { %5382 = vmatprep.subr.bf16.mxu1 %v7045_v40  ;;  %v7124_v40 = vld [vmem:[#allocation8 + $0x2e0] ss:$16 sps:$4 sm:$0xff]  }
 0x28d   :  { %5211 = vmatpush1.bf16.msra.mxu0 %v7040_v41  ;;  %v7127_v41 = vld [vmem:[#allocation8 + $0x2e8] ss:$16 sps:$4 sm:$0xff]  }
 0x28e   :  { %5383 = vmatpush1.bf16.msra.mxu1 %v7043_v42  ;;  %5212 = vmatprep.subr.bf16.mxu0 %v7048_v43  ;;  %v7132_v42 = vld [vmem:[#allocation8 + $0x304] ss:$16 sps:$4 sm:$0xff]   ;;  %v7135_v43 = vld [vmem:[#allocation8 + $0x30c] ss:$16 sps:$4 sm:$0xff]  }
 0x28f   :  { %5384 = vmatprep.subr.bf16.mxu1 %v7051_v44  ;;  %v7130_v44 = vld [vmem:[#allocation8 + $0x300] ss:$16 sps:$4 sm:$0xff]  }
 0x291   :  { %5213 = vmatpush1.bf16.msra.mxu0 %v7046_v45  ;;  %v7133_v45 = vld [vmem:[#allocation8 + $0x308] ss:$16 sps:$4 sm:$0xff]  }
 0x292   :  { %5385 = vmatpush1.bf16.msra.mxu1 %v7049_v46  ;;  %5214 = vmatprep.subr.bf16.mxu0 %v7054_v47  ;;  %v7138_v46 = vld [vmem:[#allocation8 + $0x324] ss:$16 sps:$4 sm:$0xff]   ;;  %v7141_v47 = vld [vmem:[#allocation8 + $0x32c] ss:$16 sps:$4 sm:$0xff]  }
 0x293   :  { %5386 = vmatprep.subr.bf16.mxu1 %v7057_v48  ;;  %v7136_v48 = vld [vmem:[#allocation8 + $0x320] ss:$16 sps:$4 sm:$0xff]  }
 0x295   :  { %5215 = vmatpush1.bf16.msra.mxu0 %v7052_v49  ;;  %v7139_v49 = vld [vmem:[#allocation8 + $0x328] ss:$16 sps:$4 sm:$0xff]  }
 0x296   :  { %5387 = vmatpush1.bf16.msra.mxu1 %v7055_v50  ;;  %5216 = vmatprep.subr.bf16.mxu0 %v7060_v51  ;;  %v7144_v50 = vld [vmem:[#allocation8 + $0x344] ss:$16 sps:$4 sm:$0xff]   ;;  %v7147_v51 = vld [vmem:[#allocation8 + $0x34c] ss:$16 sps:$4 sm:$0xff]  }
 0x297   :  { %5388 = vmatprep.subr.bf16.mxu1 %v7063_v52  ;;  %v7142_v52 = vld [vmem:[#allocation8 + $0x340] ss:$16 sps:$4 sm:$0xff]  }
 0x299   :  { %5217 = vmatpush1.bf16.msra.mxu0 %v7058_v53  ;;  %v7145_v53 = vld [vmem:[#allocation8 + $0x348] ss:$16 sps:$4 sm:$0xff]  }
 0x29a   :  { %5389 = vmatpush1.bf16.msra.mxu1 %v7061_v55  ;;  %5218 = vmatprep.subr.bf16.mxu0 %v7066_v57  ;;  %v7150_v55 = vld [vmem:[#allocation8 + $0x364] ss:$16 sps:$4 sm:$0xff]   ;;  %v7153_v57 = vld [vmem:[#allocation8 + $0x36c] ss:$16 sps:$4 sm:$0xff]  }
 0x29b   :  { %5390 = vmatprep.subr.bf16.mxu1 %v7069_v58  ;;  %v7148_v58 = vld [vmem:[#allocation8 + $0x360] ss:$16 sps:$4 sm:$0xff]  }
 0x29d   :  { %5219 = vmatpush1.bf16.msra.mxu0 %v7064_v59  ;;  %v7151_v59 = vld [vmem:[#allocation8 + $0x368] ss:$16 sps:$4 sm:$0xff]  }
 0x29e   :  { %5391 = vmatpush1.bf16.msra.mxu1 %v7067_v60  ;;  %5220 = vmatprep.subr.bf16.mxu0 %v7072_v63  ;;  %v7156_v60 = vld [vmem:[#allocation8 + $0x384] ss:$16 sps:$4 sm:$0xff]   ;;  %v7159_v63 = vld [vmem:[#allocation8 + $0x38c] ss:$16 sps:$4 sm:$0xff]  }
 0x29f   :  { %5392 = vmatprep.subr.bf16.mxu1 %v7075_v0  ;;  %v7154_v0 = vld [vmem:[#allocation8 + $0x380] ss:$16 sps:$4 sm:$0xff]  }
 0x2a1   :  { %5221 = vmatpush1.bf16.msra.mxu0 %v7070_v1  ;;  %v7157_v1 = vld [vmem:[#allocation8 + $0x388] ss:$16 sps:$4 sm:$0xff]  }
 0x2a2   :  { %5393 = vmatpush1.bf16.msra.mxu1 %v7073_v5  ;;  %5222 = vmatprep.subr.bf16.mxu0 %v7078_v7  ;;  %v7162_v5 = vld [vmem:[#allocation8 + $0x3a4] ss:$16 sps:$4 sm:$0xff]   ;;  %v7165_v7 = vld [vmem:[#allocation8 + $0x3ac] ss:$16 sps:$4 sm:$0xff]  }
 0x2a3   :  { %5394 = vmatprep.subr.bf16.mxu1 %v7081_v8  ;;  %v7160_v8 = vld [vmem:[#allocation8 + $0x3a0] ss:$16 sps:$4 sm:$0xff]  }
 0x2a5   :  { %5223 = vmatpush1.bf16.msra.mxu0 %v7076_v9  ;;  %v7163_v9 = vld [vmem:[#allocation8 + $0x3a8] ss:$16 sps:$4 sm:$0xff]  }
 0x2a6   :  { %5395 = vmatpush1.bf16.msra.mxu1 %v7079_v10  ;;  %5235 = vmatprep.subr.bf16.mxu0 %v7084_v11  ;;  %v7168_v10 = vld [vmem:[#allocation8 + $0x3c4] ss:$16 sps:$4 sm:$0xff]   ;;  %v7171_v11 = vld [vmem:[#allocation8 + $0x3cc] ss:$16 sps:$4 sm:$0xff]  }
 0x2a7   :  { %5407 = vmatprep.subr.bf16.mxu1 %v7087_v12  ;;  %v7166_v12 = vld [vmem:[#allocation8 + $0x3c0] ss:$16 sps:$4 sm:$0xff]  }
 0x2a8   :  { %5225 = vmatmul.mubr.bf16.vlgmr.msra.gmra.mrb[8].mxu0 %v7854_v54 }
 0x2a9   :  { %5397 = vmatmul.mubr.bf16.vlgmr.msra.gmra.mrb[8].mxu1 %v7854_v54  ;;  %5236 = vmatpush1.bf16.msra.mxu0 %v7082_v13  ;;  %v7105_v54 = vld [vmem:[#allocation8 + $0x26c] ss:$16 sps:$4 sm:$0xff]   ;;  %v7169_v13 = vld [vmem:[#allocation8 + $0x3c8] ss:$16 sps:$4 sm:$0xff]  }
 0x2aa   :  { %5267 = vmatprep.mubr.bf16.mxu0 %v7858_v61  ;;  %5408 = vmatpush1.bf16.msra.mxu1 %v7085_v14  ;;  %v7174_v14 = vld [vmem:[#allocation8 + $0x3e4] ss:$16 sps:$4 sm:$0xff]  }
 0x2ab   :  { %5439 = vmatprep.mubr.bf16.mxu1 %v7858_v61  ;;  %5237 = vmatprep.subr.bf16.mxu0 %v7090_v15  ;;  %v7106_v61 = vld [vmem:[#allocation8 + $0x280] ss:$16 sps:$4 sm:$0xff]   ;;  %v7177_v15 = vld [vmem:[#allocation8 + $0x3ec] ss:$16 sps:$4 sm:$0xff]  }
 0x2ac   :  { %5409 = vmatprep.subr.bf16.mxu1 %v7093_v16  ;;  %v7172_v16 = vld [vmem:[#allocation8 + $0x3e0] ss:$16 sps:$4 sm:$0xff]  }
 0x2ad   :  { %5238 = vmatpush1.bf16.msra.mxu0 %v7088_v17  ;;  %v7175_v17 = vld [vmem:[#allocation8 + $0x3e8] ss:$16 sps:$4 sm:$0xff]  }
 0x2ae   :  { %5410 = vmatpush1.bf16.msra.mxu1 %v7091_v18  ;;  %5239 = vmatprep.subr.bf16.mxu0 %v7096_v19  ;;  %v7180_v18 = vld [vmem:[#allocation8 + $0x404] ss:$16 sps:$4 sm:$0xff]   ;;  %v7183_v19 = vld [vmem:[#allocation8 + $0x40c] ss:$16 sps:$4 sm:$0xff]  }
 0x2af   :  { %5411 = vmatprep.subr.bf16.mxu1 %v7099_v20  ;;  %v7178_v20 = vld [vmem:[#allocation8 + $0x400] ss:$16 sps:$4 sm:$0xff]  }
 0x2b1   :  { %5240 = vmatpush1.bf16.msra.mxu0 %v7094_v21  ;;  %v7181_v21 = vld [vmem:[#allocation8 + $0x408] ss:$16 sps:$4 sm:$0xff]  }
 0x2b2   :  { %5412 = vmatpush1.bf16.msra.mxu1 %v7097_v22  ;;  %5241 = vmatprep.subr.bf16.mxu0 %v7102_v23  ;;  %v7186_v22 = vld [vmem:[#allocation8 + $0x424] ss:$16 sps:$4 sm:$0xff]   ;;  %v7189_v23 = vld [vmem:[#allocation8 + $0x42c] ss:$16 sps:$4 sm:$0xff]  }
 0x2b3   :  { %5413 = vmatprep.subr.bf16.mxu1 %v7105_v54  ;;  %v7184_v54 = vld [vmem:[#allocation8 + $0x420] ss:$16 sps:$4 sm:$0xff]  }
 0x2b5   :  { %5242 = vmatpush1.bf16.msra.mxu0 %v7100_v24  ;;  %v7187_v24 = vld [vmem:[#allocation8 + $0x428] ss:$16 sps:$4 sm:$0xff]  }
 0x2b6   :  { %5414 = vmatpush1.bf16.msra.mxu1 %v7103_v25  ;;  %5243 = vmatprep.subr.bf16.mxu0 %v7108_v26  ;;  %v7192_v25 = vld [vmem:[#allocation8 + $0x444] ss:$16 sps:$4 sm:$0xff]   ;;  %v7195_v26 = vld [vmem:[#allocation8 + $0x44c] ss:$16 sps:$4 sm:$0xff]  }
 0x2b7   :  { %5415 = vmatprep.subr.bf16.mxu1 %v7111_v27  ;;  %v7190_v27 = vld [vmem:[#allocation8 + $0x440] ss:$16 sps:$4 sm:$0xff]  }
 0x2b9   :  { %5244 = vmatpush1.bf16.msra.mxu0 %v7106_v61  ;;  %v7193_v61 = vld [vmem:[#allocation8 + $0x448] ss:$16 sps:$4 sm:$0xff]  }
 0x2ba   :  { %5416 = vmatpush1.bf16.msra.mxu1 %v7109_v28  ;;  %5245 = vmatprep.subr.bf16.mxu0 %v7114_v29  ;;  %v7198_v28 = vld [vmem:[#allocation8 + $0x464] ss:$16 sps:$4 sm:$0xff]   ;;  %v7201_v29 = vld [vmem:[#allocation8 + $0x46c] ss:$16 sps:$4 sm:$0xff]  }
 0x2bb   :  { %5417 = vmatprep.subr.bf16.mxu1 %v7117_v30  ;;  %v7196_v30 = vld [vmem:[#allocation8 + $0x460] ss:$16 sps:$4 sm:$0xff]  }
 0x2bd   :  { %5246 = vmatpush1.bf16.msra.mxu0 %v7112_v31  ;;  %v7204_v31 = vld [vmem:[#allocation8 + $0x484] ss:$16 sps:$4 sm:$0xff]  }
 0x2be   :  { %5418 = vmatpush1.bf16.msra.mxu1 %v7115_v33  ;;  %5247 = vmatprep.subr.bf16.mxu0 %v7120_v34  ;;  %v7207_v33 = vld [vmem:[#allocation8 + $0x48c] ss:$16 sps:$4 sm:$0xff]   ;;  %v7202_v34 = vld [vmem:[#allocation8 + $0x480] ss:$16 sps:$4 sm:$0xff]  }
 0x2bf   :  { %5419 = vmatprep.subr.bf16.mxu1 %v7123_v35  ;;  %v7205_v35 = vld [vmem:[#allocation8 + $0x488] ss:$16 sps:$4 sm:$0xff]  }
 0x2c1   :  { %5248 = vmatpush1.bf16.msra.mxu0 %v7118_v36  ;;  %v7210_v36 = vld [vmem:[#allocation8 + $0x4a4] ss:$16 sps:$4 sm:$0xff]  }
 0x2c2   :  { %5420 = vmatpush1.bf16.msra.mxu1 %v7121_v37  ;;  %5249 = vmatprep.subr.bf16.mxu0 %v7126_v38  ;;  %v7213_v37 = vld [vmem:[#allocation8 + $0x4ac] ss:$16 sps:$4 sm:$0xff]   ;;  %v7208_v38 = vld [vmem:[#allocation8 + $0x4a0] ss:$16 sps:$4 sm:$0xff]  }
 0x2c3   :  { %5421 = vmatprep.subr.bf16.mxu1 %v7129_v39  ;;  %v7211_v39 = vld [vmem:[#allocation8 + $0x4a8] ss:$16 sps:$4 sm:$0xff]  }
 0x2c5   :  { %5250 = vmatpush1.bf16.msra.mxu0 %v7124_v40  ;;  %v7216_v40 = vld [vmem:[#allocation8 + $0x4c4] ss:$16 sps:$4 sm:$0xff]  }
 0x2c6   :  { %5422 = vmatpush1.bf16.msra.mxu1 %v7127_v41  ;;  %5251 = vmatprep.subr.bf16.mxu0 %v7132_v42  ;;  %v7219_v41 = vld [vmem:[#allocation8 + $0x4cc] ss:$16 sps:$4 sm:$0xff]   ;;  %v7214_v42 = vld [vmem:[#allocation8 + $0x4c0] ss:$16 sps:$4 sm:$0xff]  }
 0x2c7   :  { %5423 = vmatprep.subr.bf16.mxu1 %v7135_v43  ;;  %v7217_v43 = vld [vmem:[#allocation8 + $0x4c8] ss:$16 sps:$4 sm:$0xff]  }
 0x2c9   :  { %5252 = vmatpush1.bf16.msra.mxu0 %v7130_v44  ;;  %v7222_v44 = vld [vmem:[#allocation8 + $0x4e4] ss:$16 sps:$4 sm:$0xff]  }
 0x2ca   :  { %5424 = vmatpush1.bf16.msra.mxu1 %v7133_v45  ;;  %5253 = vmatprep.subr.bf16.mxu0 %v7138_v46  ;;  %v7225_v45 = vld [vmem:[#allocation8 + $0x4ec] ss:$16 sps:$4 sm:$0xff]   ;;  %v7220_v46 = vld [vmem:[#allocation8 + $0x4e0] ss:$16 sps:$4 sm:$0xff]  }
 0x2cb   :  { %5425 = vmatprep.subr.bf16.mxu1 %v7141_v47  ;;  %v7223_v47 = vld [vmem:[#allocation8 + $0x4e8] ss:$16 sps:$4 sm:$0xff]  }
 0x2cd   :  { %5254 = vmatpush1.bf16.msra.mxu0 %v7136_v48  ;;  %v7228_v48 = vld [vmem:[#allocation8 + $0x504] ss:$16 sps:$4 sm:$0xff]  }
 0x2ce   :  { %5426 = vmatpush1.bf16.msra.mxu1 %v7139_v49  ;;  %5255 = vmatprep.subr.bf16.mxu0 %v7144_v50  ;;  %v7231_v49 = vld [vmem:[#allocation8 + $0x50c] ss:$16 sps:$4 sm:$0xff]   ;;  %v7226_v50 = vld [vmem:[#allocation8 + $0x500] ss:$16 sps:$4 sm:$0xff]  }
 0x2cf   :  { %5427 = vmatprep.subr.bf16.mxu1 %v7147_v51  ;;  %v7229_v51 = vld [vmem:[#allocation8 + $0x508] ss:$16 sps:$4 sm:$0xff]  }
 0x2d1   :  { %5256 = vmatpush1.bf16.msra.mxu0 %v7142_v52  ;;  %v7234_v52 = vld [vmem:[#allocation8 + $0x524] ss:$16 sps:$4 sm:$0xff]  }
 0x2d2   :  { %5428 = vmatpush1.bf16.msra.mxu1 %v7145_v53  ;;  %5257 = vmatprep.subr.bf16.mxu0 %v7150_v55  ;;  %v7237_v53 = vld [vmem:[#allocation8 + $0x52c] ss:$16 sps:$4 sm:$0xff]   ;;  %v7232_v55 = vld [vmem:[#allocation8 + $0x520] ss:$16 sps:$4 sm:$0xff]  }
 0x2d3   :  { %5429 = vmatprep.subr.bf16.mxu1 %v7153_v57  ;;  %v7235_v57 = vld [vmem:[#allocation8 + $0x528] ss:$16 sps:$4 sm:$0xff]  }
 0x2d5   :  { %5258 = vmatpush1.bf16.msra.mxu0 %v7148_v58  ;;  %v7240_v58 = vld [vmem:[#allocation8 + $0x544] ss:$16 sps:$4 sm:$0xff]  }
 0x2d6   :  { %5430 = vmatpush1.bf16.msra.mxu1 %v7151_v59  ;;  %5259 = vmatprep.subr.bf16.mxu0 %v7156_v60  ;;  %v7243_v59 = vld [vmem:[#allocation8 + $0x54c] ss:$16 sps:$4 sm:$0xff]   ;;  %v7238_v60 = vld [vmem:[#allocation8 + $0x540] ss:$16 sps:$4 sm:$0xff]  }
 0x2d7   :  { %5431 = vmatprep.subr.bf16.mxu1 %v7159_v63  ;;  %v7241_v63 = vld [vmem:[#allocation8 + $0x548] ss:$16 sps:$4 sm:$0xff]  }
 0x2d9   :  { %5260 = vmatpush1.bf16.msra.mxu0 %v7154_v0  ;;  %v7246_v0 = vld [vmem:[#allocation8 + $0x564] ss:$16 sps:$4 sm:$0xff]  }
 0x2da   :  { %5432 = vmatpush1.bf16.msra.mxu1 %v7157_v1  ;;  %5261 = vmatprep.subr.bf16.mxu0 %v7162_v5  ;;  %v7249_v1 = vld [vmem:[#allocation8 + $0x56c] ss:$16 sps:$4 sm:$0xff]   ;;  %v7244_v5 = vld [vmem:[#allocation8 + $0x560] ss:$16 sps:$4 sm:$0xff]  }
 0x2db   :  { %5433 = vmatprep.subr.bf16.mxu1 %v7165_v7  ;;  %v7247_v7 = vld [vmem:[#allocation8 + $0x568] ss:$16 sps:$4 sm:$0xff]  }
 0x2dd   :  { %5262 = vmatpush1.bf16.msra.mxu0 %v7160_v8  ;;  %v7252_v8 = vld [vmem:[#allocation8 + $0x584] ss:$16 sps:$4 sm:$0xff]  }
 0x2de   :  { %5434 = vmatpush1.bf16.msra.mxu1 %v7163_v9  ;;  %5263 = vmatprep.subr.bf16.mxu0 %v7168_v10  ;;  %v7255_v9 = vld [vmem:[#allocation8 + $0x58c] ss:$16 sps:$4 sm:$0xff]   ;;  %v7250_v10 = vld [vmem:[#allocation8 + $0x580] ss:$16 sps:$4 sm:$0xff]  }
 0x2df   :  { %5435 = vmatprep.subr.bf16.mxu1 %v7171_v11  ;;  %v7253_v11 = vld [vmem:[#allocation8 + $0x588] ss:$16 sps:$4 sm:$0xff]  }
 0x2e1   :  { %5264 = vmatpush1.bf16.msra.mxu0 %v7166_v12  ;;  %v7258_v12 = vld [vmem:[#allocation8 + $0x5a4] ss:$16 sps:$4 sm:$0xff]  }
 0x2e2   :  { %5436 = vmatpush1.bf16.msra.mxu1 %v7169_v13  ;;  %5265 = vmatprep.subr.bf16.mxu0 %v7174_v14  ;;  %v7261_v13 = vld [vmem:[#allocation8 + $0x5ac] ss:$16 sps:$4 sm:$0xff]   ;;  %v7256_v14 = vld [vmem:[#allocation8 + $0x5a0] ss:$16 sps:$4 sm:$0xff]  }
 0x2e3   :  { %5437 = vmatprep.subr.bf16.mxu1 %v7177_v15  ;;  %v7259_v15 = vld [vmem:[#allocation8 + $0x5a8] ss:$16 sps:$4 sm:$0xff]  }
 0x2e5   :  { %5266 = vmatpush1.bf16.msra.mxu0 %v7172_v16  ;;  %v7264_v16 = vld [vmem:[#allocation8 + $0x5c4] ss:$16 sps:$4 sm:$0xff]  }
 0x2e6   :  { %5438 = vmatpush1.bf16.msra.mxu1 %v7175_v17  ;;  %5278 = vmatprep.subr.bf16.mxu0 %v7180_v18  ;;  %v7267_v17 = vld [vmem:[#allocation8 + $0x5cc] ss:$16 sps:$4 sm:$0xff]   ;;  %v7262_v18 = vld [vmem:[#allocation8 + $0x5c0] ss:$16 sps:$4 sm:$0xff]  }
 0x2e7   :  { %5450 = vmatprep.subr.bf16.mxu1 %v7183_v19  ;;  %v7265_v19 = vld [vmem:[#allocation8 + $0x5c8] ss:$16 sps:$4 sm:$0xff]  }
 0x2e8   :  { %5268 = vmatmul.mubr.bf16.vlgmr.msra.gmra.mrb[8].mxu0 %v7856_v32 }
 0x2e9   :  { %5440 = vmatmul.mubr.bf16.vlgmr.msra.gmra.mrb[8].mxu1 %v7856_v32  ;;  %5279 = vmatpush1.bf16.msra.mxu0 %v7178_v20  ;;  %v7199_v32 = vld [vmem:[#allocation8 + $0x468] ss:$16 sps:$4 sm:$0xff]   ;;  %v7270_v20 = vld [vmem:[#allocation8 + $0x5e4] ss:$16 sps:$4 sm:$0xff]  }
 0x2ea   :  { %5451 = vmatpush1.bf16.msra.mxu1 %v7181_v21  ;;  %5280 = vmatprep.subr.bf16.mxu0 %v7186_v22  ;;  %v7273_v21 = vld [vmem:[#allocation8 + $0x5ec] ss:$16 sps:$4 sm:$0xff]   ;;  %v7268_v22 = vld [vmem:[#allocation8 + $0x5e0] ss:$16 sps:$4 sm:$0xff]  }
 0x2eb   :  { %5452 = vmatprep.subr.bf16.mxu1 %v7189_v23  ;;  %v7271_v23 = vld [vmem:[#allocation8 + $0x5e8] ss:$16 sps:$4 sm:$0xff]  }
 0x2ed   :  { %5281 = vmatpush1.bf16.msra.mxu0 %v7184_v54  ;;  %v7276_v54 = vld [vmem:[#allocation8 + $0x604] ss:$16 sps:$4 sm:$0xff]  }
 0x2ee   :  { %5453 = vmatpush1.bf16.msra.mxu1 %v7187_v24  ;;  %5282 = vmatprep.subr.bf16.mxu0 %v7192_v25  ;;  %v7279_v24 = vld [vmem:[#allocation8 + $0x60c] ss:$16 sps:$4 sm:$0xff]   ;;  %v624_v25 = vsub.s32 4, %v7834_v56 }
 0x2ef   :  { %5454 = vmatprep.subr.bf16.mxu1 %v7195_v26  ;;  %v632_v26 = vsub.s32 6, %v7834_v56 }
 0x2f1   :  { %5283 = vmatpush1.bf16.msra.mxu0 %v7190_v27  ;;  %v628_v27 = vsub.s32 5, %v7834_v56 }
 0x2f2   :  { %5455 = vmatpush1.bf16.msra.mxu1 %v7193_v61  ;;  %5284 = vmatprep.subr.bf16.mxu0 %v7198_v28  ;;  %v636_v61 = vsub.s32 7, %v7834_v56  ;;  %v625_v28 = vrot.slane %v7837_v2, %v624_v25  ;;  %v7315_v25 = vld [vmem:[#allocation8 + $0x6cc] ss:$16 sps:$4 sm:$0xff]  }
 0x2f3   :  { %5456 = vmatprep.subr.bf16.mxu1 %v7201_v29  ;;  %v633_v29 = vrot.slane %v7837_v2, %v632_v26  ;;  %v7310_v26 = vld [vmem:[#allocation8 + $0x6c0] ss:$16 sps:$4 sm:$0xff]  }
 0x2f5   :  { %5285 = vmatpush1.bf16.msra.mxu0 %v7196_v30  ;;  %v629_v30 = vrot.slane %v7837_v2, %v628_v27  ;;  %v7313_v27 = vld [vmem:[#allocation8 + $0x6c8] ss:$16 sps:$4 sm:$0xff]  }
 0x2f6   :  { %5457 = vmatpush1.bf16.msra.mxu1 %v7199_v32  ;;  %5286 = vmatprep.subr.bf16.mxu0 %v7204_v31  ;;  %v637_v32 = vrot.slane %v7837_v2, %v636_v61  ;;  %v7318_v61 = vld [vmem:[#allocation8 + $0x6e4] ss:$16 sps:$4 sm:$0xff]  }
 0x2f7   :  { %5458 = vmatprep.subr.bf16.mxu1 %v7207_v33 }
 0x2f9   :  { %5287 = vmatpush1.bf16.msra.mxu0 %v7202_v34 }
 0x2fa   :  { %5459 = vmatpush1.bf16.msra.mxu1 %v7205_v35  ;;  %5288 = vmatprep.subr.bf16.mxu0 %v7210_v36 }
 0x2fb   :  { %5460 = vmatprep.subr.bf16.mxu1 %v7213_v37 }
 0x2fd   :  { %5289 = vmatpush1.bf16.msra.mxu0 %v7208_v38 }
 0x2fe   :  { %5461 = vmatpush1.bf16.msra.mxu1 %v7211_v39  ;;  %5290 = vmatprep.subr.bf16.mxu0 %v7216_v40 }
 0x2ff   :  { %5462 = vmatprep.subr.bf16.mxu1 %v7219_v41 }
 0x301   :  { %5291 = vmatpush1.bf16.msra.mxu0 %v7214_v42 }
 0x302   :  { %5463 = vmatpush1.bf16.msra.mxu1 %v7217_v43  ;;  %5292 = vmatprep.subr.bf16.mxu0 %v7222_v44 }
 0x303   :  { %5464 = vmatprep.subr.bf16.mxu1 %v7225_v45 }
 0x305   :  { %5293 = vmatpush1.bf16.msra.mxu0 %v7220_v46 }
 0x306   :  { %5465 = vmatpush1.bf16.msra.mxu1 %v7223_v47  ;;  %5294 = vmatprep.subr.bf16.mxu0 %v7228_v48 }
 0x307   :  { %5466 = vmatprep.subr.bf16.mxu1 %v7231_v49 }
 0x309   :  { %5295 = vmatpush1.bf16.msra.mxu0 %v7226_v50 }
 0x30a   :  { %5467 = vmatpush1.bf16.msra.mxu1 %v7229_v51  ;;  %5296 = vmatprep.subr.bf16.mxu0 %v7234_v52 }
 0x30b   :  { %5468 = vmatprep.subr.bf16.mxu1 %v7237_v53 }
 0x30d   :  { %5297 = vmatpush1.bf16.msra.mxu0 %v7232_v55 }
 0x30e   :  { %5469 = vmatpush1.bf16.msra.mxu1 %v7235_v57  ;;  %5298 = vmatprep.subr.bf16.mxu0 %v7240_v58 }
 0x30f   :  { %5470 = vmatprep.subr.bf16.mxu1 %v7243_v59 }
 0x311   :  { %5299 = vmatpush1.bf16.msra.mxu0 %v7238_v60  ;;  %v7274_v60 = vld [vmem:[#allocation8 + $0x600] ss:$16 sps:$4 sm:$0xff]  }
 0x312   :  { %5471 = vmatpush1.bf16.msra.mxu1 %v7241_v63  ;;  %5300 = vmatprep.subr.bf16.mxu0 %v7246_v0  ;;  %v7277_v63 = vld [vmem:[#allocation8 + $0x608] ss:$16 sps:$4 sm:$0xff]  }
 0x313   :  { %5472 = vmatprep.subr.bf16.mxu1 %v7249_v1  ;;  %v7282_v1 = vld [vmem:[#allocation8 + $0x624] ss:$16 sps:$4 sm:$0xff]  }
 0x315   :  { %5301 = vmatpush1.bf16.msra.mxu0 %v7244_v5  ;;  %v7285_v5 = vld [vmem:[#allocation8 + $0x62c] ss:$16 sps:$4 sm:$0xff]  }
 0x316   :  { %5473 = vmatpush1.bf16.msra.mxu1 %v7247_v7  ;;  %5302 = vmatprep.subr.bf16.mxu0 %v7252_v8  ;;  %v7280_v7 = vld [vmem:[#allocation8 + $0x620] ss:$16 sps:$4 sm:$0xff]   ;;  %v7283_v8 = vld [vmem:[#allocation8 + $0x628] ss:$16 sps:$4 sm:$0xff]  }
 0x317   :  { %5474 = vmatprep.subr.bf16.mxu1 %v7255_v9  ;;  %v7288_v9 = vld [vmem:[#allocation8 + $0x644] ss:$16 sps:$4 sm:$0xff]  }
 0x319   :  { %5303 = vmatpush1.bf16.msra.mxu0 %v7250_v10  ;;  %v7291_v10 = vld [vmem:[#allocation8 + $0x64c] ss:$16 sps:$4 sm:$0xff]  }
 0x31a   :  { %5475 = vmatpush1.bf16.msra.mxu1 %v7253_v11  ;;  %5304 = vmatprep.subr.bf16.mxu0 %v7258_v12  ;;  %v7286_v11 = vld [vmem:[#allocation8 + $0x640] ss:$16 sps:$4 sm:$0xff]   ;;  %v7289_v12 = vld [vmem:[#allocation8 + $0x648] ss:$16 sps:$4 sm:$0xff]  }
 0x31b   :  { %5476 = vmatprep.subr.bf16.mxu1 %v7261_v13  ;;  %v7294_v13 = vld [vmem:[#allocation8 + $0x664] ss:$16 sps:$4 sm:$0xff]  }
 0x31d   :  { %5305 = vmatpush1.bf16.msra.mxu0 %v7256_v14  ;;  %v7297_v14 = vld [vmem:[#allocation8 + $0x66c] ss:$16 sps:$4 sm:$0xff]  }
 0x31e   :  { %5477 = vmatpush1.bf16.msra.mxu1 %v7259_v15  ;;  %5306 = vmatprep.subr.bf16.mxu0 %v7264_v16  ;;  %v7292_v15 = vld [vmem:[#allocation8 + $0x660] ss:$16 sps:$4 sm:$0xff]   ;;  %v7295_v16 = vld [vmem:[#allocation8 + $0x668] ss:$16 sps:$4 sm:$0xff]  }
 0x31f   :  { %5478 = vmatprep.subr.bf16.mxu1 %v7267_v17  ;;  %v7300_v17 = vld [vmem:[#allocation8 + $0x684] ss:$16 sps:$4 sm:$0xff]  }
 0x321   :  { %5307 = vmatpush1.bf16.msra.mxu0 %v7262_v18  ;;  %v7303_v18 = vld [vmem:[#allocation8 + $0x68c] ss:$16 sps:$4 sm:$0xff]  }
 0x322   :  { %5479 = vmatpush1.bf16.msra.mxu1 %v7265_v19  ;;  %5308 = vmatprep.subr.bf16.mxu0 %v7270_v20  ;;  %v7298_v19 = vld [vmem:[#allocation8 + $0x680] ss:$16 sps:$4 sm:$0xff]   ;;  %v7301_v20 = vld [vmem:[#allocation8 + $0x688] ss:$16 sps:$4 sm:$0xff]  }
 0x323   :  { %5480 = vmatprep.subr.bf16.mxu1 %v7273_v21  ;;  %v7306_v21 = vld [vmem:[#allocation8 + $0x6a4] ss:$16 sps:$4 sm:$0xff]  }
 0x325   :  { %5309 = vmatpush1.bf16.msra.mxu0 %v7268_v22  ;;  %v7309_v22 = vld [vmem:[#allocation8 + $0x6ac] ss:$16 sps:$4 sm:$0xff]  }
 0x326   :  { %5481 = vmatpush1.bf16.msra.mxu1 %v7271_v23  ;;  %5321 = vmatprep.subr.bf16.mxu0 %v7276_v54  ;;  %v7304_v23 = vld [vmem:[#allocation8 + $0x6a0] ss:$16 sps:$4 sm:$0xff]   ;;  %v7307_v54 = vld [vmem:[#allocation8 + $0x6a8] ss:$16 sps:$4 sm:$0xff]  }
 0x327   :  { %5493 = vmatprep.subr.bf16.mxu1 %v7279_v24  ;;  %v7312_v24 = vld [vmem:[#allocation8 + $0x6c4] ss:$16 sps:$4 sm:$0xff]  }
 0x33b   :  { %v3429_v31 = vpop.f32.mrb[4].mxu0  ;;  %v3601_v34 = vpop.f32.mrb[4].mxu1 }
 0x33c   :  { %v6865_v33 = vadd.f32 %v3429_v31, %v625_v28  ;;  %v3431_v35 = vpop.f32.mrb[5].mxu0  ;;  %v6869_v36 = vadd.f32 %v3601_v34, %v633_v29  ;;  %v3603_v38 = vpop.f32.mrb[5].mxu1  ;;  %v7327_v31 = vld [vmem:[#allocation8 + $0x70c] ss:$16 sps:$4 sm:$0xff]   ;;  %v7325_v34 = vld [vmem:[#allocation8 + $0x708] ss:$16 sps:$4 sm:$0xff]  }
 0x33d   :  { %v6866_v37 = vadd.f32 %v3431_v35, %v629_v30  ;;  %v3433_v39 = vpop.f32.mrb[6].mxu0  ;;  %v6870_v40 = vadd.f32 %v3603_v38, %v637_v32  ;;  %v3605_v42 = vpop.f32.mrb[6].mxu1  ;;  %v7330_v35 = vld [vmem:[#allocation8 + $0x724] ss:$16 sps:$4 sm:$0xff]   ;;  %v7331_v38 = vld [vmem:[#allocation8 + $0x728] ss:$16 sps:$4 sm:$0xff]  }
 0x33e   :  { %v6867_v41 = vadd.f32 %v3433_v39, %v625_v28  ;;  %v3435_v43 = vpop.f32.mrb[7].mxu0  ;;  %v6871_v44 = vadd.f32 %v3605_v42, %v633_v29  ;;  %v3607_v46 = vpop.f32.mrb[7].mxu1  ;;  %v3614_v47 = vmax.f32 %v6865_v33, 0.0  ;;  %v3616_v50 = vmax.f32 %v6869_v36, 0.0  ;;  %v7321_v28 = vld [vmem:[#allocation8 + $0x6ec] ss:$16 sps:$4 sm:$0xff]  }
 0x33f   :  { %v6868_v45 = vadd.f32 %v3435_v43, %v629_v30  ;;  %v6872_v49 = vadd.f32 %v3607_v46, %v637_v32  ;;  %v3615_v2 = vmax.f32 %v6866_v37, 0.0  ;;  %v3617_v53 = vmax.f32 %v6870_v40, 0.0  ;;  %v7316_v29 = vld [vmem:[#allocation8 + $0x6e0] ss:$16 sps:$4 sm:$0xff]   ;;  %v7319_v30 = vld [vmem:[#allocation8 + $0x6e8] ss:$16 sps:$4 sm:$0xff]  }
 0x340   :  { %v3622_v48 = vmax.f32 %v6867_v41, 0.0  ;;  %v3624_v51 = vmax.f32 %v6871_v44, 0.0  ;;  %v7324_v32 = vld [vmem:[#allocation8 + $0x704] ss:$16 sps:$4 sm:$0xff]   ;;  %v7322_v33 = vld [vmem:[#allocation8 + $0x700] ss:$16 sps:$4 sm:$0xff]  }
 0x341   :  { %v3623_v52 = vmax.f32 %v6868_v45, 0.0  ;;  %v3625_v57 = vmax.f32 %v6872_v49, 0.0  ;;  %v7333_v36 = vld [vmem:[#allocation8 + $0x72c] ss:$16 sps:$4 sm:$0xff]   ;;  %v7328_v37 = vld [vmem:[#allocation8 + $0x720] ss:$16 sps:$4 sm:$0xff]  }
 0x342   :  { %v3630_v55 = vpack.c.bf16 %v3622_v48, %v3614_v47  ;;  %v7874_v58 = vpack.c.bf16 %v3624_v51, %v3616_v50  ;;  %v7336_v39 = vld [vmem:[#allocation8 + $0x744] ss:$16 sps:$4 sm:$0xff]   ;;  %v7339_v40 = vld [vmem:[#allocation8 + $0x74c] ss:$16 sps:$4 sm:$0xff]   ;;  %v7334_v41 = vld [vmem:[#allocation8 + $0x740] ss:$16 sps:$4 sm:$0xff]  }
 0x343   :  { %v3631_v59 = vpack.c.bf16 %v3623_v52, %v3615_v2  ;;  %v3633_v0 = vpack.c.bf16 %v3625_v57, %v3617_v53  ;;  %v7337_v42 = vld [vmem:[#allocation8 + $0x748] ss:$16 sps:$4 sm:$0xff]   ;;  %v7342_v43 = vld [vmem:[#allocation8 + $0x764] ss:$16 sps:$4 sm:$0xff]   ;;  %v7345_v44 = vld [vmem:[#allocation8 + $0x76c] ss:$16 sps:$4 sm:$0xff]  }
 0x344   :  { %v7340_v45 = vld [vmem:[#allocation8 + $0x760] ss:$16 sps:$4 sm:$0xff]   ;;  %v7343_v46 = vld [vmem:[#allocation8 + $0x768] ss:$16 sps:$4 sm:$0xff]   ;;  %v7348_v47 = vld [vmem:[#allocation8 + $0x784] ss:$16 sps:$4 sm:$0xff]  }
 0x345   :  { %5310 = vmatprep.mubr.bf16.mxu0 %v3631_v59  ;;  %5482 = vmatprep.mubr.bf16.mxu1 %v3631_v59  ;;  %v7351_v48 = vld [vmem:[#allocation8 + $0x78c] ss:$16 sps:$4 sm:$0xff]   ;;  %v7346_v49 = vld [vmem:[#allocation8 + $0x780] ss:$16 sps:$4 sm:$0xff]   ;;  %v7349_v50 = vld [vmem:[#allocation8 + $0x788] ss:$16 sps:$4 sm:$0xff]  }
 0x346   :  { %5311 = vmatmul.mubr.bf16.vlgmr.msra.gmra.mrb[8].mxu0 %v3630_v55  ;;  %5483 = vmatmul.mubr.bf16.vlgmr.msra.gmra.mrb[8].mxu1 %v3630_v55  ;;  %v7354_v2 = vld [vmem:[#allocation8 + $0x7a4] ss:$16 sps:$4 sm:$0xff]   ;;  %v7357_v51 = vld [vmem:[#allocation8 + $0x7ac] ss:$16 sps:$4 sm:$0xff]   ;;  %v7352_v52 = vld [vmem:[#allocation8 + $0x7a0] ss:$16 sps:$4 sm:$0xff]  }
 0x347   :  { %5322 = vmatpush1.bf16.msra.mxu0 %v7274_v60  ;;  %5494 = vmatpush1.bf16.msra.mxu1 %v7277_v63  ;;  %v7355_v53 = vld [vmem:[#allocation8 + $0x7a8] ss:$16 sps:$4 sm:$0xff]   ;;  %v7360_v55 = vld [vmem:[#allocation8 + $0x7c4] ss:$16 sps:$4 sm:$0xff]   ;;  %v7363_v57 = vld [vmem:[#allocation8 + $0x7cc] ss:$16 sps:$4 sm:$0xff]  }
 0x348   :  { %5353 = vmatprep.mubr.bf16.mxu0 %v3633_v0  ;;  %5525 = vmatprep.mubr.bf16.mxu1 %v3633_v0  ;;  %v7358_v59 = vld [vmem:[#allocation8 + $0x7c0] ss:$16 sps:$4 sm:$0xff]   ;;  %v7361_v60 = vld [vmem:[#allocation8 + $0x7c8] ss:$16 sps:$4 sm:$0xff]   ;;  %v7366_v63 = vld [vmem:[#allocation8 + $0x7e4] ss:$16 sps:$4 sm:$0xff]  }
 0x349   :  { %5323 = vmatprep.subr.bf16.mxu0 %v7282_v1  ;;  %5495 = vmatprep.subr.bf16.mxu1 %v7285_v5  ;;  %v7369_v0 = vld [vmem:[#allocation8 + $0x7ec] ss:$16 sps:$4 sm:$0xff]   ;;  %v7364_v1 = vld [vmem:[#allocation8 + $0x7e0] ss:$16 sps:$4 sm:$0xff]   ;;  %v7367_v5 = vld [vmem:[#allocation8 + $0x7e8] ss:$16 sps:$4 sm:$0xff]  }
 0x34b   :  { %5324 = vmatpush1.bf16.msra.mxu0 %v7280_v7  ;;  %5496 = vmatpush1.bf16.msra.mxu1 %v7283_v8  ;;  %v7370_v7 = vld [vmem:[#allocation11 + $0x40] sm:$0xff]  }
 0x34c   :  { %5325 = vmatprep.subr.bf16.mxu0 %v7288_v9  ;;  %5497 = vmatprep.subr.bf16.mxu1 %v7291_v10  ;;  %v7371_v8 = vld [vmem:[#allocation11 + $0xc0] sm:$0xff]  }
 0x34d   :  { %v7372_v9 = vld [vmem:[#allocation11] sm:$0xff]  }
 0x34e   :  { %v7373_v10 = vld [vmem:[#allocation11 + $0x80] sm:$0xff]  }
 0x34f   :  { %5326 = vmatpush1.bf16.msra.mxu0 %v7286_v11  ;;  %5498 = vmatpush1.bf16.msra.mxu1 %v7289_v12  ;;  %v7374_v11 = vld [vmem:[#allocation11 + $0x48] sm:$0xff]  }
 0x350   :  { %5327 = vmatprep.subr.bf16.mxu0 %v7294_v13  ;;  %5499 = vmatprep.subr.bf16.mxu1 %v7297_v14  ;;  %v7375_v12 = vld [vmem:[#allocation11 + $0xc8] sm:$0xff]  }
 0x351   :  { %v7376_v13 = vld [vmem:[#allocation11 + $0x8] sm:$0xff]  }
 0x352   :  { %v7377_v14 = vld [vmem:[#allocation11 + $0x88] sm:$0xff]  }
 0x353   :  { %5328 = vmatpush1.bf16.msra.mxu0 %v7292_v15  ;;  %5500 = vmatpush1.bf16.msra.mxu1 %v7295_v16  ;;  %v7378_v15 = vld [vmem:[#allocation11 + $0x50] sm:$0xff]  }
 0x354   :  { %5329 = vmatprep.subr.bf16.mxu0 %v7300_v17  ;;  %5501 = vmatprep.subr.bf16.mxu1 %v7303_v18  ;;  %v7379_v16 = vld [vmem:[#allocation11 + $0xd0] sm:$0xff]  }
 0x355   :  { %v7380_v17 = vld [vmem:[#allocation11 + $0x10] sm:$0xff]  }
 0x356   :  { %v7381_v18 = vld [vmem:[#allocation11 + $0x90] sm:$0xff]  }
 0x357   :  { %5330 = vmatpush1.bf16.msra.mxu0 %v7298_v19  ;;  %5502 = vmatpush1.bf16.msra.mxu1 %v7301_v20  ;;  %v7382_v19 = vld [vmem:[#allocation11 + $0x58] sm:$0xff]  }
 0x358   :  { %5331 = vmatprep.subr.bf16.mxu0 %v7306_v21  ;;  %5503 = vmatprep.subr.bf16.mxu1 %v7309_v22  ;;  %v7383_v20 = vld [vmem:[#allocation11 + $0xd8] sm:$0xff]   ;;  %v7386_v22 = vld [vmem:[#allocation11 + $0x60] sm:$0xff]  }
 0x359   :  { %v7384_v21 = vld [vmem:[#allocation11 + $0x18] sm:$0xff]  }
 0x35b   :  { %5332 = vmatpush1.bf16.msra.mxu0 %v7304_v23  ;;  %5504 = vmatpush1.bf16.msra.mxu1 %v7307_v54  ;;  %v7387_v23 = vld [vmem:[#allocation11 + $0xe0] sm:$0xff]  }
 0x35c   :  { %5333 = vmatprep.subr.bf16.mxu0 %v7312_v24  ;;  %5505 = vmatprep.subr.bf16.mxu1 %v7315_v25  ;;  %v7388_v54 = vld [vmem:[#allocation11 + $0x20] sm:$0xff]   ;;  %v7390_v25 = vld [vmem:[#allocation11 + $0x68] sm:$0xff]  }
 0x35d   :  { %v7389_v24 = vld [vmem:[#allocation11 + $0xa0] sm:$0xff]  }
 0x35f   :  { %5334 = vmatpush1.bf16.msra.mxu0 %v7310_v26  ;;  %5506 = vmatpush1.bf16.msra.mxu1 %v7313_v27  ;;  %v7391_v26 = vld [vmem:[#allocation11 + $0xe8] sm:$0xff]  }
 0x360   :  { %5335 = vmatprep.subr.bf16.mxu0 %v7318_v61  ;;  %5507 = vmatprep.subr.bf16.mxu1 %v7321_v28  ;;  %v7392_v27 = vld [vmem:[#allocation11 + $0x28] sm:$0xff]   ;;  %v7394_v28 = vld [vmem:[#allocation11 + $0x70] sm:$0xff]  }
 0x361   :  { %v7393_v61 = vld [vmem:[#allocation11 + $0xa8] sm:$0xff]  }
 0x363   :  { %5336 = vmatpush1.bf16.msra.mxu0 %v7316_v29  ;;  %5508 = vmatpush1.bf16.msra.mxu1 %v7319_v30  ;;  %v7395_v29 = vld [vmem:[#allocation11 + $0xf0] sm:$0xff]  }
 0x364   :  { %5337 = vmatprep.subr.bf16.mxu0 %v7324_v32  ;;  %5509 = vmatprep.subr.bf16.mxu1 %v7327_v31  ;;  %v7396_v30 = vld [vmem:[#allocation11 + $0x30] sm:$0xff]   ;;  %v7398_v31 = vld [vmem:[#allocation11 + $0x78] sm:$0xff]  }
 0x365   :  { %v7397_v32 = vld [vmem:[#allocation11 + $0xb0] sm:$0xff]  }
 0x367   :  { %5338 = vmatpush1.bf16.msra.mxu0 %v7322_v33  ;;  %5510 = vmatpush1.bf16.msra.mxu1 %v7325_v34  ;;  %v7399_v33 = vld [vmem:[#allocation11 + $0xf8] sm:$0xff]  }
 0x368   :  { %5339 = vmatprep.subr.bf16.mxu0 %v7330_v35  ;;  %5511 = vmatprep.subr.bf16.mxu1 %v7333_v36  ;;  %v7400_v34 = vld [vmem:[#allocation11 + $0x38] sm:$0xff]   ;;  %v7667_v36 = vmov 0.0  }
 0x369   :  { %v7401_v35 = vld [vmem:[#allocation11 + $0xb8] sm:$0xff]  }
 0x36b   :  { %5340 = vmatpush1.bf16.msra.mxu0 %v7328_v37  ;;  %5512 = vmatpush1.bf16.msra.mxu1 %v7331_v38  ;;  %v3890_v37 = vld [vmem:[#allocation10] sm:$0xf] }
 0x36c   :  { %5341 = vmatprep.subr.bf16.mxu0 %v7336_v39  ;;  %5513 = vmatprep.subr.bf16.mxu1 %v7339_v40  ;;  %v3895_v38 = vrot.slane %v3890_v37, %v608_v62  ;;  %v3903_v39 = vrot.slane %v3890_v37, %v616_v3  ;;  %v3899_v40 = vrot.slane %v3890_v37, %v612_v4 }
 0x36f   :  { %5342 = vmatpush1.bf16.msra.mxu0 %v7334_v41  ;;  %5514 = vmatpush1.bf16.msra.mxu1 %v7337_v42  ;;  %v3907_v41 = vrot.slane %v3890_v37, %v620_v6 }
 0x370   :  { %5343 = vmatprep.subr.bf16.mxu0 %v7342_v43  ;;  %5515 = vmatprep.subr.bf16.mxu1 %v7345_v44 }
 0x373   :  { %5344 = vmatpush1.bf16.msra.mxu0 %v7340_v45  ;;  %5516 = vmatpush1.bf16.msra.mxu1 %v7343_v46 }
 0x374   :  { %5345 = vmatprep.subr.bf16.mxu0 %v7348_v47  ;;  %5517 = vmatprep.subr.bf16.mxu1 %v7351_v48 }
 0x377   :  { %5346 = vmatpush1.bf16.msra.mxu0 %v7346_v49  ;;  %5518 = vmatpush1.bf16.msra.mxu1 %v7349_v50 }
 0x378   :  { %5347 = vmatprep.subr.bf16.mxu0 %v7354_v2  ;;  %5519 = vmatprep.subr.bf16.mxu1 %v7357_v51 }
 0x37b   :  { %5348 = vmatpush1.bf16.msra.mxu0 %v7352_v52  ;;  %5520 = vmatpush1.bf16.msra.mxu1 %v7355_v53 }
 0x37c   :  { %5349 = vmatprep.subr.bf16.mxu0 %v7360_v55  ;;  %5521 = vmatprep.subr.bf16.mxu1 %v7363_v57 }
 0x37f   :  { %5350 = vmatpush1.bf16.msra.mxu0 %v7358_v59  ;;  %5522 = vmatpush1.bf16.msra.mxu1 %v7361_v60 }
 0x380   :  { %5351 = vmatprep.subr.bf16.mxu0 %v7366_v63  ;;  %5523 = vmatprep.subr.bf16.mxu1 %v7369_v0 }
 0x383   :  { %5352 = vmatpush1.bf16.msra.mxu0 %v7364_v1  ;;  %5524 = vmatpush1.bf16.msra.mxu1 %v7367_v5 }
 0x384   :  { %6784 = vmatprep.subr.bf16.mxu0 %v7370_v7  ;;  %6806 = vmatprep.subr.bf16.mxu1 %v7371_v8 }
 0x386   :  { %5354 = vmatmul.mubr.bf16.vlgmr.msra.gmra.mrb[8].mxu0 %v7874_v58  ;;  %5526 = vmatmul.mubr.bf16.vlgmr.msra.gmra.mrb[8].mxu1 %v7874_v58  ;;  %v7385_v58 = vld [vmem:[#allocation11 + $0x98] sm:$0xff]  }
 0x387   :  { %6785 = vmatpush3.bf16.msra.mxu0 %v7372_v9  ;;  %6807 = vmatpush3.bf16.msra.mxu1 %v7373_v10  ;;  %v7402_v9 = vld [vmem:[#allocation14] sm:$0xff]   ;;  %v7403_v10 = vld [vmem:[#allocation14 + $0x8] sm:$0xff]  }
 0x388   :  { %6786 = vmatprep.subr.bf16.mxu0 %v7374_v11  ;;  %6808 = vmatprep.subr.bf16.mxu1 %v7375_v12  ;;  %v7404_v11 = vld [vmem:[#allocation14 + $0x10] sm:$0xff]   ;;  %v7405_v12 = vld [vmem:[#allocation14 + $0x18] sm:$0xff]  }
 0x38b   :  { %6787 = vmatpush3.bf16.msra.mxu0 %v7376_v13  ;;  %6809 = vmatpush3.bf16.msra.mxu1 %v7377_v14  ;;  %v7406_v13 = vld [vmem:[#allocation14 + $0x20] sm:$0xff]   ;;  %v7407_v14 = vld [vmem:[#allocation14 + $0x28] sm:$0xff]  }
 0x38c   :  { %6788 = vmatprep.subr.bf16.mxu0 %v7378_v15  ;;  %6810 = vmatprep.subr.bf16.mxu1 %v7379_v16  ;;  %v7408_v15 = vld [vmem:[#allocation14 + $0x30] sm:$0xff]   ;;  %v7409_v16 = vld [vmem:[#allocation14 + $0x38] sm:$0xff]  }
 0x38f   :  { %6789 = vmatpush3.bf16.msra.mxu0 %v7380_v17  ;;  %6811 = vmatpush3.bf16.msra.mxu1 %v7381_v18 }
 0x390   :  { %6790 = vmatprep.subr.bf16.mxu0 %v7382_v19  ;;  %6812 = vmatprep.subr.bf16.mxu1 %v7383_v20  ;;  %v6742_v19 = vld [vmem:[#allocation13] ss:$0 sm:$0xff] }
 0x393   :  { %6791 = vmatpush3.bf16.msra.mxu0 %v7384_v21  ;;  %6813 = vmatpush3.bf16.msra.mxu1 %v7385_v58 }
 0x394   :  { %6792 = vmatprep.subr.bf16.mxu0 %v7386_v22  ;;  %6814 = vmatprep.subr.bf16.mxu1 %v7387_v23 }
 0x397   :  { %6793 = vmatpush3.bf16.msra.mxu0 %v7388_v54  ;;  %6815 = vmatpush3.bf16.msra.mxu1 %v7389_v24 }
 0x398   :  { %6794 = vmatprep.subr.bf16.mxu0 %v7390_v25  ;;  %6816 = vmatprep.subr.bf16.mxu1 %v7391_v26 }
 0x39b   :  { %6795 = vmatpush3.bf16.msra.mxu0 %v7392_v27  ;;  %6817 = vmatpush3.bf16.msra.mxu1 %v7393_v61 }
 0x39c   :  { %6796 = vmatprep.subr.bf16.mxu0 %v7394_v28  ;;  %6818 = vmatprep.subr.bf16.mxu1 %v7395_v29 }
 0x39f   :  { %6797 = vmatpush3.bf16.msra.mxu0 %v7396_v30  ;;  %6819 = vmatpush3.bf16.msra.mxu1 %v7397_v32 }
 0x3a0   :  { %6798 = vmatprep.subr.bf16.mxu0 %v7398_v31  ;;  %6820 = vmatprep.subr.bf16.mxu1 %v7399_v33 }
 0x3a3   :  { %6799 = vmatpush3.bf16.msra.mxu0 %v7400_v34  ;;  %6821 = vmatpush3.bf16.msra.mxu1 %v7401_v35  ;;  %v6775_v34 = vld [vmem:[#allocation16] ss:$0 sm:$0xff] }
 0x3a4   :  { %6837 = vmatprep.subr.bf16.mxu0 %v7667_v36 }
 0x459   :  { %v5355_v42 = vpop.f32.mrb[8].mxu0  ;;  %v5527_v43 = vpop.f32.mrb[8].mxu1 }
 0x45a   :  { %v6873_v44 = vadd.f32 %v5355_v42, %v3895_v38  ;;  %v6877_v45 = vadd.f32 %v5527_v43, %v3903_v39  ;;  %v5357_v46 = vpop.f32.mrb[9].mxu0  ;;  %v5529_v47 = vpop.f32.mrb[9].mxu1 }
 0x45b   :  { %v6874_v48 = vadd.f32 %v5357_v46, %v3899_v40  ;;  %v6878_v49 = vadd.f32 %v5529_v47, %v3907_v41  ;;  %v5359_v50 = vpop.f32.mrb[10].mxu0  ;;  %v5531_v2 = vpop.f32.mrb[10].mxu1 }
 0x45c   :  { %v6875_v62 = vadd.f32 %v5359_v50, %v3895_v38  ;;  %v6879_v51 = vadd.f32 %v5531_v2, %v3903_v39  ;;  %v5361_v52 = vpop.f32.mrb[11].mxu0  ;;  %v5533_v3 = vpop.f32.mrb[11].mxu1  ;;  %v5536_v4 = vmax.f32 %v6873_v44, 0.0  ;;  %v5538_v57 = vmax.f32 %v6877_v45, 0.0 }
 0x45d   :  { %v6876_v53 = vadd.f32 %v5361_v52, %v3899_v40  ;;  %v6880_v55 = vadd.f32 %v5533_v3, %v3907_v41  ;;  %v5537_v59 = vmax.f32 %v6874_v48, 0.0  ;;  %v5539_v60 = vmax.f32 %v6878_v49, 0.0 }
 0x45e   :  { %v5540_v56 = vmax.f32 %v6875_v62, 0.0  ;;  %v5542_v6 = vmax.f32 %v6879_v51, 0.0 }
 0x45f   :  { %v5541_v63 = vmax.f32 %v6876_v53, 0.0  ;;  %v5543_v0 = vmax.f32 %v6880_v55, 0.0 }
 0x460   :  { %v5544_v1 = vpack.c.bf16 %v5540_v56, %v5536_v4  ;;  %v5546_v5 = vpack.c.bf16 %v5542_v6, %v5538_v57 }
 0x461   :  { %v5545_v7 = vpack.c.bf16 %v5541_v63, %v5537_v59  ;;  %v5547_v8 = vpack.c.bf16 %v5543_v0, %v5539_v60 }
 0x463   :  { %5843 = vmatprep.mubr.bf16.mxu0 %v5545_v7  ;;  %5884 = vmatprep.mubr.bf16.mxu1 %v5547_v8 }
 0x464   :  { %5844 = vmatmul.mubr.bf16.vlgmr.msra.gmra.mrb[12].mxu0 %v5544_v1  ;;  %5885 = vmatmul.mubr.bf16.vlgmr.msra.gmra.mrb[12].mxu1 %v5546_v5 }
 0x465   :  { %6838 = vmatpush3.bf16.msra.mxu0 %v7402_v9  ;;  %6853 = vmatprep.mubr.msk.bf16.mxu0 %vm7668_vm0, %v7667_v36 }
 0x466   :  { %6839 = vmatprep.subr.bf16.mxu0 %v7667_v36 }
 0x469   :  { %6840 = vmatpush3.bf16.msra.mxu0 %v7403_v10 }
 0x46a   :  { %6841 = vmatprep.subr.bf16.mxu0 %v7667_v36 }
 0x46d   :  { %6842 = vmatpush3.bf16.msra.mxu0 %v7404_v11 }
 0x46e   :  { %6843 = vmatprep.subr.bf16.mxu0 %v7667_v36 }
 0x471   :  { %6844 = vmatpush3.bf16.msra.mxu0 %v7405_v12 }
 0x472   :  { %6845 = vmatprep.subr.bf16.mxu0 %v7667_v36 }
 0x475   :  { %6846 = vmatpush3.bf16.msra.mxu0 %v7406_v13 }
 0x476   :  { %6847 = vmatprep.subr.bf16.mxu0 %v7667_v36 }
 0x479   :  { %6848 = vmatpush3.bf16.msra.mxu0 %v7407_v14 }
 0x47a   :  { %6849 = vmatprep.subr.bf16.mxu0 %v7667_v36 }
 0x47d   :  { %6850 = vmatpush3.bf16.msra.mxu0 %v7408_v15 }
 0x47e   :  { %6851 = vmatprep.subr.bf16.mxu0 %v7667_v36 }
 0x481   :  { %6852 = vmatpush3.bf16.msra.mxu0 %v7409_v16 }
 0x537   :  { %v6800_v17 = vpop.f32.mrb[12].mxu0  ;;  %v6822_v18 = vpop.f32.mrb[12].mxu1 }
 0x538   :  { %v6801_v20 = vpop.f32.mrb[13].mxu0  ;;  %v6823_v21 = vpop.f32.mrb[13].mxu1 }
 0x539   :  { %v6802_v58 = vadd.f32 %v6801_v20, %v6800_v17  ;;  %v6824_v22 = vadd.f32 %v6823_v21, %v6822_v18  ;;  %v6803_v23 = vpop.f32.mrb[14].mxu0  ;;  %v6825_v54 = vpop.f32.mrb[14].mxu1 }
 0x53a   :  { %v6804_v24 = vpop.f32.mrb[15].mxu0  ;;  %v6826_v25 = vpop.f32.mrb[15].mxu1 }
 0x53b   :  { %v5846_v26 = vadd.f32 %v6802_v58, %v6742_v19  ;;  %v6805_v27 = vadd.f32 %v6804_v24, %v6803_v23  ;;  %v6827_v61 = vadd.f32 %v6826_v25, %v6825_v54 }
 0x53d   :  { %v5887_v28 = vadd.f32 %v6824_v22, %v5846_v26  ;;  %v5849_v29 = vadd.f32 %v6805_v27, %v6742_v19 }
 0x53f   :  { %v5890_v30 = vadd.f32 %v6827_v61, %v5849_v29  ;;  %v5893_v32 = vmax.f32 %v5887_v28, 0.0 }
 0x541   :  { %v5894_v31 = vmax.f32 %v5890_v30, 0.0 }
 0x543   :  { %v5895_v33 = vpack.c.bf16 %v5894_v31, %v5893_v32 }
 0x545   :  { %6854 = vmatmul.mubr.bf16.vlgmr.msra.gmra.mrb[16].mxu0 %v5895_v33 }
 0x618   :  { %v6001_v35 = vpop.f32.mrb[16].mxu0 }
 0x619   :  { %v6002_v36 = vadd.f32 %v6775_v34, %v6001_v35  ;;  %v6855_v37 = vpop.f32.mrb[17].mxu0 }
 0x61a   :  { %v6004_v38 = vpop.f32.mrb[18].mxu0 }
 0x61b   :  { %6008 = vst [vmem:[#allocation17] sm:$0xff] %v6002_v36  ;;  %v6005_v39 = vadd.f32 %v6775_v34, %v6004_v38  ;;  %v6856_v40 = vpop.f32.mrb[19].mxu0 }
 0x61d   :  { %6009 = vst [vmem:[#allocation17 + $0x8] sm:$0xff] %v6005_v39 }
 0x61e   :  { %7626 = shalt.err (!%p7623_p6)
}
 0x61f   :  { %s7627_s24 = scalar_lea.hbm %s7916_s9, 256 }
 0x620   :  { %p7628_p7 = scmp.ne.s32.totalorder %s7916_s9, %s7627_s24  ;;  %p7631_p8 = scmp.lt.u32.totalorder %s7627_s24, %s7916_s9 }
 0x622   :  { %p7633_p9 = pnand %p7631_p8, %p7628_p7 }
 0x624   :  { %7636 = shalt.err (!%p7633_p9)
}
 0x625   :  { %s7670_s10 = smov 128   ;;  %s7671_s13 = smov 8  }
 0x626   :  { %6021 = dma.vmem_to_hbm [thread:$0]  %s6016_s27, 256, %s7916_s9, [#allocation4], %s7670_s10, %s7670_s10, %s7671_s13  }
 0x627   :  { %7647 = dma.done.wait [#allocation4], 256  }
 0x628   :  { %7648 = vsyncadd [#allocation4], 4294967040 }
 0x629   :  { %6025 = vsyncpa [#allocation3], 1 }
 0x62a   :  { %6026 = vsyncpa [#allocation6], 1 }
 0x62b   :  { %6027 = vsyncpa [#allocation9], 1 }
 0x62c   :  { %6028 = vsyncpa [#allocation12], 1 }
 0x62d   :  { %6029 = vsyncpa [#allocation15], 1 }
 0x62e   :  { %6030 = vsyncpa [#allocation4], 1 }

</bundles_post_ra>
